<compile_context>
chip_gen: v6e
topology: v6e:2x2x1
jax: 0.10.0
libtpu: 0.0.40
codegen_flags: <defaults>
</compile_context>

<pallas_src>
import functools

import jax
import jax.numpy as jnp
from jax.experimental import pallas as pl
from jax.experimental.pallas import tpu as pltpu


def _round_up(x, m):
    return (x + m - 1) // m * m


def _vmem_limit_bytes():
    """Generation-aware VMEM limit: ~75% of physical, clamped to a safe range."""
    cap = None
    try:
        cap = getattr(pltpu.get_tpu_info(), "vmem_capacity_bytes", None)
    except Exception:
        cap = None
    if not cap:
        cap = 64 * 1024 * 1024  # conservative fallback (v7x-sized)
    return int(max(32 * 1024 * 1024, min(cap * 3 // 4, 100 * 1024 * 1024)))


_VMEM_LIMIT = _vmem_limit_bytes()


# ----------------------------------------------------------------------------
# Pallas kernel 1: tiled matmul with fused epilogue
#   out = relu?( A @ B + bias ) * scale + shift   (bias/scale/shift per column,
#   packed into one (3, N) operand: rows = [bias, scale, shift])
# ----------------------------------------------------------------------------
def _mm_kernel(a_ref, b_ref, eps_ref, o_ref, acc_ref, *, apply_relu):
    k = pl.program_id(2)
    prod = jnp.dot(a_ref[...], b_ref[...], preferred_element_type=jnp.float32)

    @pl.when(k == 0)
    def _():
        acc_ref[...] = prod        # direct write, no zero-init pass

    @pl.when(k != 0)
    def _():
        acc_ref[...] += prod

    @pl.when(k == pl.num_programs(2) - 1)
    def _():
        y = acc_ref[...] + eps_ref[0:1, :]
        if apply_relu:
            y = jnp.maximum(y, 0.0)
        y = y * eps_ref[1:2, :] + eps_ref[2:3, :]
        o_ref[...] = y.astype(o_ref.dtype)


def fused_matmul(a, b, bias, scale, shift, apply_relu, out_dtype=jnp.bfloat16):
    """(M,K) @ (K,N) in bf16 on the MXU, f32 accumulate, fused epilogue."""
    M, K = a.shape
    Kb, N = b.shape
    assert K == Kb
    TM = min(1024, _round_up(M, 8))
    Kp = _round_up(K, 128)
    Np = _round_up(N, 128)
    TK = 256 if Kp % 256 == 0 else 128
    TN = 256 if Np % 256 == 0 else 128
    Mp = _round_up(M, TM)

    a = a.astype(jnp.bfloat16)
    b = b.astype(jnp.bfloat16)
    if (Mp, Kp) != (M, K):
        a = jnp.pad(a, ((0, Mp - M), (0, Kp - K)))
    if (Kp, Np) != (K, N):
        b = jnp.pad(b, ((0, Kp - K), (0, Np - N)))

    def _padv(v):
        v = v.astype(jnp.float32)
        return jnp.pad(v, (0, Np - N)) if Np != N else v

    eps = jnp.stack([_padv(bias), _padv(scale), _padv(shift)])  # (3, Np) f32

    out = pl.pallas_call(
        functools.partial(_mm_kernel, apply_relu=apply_relu),
        out_shape=jax.ShapeDtypeStruct((Mp, Np), out_dtype),
        grid_spec=pltpu.PrefetchScalarGridSpec(
            num_scalar_prefetch=0,
            grid=(Mp // TM, Np // TN, Kp // TK),
            in_specs=[
                pl.BlockSpec((TM, TK), lambda i, j, k: (i, k)),
                pl.BlockSpec((TK, TN), lambda i, j, k: (k, j)),
                pl.BlockSpec((3, TN), lambda i, j, k: (0, j)),
            ],
            out_specs=pl.BlockSpec((TM, TN), lambda i, j, k: (i, j)),
            scratch_shapes=[pltpu.VMEM((TM, TN), jnp.float32)],
        ),
        compiler_params=pltpu.CompilerParams(
            dimension_semantics=("parallel", "parallel", "arbitrary"),
            vmem_limit_bytes=_VMEM_LIMIT),
    )(a, b, eps)
    if (Mp, Np) != (M, N):
        out = out[:M, :N]
    return out


# ----------------------------------------------------------------------------
# Pallas kernel 2: direct 3x3x3 conv
#
# A operand : padded activation per batch, kw taps pre-expanded into the lane dim
#             ((kw, cin) flattened -> K3 = 3*C128), (d,h,w) flattened with an
#             8-aligned row stride Wr and zero halo rows of (Hp+1)*Wr on each side:
#             shape (B, S_ext, K3), bf16.
# B operand : weights rearranged to (9*K3, Coutp) = ((kd,kh),(kw,cin)) x cout, bf16.
# Grid      : (B, Coutp // TN) -- no reduction axis; weights are HBM-read once per batch.
# Per (kd,kh) tap the kernel does one shifted-window matmul; every window start is a
# multiple of 8 sublanes, so no relayout copies are needed.  Output is computed on the
# padded (Dp,Hp,Wr) grid; garbage border rows are cropped in the wrapper.
# ----------------------------------------------------------------------------
def _conv3x3_kernel(a_ref, w_ref, eps_ref, o_ref, *,
                    k3, s_rows, chunk, hp_wr, wr, apply_relu):
    halo = hp_wr + wr
    bias = eps_ref[0:1, :]
    scale = eps_ref[1:2, :]
    shift = eps_ref[2:3, :]
    for c0 in range(0, s_rows, chunk):                 # static row-chunk loop
        rows = min(chunk, s_rows - c0)
        acc = None
        for t in range(9):                             # statically unrolled (kd, kh) taps
            kd, kh = t // 3, t % 3
            off = halo + c0 + (kd - 1) * hp_wr + (kh - 1) * wr   # 8-aligned
            a_win = a_ref[0, off:off + rows, :]                  # (rows, K3) bf16
            w_tap = w_ref[t * k3:(t + 1) * k3, :]                # (K3, TN)   bf16
            prod = jnp.dot(a_win, w_tap, preferred_element_type=jnp.float32)
            acc = prod if acc is None else acc + prod
        y = acc + bias
        if apply_relu:
            y = jnp.maximum(y, 0.0)
        y = y * scale + shift
        o_ref[0, c0:c0 + rows, :] = y.astype(o_ref.dtype)


def conv3d_3x3x3(x, w, b, scale=None, shift=None, relu=False, out_dtype=jnp.bfloat16):
    """3x3x3 conv, stride 1, padding 1.  x: (B,D,H,W,Cin), w: (Cout,Cin,3,3,3)."""
    B, D, H, W, Cin = x.shape
    Cout = w.shape[0]
    if scale is None:
        scale = jnp.ones((Cout,), jnp.float32)
    if shift is None:
        shift = jnp.zeros((Cout,), jnp.float32)

    C128 = _round_up(Cin, 128)
    Coutp = _round_up(Cout, 128)
    K3 = 3 * C128
    # Wider Cout tiles only when the all-tap weight double-buffer stays small.
    TN = 256 if (Coutp % 256 == 0 and C128 <= 512) else 128

    Dp, Hp, Wp = D + 2, H + 2, W + 2
    Wr = _round_up(Wp, 8)              # 8-aligned row stride
    HpWr = Hp * Wr
    S = Dp * HpWr                      # rows of the padded output grid (multiple of 8)
    halo = HpWr + Wr                   # covers the most negative (kd,kh) offset
    S_ext = S + 2 * halo
    chunk = min(S, 2048)

    # --- A: kw taps expanded into the lane dim, halo rows added, bf16 ---
    xb = x.astype(jnp.bfloat16)
    xp = jnp.pad(xb, ((0, 0), (1, 1), (1, 1), (2, 2), (0, C128 - Cin)))
    cols = [xp[:, :, :, kw:kw + Wp, :] for kw in range(3)]      # each (B,Dp,Hp,Wp,C128)
    a = jnp.stack(cols, axis=4).reshape(B, Dp, Hp, Wp, K3)
    a = jnp.pad(a, ((0, 0), (0, 0), (0, 0), (0, Wr - Wp), (0, 0)))
    a = a.reshape(B, S, K3)
    a = jnp.pad(a, ((0, 0), (halo, halo), (0, 0)))              # (B, S_ext, K3)

    # --- weights: ((kd,kh), (kw,cin)) x cout, bf16 ---
    wt = jnp.transpose(w, (2, 3, 4, 1, 0)).astype(jnp.bfloat16)  # (3,3,3,Cin,Cout)
    wt = jnp.pad(wt, ((0, 0), (0, 0), (0, 0), (0, C128 - Cin), (0, Coutp - Cout)))
    wm = wt.reshape(9 * K3, Coutp)

    # --- epilogue operand: rows = [bias, scale, shift], f32 ---
    def _padc(v):
        return jnp.pad(v.astype(jnp.float32), (0, Coutp - Cout))
    eps = jnp.stack([_padc(b), _padc(scale), _padc(shift)])      # (3, Coutp)

    kernel = functools.partial(_conv3x3_kernel, k3=K3, s_rows=S, chunk=chunk,
                               hp_wr=HpWr, wr=Wr, apply_relu=relu)
    out = pl.pallas_call(
        kernel,
        out_shape=jax.ShapeDtypeStruct((B, S, Coutp), out_dtype),
        grid_spec=pltpu.PrefetchScalarGridSpec(
            num_scalar_prefetch=0,
            grid=(B, Coutp // TN),
            in_specs=[
                pl.BlockSpec((1, S_ext, K3), lambda bb, j: (bb, 0, 0)),
                pl.BlockSpec((9 * K3, TN), lambda bb, j: (0, j)),
                pl.BlockSpec((3, TN), lambda bb, j: (0, j)),
            ],
            out_specs=pl.BlockSpec((1, S, TN), lambda bb, j: (bb, 0, j)),
        ),
        compiler_params=pltpu.CompilerParams(
            dimension_semantics=("parallel", "parallel"),
            vmem_limit_bytes=_VMEM_LIMIT),
    )(a, wm, eps)

    out = out.reshape(B, Dp, Hp, Wr, Coutp)
    return out[:, 1:1 + D, 1:1 + H, 1:1 + W, :Cout]


# ----------------------------------------------------------------------------
# Other layer wrappers
# ----------------------------------------------------------------------------
def conv3d_1x1x1(x, w, b, scale=None, shift=None, relu=False, out_dtype=jnp.bfloat16):
    """1x1x1 conv.  w: (Cout,Cin,1,1,1)."""
    B, D, H, W, Cin = x.shape
    Cout = w.shape[0]
    if scale is None:
        scale = jnp.ones((Cout,), jnp.float32)
    if shift is None:
        shift = jnp.zeros((Cout,), jnp.float32)
    a = x.reshape(B * D * H * W, Cin)
    wm = w.reshape(Cout, Cin).T
    y = fused_matmul(a, wm, b, scale, shift, relu, out_dtype=out_dtype)
    return y.reshape(B, D, H, W, Cout)


def conv_transpose3d_2x2x2(x, w, b):
    """ConvTranspose3d(kernel=2, stride=2).  w: (Cin,Cout,2,2,2) torch layout."""
    B, D, H, W, Cin = x.shape
    Cout = w.shape[1]
    a = x.reshape(B * D * H * W, Cin)
    wm = jnp.transpose(w, (0, 2, 3, 4, 1)).reshape(Cin, 8 * Cout)
    bias = jnp.tile(b, 8)
    ones = jnp.ones((8 * Cout,), jnp.float32)
    zeros = jnp.zeros((8 * Cout,), jnp.float32)
    y = fused_matmul(a, wm, bias, ones, zeros, False, out_dtype=jnp.bfloat16)
    y = y.reshape(B, D, H, W, 2, 2, 2, Cout)
    y = jnp.transpose(y, (0, 1, 4, 2, 5, 3, 6, 7))
    return y.reshape(B, 2 * D, 2 * H, 2 * W, Cout)


def maxpool3d_2(x):
    B, D, H, W, C = x.shape
    return x.reshape(B, D // 2, 2, H // 2, 2, W // 2, 2, C).max(axis=(2, 4, 6))


# ----------------------------------------------------------------------------
# Deterministic parameter initialization (shapes follow the PyTorch module)
# ----------------------------------------------------------------------------
def _conv_init(key, cout, cin, k):
    kw, kb = jax.random.split(key)
    fan_in = cin * k * k * k
    w = jax.random.normal(kw, (cout, cin, k, k, k), jnp.float32) / jnp.sqrt(float(fan_in))
    b = 0.01 * jax.random.normal(kb, (cout,), jnp.float32)
    return w, b


def _bn_init(key, c):
    kg, kb = jax.random.split(key)
    gamma = 1.0 + 0.1 * jax.random.normal(kg, (c,), jnp.float32)
    beta = 0.1 * jax.random.normal(kb, (c,), jnp.float32)
    eps = 1e-5
    scale = gamma / jnp.sqrt(1.0 + eps)  # running_var=1, running_mean=0 (eval mode)
    shift = beta
    return scale, shift


def _convT_init(key, cin, cout):
    kw, kb = jax.random.split(key)
    w = jax.random.normal(kw, (cin, cout, 2, 2, 2), jnp.float32) / jnp.sqrt(float(cin * 8))
    b = 0.01 * jax.random.normal(kb, (cout,), jnp.float32)
    return w, b


def init_block(key, cin, cout):
    ks = jax.random.split(key, 6)
    p = {}
    p['w1'], p['b1'] = _conv_init(ks[0], cin, cin, 3)
    p['w2'], p['b2'] = _conv_init(ks[1], cout, cin, 1)
    p['bn1_s'], p['bn1_t'] = _bn_init(ks[2], cout)
    p['w3'], p['b3'] = _conv_init(ks[3], cout, cout, 3)
    p['w4'], p['b4'] = _conv_init(ks[4], cout, cout, 1)
    p['bn2_s'], p['bn2_t'] = _bn_init(ks[5], cout)
    return p


def block_fwd(p, x):
    # Conv3d(in,in,3,p=1) -> Conv3d(in,out,1) -> ReLU -> Dropout -> BN -> (same again)
    x = conv3d_3x3x3(x, p['w1'], p['b1'])
    x = conv3d_1x1x1(x, p['w2'], p['b2'], p['bn1_s'], p['bn1_t'], relu=True)
    x = conv3d_3x3x3(x, p['w3'], p['b3'])
    x = conv3d_1x1x1(x, p['w4'], p['b4'], p['bn2_s'], p['bn2_t'], relu=True)
    return x


def init_inblock(key, cin, cout):
    ks = jax.random.split(key, 4)
    p = {}
    p['w1'], p['b1'] = _conv_init(ks[0], cout, cin, 3)
    p['bn1_s'], p['bn1_t'] = _bn_init(ks[1], cout)
    p['w2'], p['b2'] = _conv_init(ks[2], cout, cout, 3)
    p['bn2_s'], p['bn2_t'] = _bn_init(ks[3], cout)
    return p


def inblock_fwd(p, x):
    x = conv3d_3x3x3(x, p['w1'], p['b1'], p['bn1_s'], p['bn1_t'], relu=True)
    x = conv3d_3x3x3(x, p['w2'], p['b2'], p['bn2_s'], p['bn2_t'], relu=True)
    return x


def init_outblock(key, cin, cout):
    ks = jax.random.split(key, 5)
    p = {}
    p['w1'], p['b1'] = _conv_init(ks[0], 64, cin, 3)
    p['bn1_s'], p['bn1_t'] = _bn_init(ks[1], 64)
    p['w2'], p['b2'] = _conv_init(ks[2], 64, 64, 3)
    p['bn2_s'], p['bn2_t'] = _bn_init(ks[3], 64)
    p['w3'], p['b3'] = _conv_init(ks[4], cout, 64, 1)
    return p


def outblock_fwd(p, x):
    x = conv3d_3x3x3(x, p['w1'], p['b1'], p['bn1_s'], p['bn1_t'], relu=True)
    x = conv3d_3x3x3(x, p['w2'], p['b2'], p['bn2_s'], p['bn2_t'], relu=True)
    x = conv3d_1x1x1(x, p['w3'], p['b3'], out_dtype=jnp.float32)   # final logits in f32
    return x


def init_unet(key, in_channels, out_channels):
    ks = jax.random.split(key, 13)
    return {
        'in_b': init_inblock(ks[0], in_channels, 64),
        'conv1': init_block(ks[1], 64, 128),
        'conv2': init_block(ks[2], 128, 256),
        'conv3': init_block(ks[3], 256, 512),
        'bot': init_block(ks[4], 512, 1024),
        'deconv1': init_block(ks[5], 1024, 512),
        'deconv2': init_block(ks[6], 512, 256),
        'deconv3': init_block(ks[7], 256, 128),
        'out_b': init_outblock(ks[8], 128, out_channels),
        'up1': _convT_init(ks[9], 1024, 512),
        'up2': _convT_init(ks[10], 512, 256),
        'up3': _convT_init(ks[11], 256, 128),
        'up4': _convT_init(ks[12], 128, 64),
    }


@functools.partial(jax.jit, static_argnames=("encoder",))
def unet_forward(params, x_ncdhw, encoder=True):
    x = jnp.transpose(x_ncdhw, (0, 2, 3, 4, 1))  # NCDHW -> NDHWC
    in_b = inblock_fwd(params['in_b'], x)
    c1 = block_fwd(params['conv1'], maxpool3d_2(in_b))
    c2 = block_fwd(params['conv2'], maxpool3d_2(c1))
    c3 = block_fwd(params['conv3'], maxpool3d_2(c2))
    xb = block_fwd(params['bot'], maxpool3d_2(c3))
    x = block_fwd(params['deconv1'],
                  jnp.concatenate([c3, conv_transpose3d_2x2x2(xb, *params['up1'])], axis=-1))
    x = block_fwd(params['deconv2'],
                  jnp.concatenate([c2, conv_transpose3d_2x2x2(x, *params['up2'])], axis=-1))
    x = block_fwd(params['deconv3'],
                  jnp.concatenate([c1, conv_transpose3d_2x2x2(x, *params['up3'])], axis=-1))
    x = outblock_fwd(params['out_b'],
                     jnp.concatenate([in_b, conv_transpose3d_2x2x2(x, *params['up4'])], axis=-1))
    out = jnp.transpose(x, (0, 4, 1, 2, 3))  # NDHWC -> NCDHW
    if encoder:
        out = jax.nn.softmax(out, axis=1)    # nn.Softmax(dim=1)
    return out


# ----------------------------------------------------------------------------
# Self-check: direct conv kernel vs a pure-jnp reference (odd spatial sizes so the
# 8-aligned row padding is exercised, and Cout=320 so the Cout-tile axis has 3 tiles).
# ----------------------------------------------------------------------------
def _selfcheck_conv():
    key = jax.random.PRNGKey(42)
    k1, k2, k3, k4, k5 = jax.random.split(key, 5)
    B, D, H, W, Cin, Cout = 1, 3, 4, 5, 8, 320
    x = jax.random.normal(k1, (B, D, H, W, Cin), jnp.float32)
    w = 0.1 * jax.random.normal(k2, (Cout, Cin, 3, 3, 3), jnp.float32)
    b = 0.1 * jax.random.normal(k3, (Cout,), jnp.float32)
    scale = 1.0 + 0.1 * jax.random.normal(k4, (Cout,), jnp.float32)
    shift = 0.1 * jax.random.normal(k5, (Cout,), jnp.float32)

    got = conv3d_3x3x3(x, w, b, scale, shift, relu=True, out_dtype=jnp.float32)
    got = jax.block_until_ready(got)

    xr = x.astype(jnp.bfloat16).astype(jnp.float32)
    wr = w.astype(jnp.bfloat16).astype(jnp.float32)
    xp = jnp.pad(xr, ((0, 0), (1, 1), (1, 1), (1, 1), (0, 0)))
    ref = jnp.zeros((B, D, H, W, Cout), jnp.float32)
    for kd in range(3):
        for kh in range(3):
            for kw in range(3):
                win = xp[:, kd:kd + D, kh:kh + H, kw:kw + W, :]
                ref = ref + jnp.einsum('bdhwc,oc->bdhwo', win, wr[:, :, kd, kh, kw])
    ref = jnp.maximum(ref + b, 0.0) * scale + shift
    err = float(jnp.max(jnp.abs(got - ref)))
    assert err < 1e-2, f"direct conv mismatch: max|err|={err}"


if __name__ == "__main__":
    _selfcheck_conv()

    key = jax.random.PRNGKey(0)
    kx, kp = jax.random.split(key)
    in_channels, out_channels = 4, 4
    # spatial must be divisible by 16 (4 MaxPool3d(2) levels); smallest useful = 16
    x = jax.random.normal(kx, (1, in_channels, 16, 16, 16), jnp.float32)
    params = init_unet(kp, in_channels, out_channels)

    out = unet_forward(params, x, encoder=True)
    out = jax.block_until_ready(out)

    assert out.shape == (1, out_channels, 16, 16, 16), out.shape
    assert bool(jnp.all(jnp.isfinite(out)))
    print("KERNEL_OK")
</pallas_src>

<mosaic_0001>
module attributes {stable_mosaic.version = 11 : i64} {
  func.func @_conv3x3_kernel(%arg0: i32, %arg1: i32, %arg2: memref<1x352x384xbf16, #tpu.memory_space<vmem>>, %arg3: memref<3456x128xbf16, #tpu.memory_space<vmem>>, %arg4: memref<3x128xf32, #tpu.memory_space<vmem>>, %arg5: memref<1x240x128xf32, #tpu.memory_space<vmem>>) attributes {dimension_semantics = [#tpu.dimension_semantics<parallel>, #tpu.dimension_semantics<parallel>], iteration_bounds = array<i64: 1, 3>, scalar_prefetch = 0 : i64, scratch_operands = 0 : i64, tpu.core_type = #tpu.core_type<tc>, window_params = [{transform_indices = @transform_0, window_bounds = array<i64: 1, 352, 384>}, {transform_indices = @transform_1, window_bounds = array<i64: 3456, 128>}, {transform_indices = @transform_2, window_bounds = array<i64: 3, 128>}, {transform_indices = @transform_3, window_bounds = array<i64: 1, 240, 128>}]} {
    %c0 = arith.constant 0 : index
    %c0_0 = arith.constant 0 : index
    %0 = vector.load %arg4[%c0, %c0_0] : memref<3x128xf32, #tpu.memory_space<vmem>>, vector<1x128xf32>
    %c1 = arith.constant 1 : index
    %c0_1 = arith.constant 0 : index
    %1 = vector.load %arg4[%c1, %c0_1] : memref<3x128xf32, #tpu.memory_space<vmem>>, vector<1x128xf32>
    %c2 = arith.constant 2 : index
    %c0_2 = arith.constant 0 : index
    %2 = vector.load %arg4[%c2, %c0_2] : memref<3x128xf32, #tpu.memory_space<vmem>>, vector<1x128xf32>
    %c0_3 = arith.constant 0 : index
    %c0_4 = arith.constant 0 : index
    %c0_5 = arith.constant 0 : index
    %3 = vector.load %arg2[%c0_3, %c0_4, %c0_5] : memref<1x352x384xbf16, #tpu.memory_space<vmem>>, vector<1x240x384xbf16>
    %4 = vector.shape_cast %3 : vector<1x240x384xbf16> to vector<240x384xbf16>
    %c0_6 = arith.constant 0 : index
    %c0_7 = arith.constant 0 : index
    %5 = vector.load %arg3[%c0_6, %c0_7] : memref<3456x128xbf16, #tpu.memory_space<vmem>>, vector<384x128xbf16>
    %cst = arith.constant dense<0.000000e+00> : vector<240x128xf32>
    %6 = tpu.matmul %4, %5, %cst {dimension_numbers = #tpu.dot_dimension_numbers<[1], [0], [0], [1], [0, 0, 1, 1], [], []>} : vector<240x384xbf16>, vector<384x128xbf16>, vector<240x128xf32> -> vector<240x128xf32>
    %c0_8 = arith.constant 0 : index
    %c8 = arith.constant 8 : index
    %c0_9 = arith.constant 0 : index
    %7 = vector.load %arg2[%c0_8, %c8, %c0_9] : memref<1x352x384xbf16, #tpu.memory_space<vmem>>, vector<1x240x384xbf16>
    %8 = vector.shape_cast %7 : vector<1x240x384xbf16> to vector<240x384xbf16>
    %c384 = arith.constant 384 : index
    %c0_10 = arith.constant 0 : index
    %9 = vector.load %arg3[%c384, %c0_10] : memref<3456x128xbf16, #tpu.memory_space<vmem>>, vector<384x128xbf16>
    %cst_11 = arith.constant dense<0.000000e+00> : vector<240x128xf32>
    %10 = tpu.matmul %8, %9, %cst_11 {dimension_numbers = #tpu.dot_dimension_numbers<[1], [0], [0], [1], [0, 0, 1, 1], [], []>} : vector<240x384xbf16>, vector<384x128xbf16>, vector<240x128xf32> -> vector<240x128xf32>
    %11 = arith.addf %6, %10 : vector<240x128xf32>
    %c0_12 = arith.constant 0 : index
    %c16 = arith.constant 16 : index
    %c0_13 = arith.constant 0 : index
    %12 = vector.load %arg2[%c0_12, %c16, %c0_13] : memref<1x352x384xbf16, #tpu.memory_space<vmem>>, vector<1x240x384xbf16>
    %13 = vector.shape_cast %12 : vector<1x240x384xbf16> to vector<240x384xbf16>
    %c768 = arith.constant 768 : index
    %c0_14 = arith.constant 0 : index
    %14 = vector.load %arg3[%c768, %c0_14] : memref<3456x128xbf16, #tpu.memory_space<vmem>>, vector<384x128xbf16>
    %cst_15 = arith.constant dense<0.000000e+00> : vector<240x128xf32>
    %15 = tpu.matmul %13, %14, %cst_15 {dimension_numbers = #tpu.dot_dimension_numbers<[1], [0], [0], [1], [0, 0, 1, 1], [], []>} : vector<240x384xbf16>, vector<384x128xbf16>, vector<240x128xf32> -> vector<240x128xf32>
    %16 = arith.addf %11, %15 : vector<240x128xf32>
    %c0_16 = arith.constant 0 : index
    %c48 = arith.constant 48 : index
    %c0_17 = arith.constant 0 : index
    %17 = vector.load %arg2[%c0_16, %c48, %c0_17] : memref<1x352x384xbf16, #tpu.memory_space<vmem>>, vector<1x240x384xbf16>
    %18 = vector.shape_cast %17 : vector<1x240x384xbf16> to vector<240x384xbf16>
    %c1152 = arith.constant 1152 : index
    %c0_18 = arith.constant 0 : index
    %19 = vector.load %arg3[%c1152, %c0_18] : memref<3456x128xbf16, #tpu.memory_space<vmem>>, vector<384x128xbf16>
    %cst_19 = arith.constant dense<0.000000e+00> : vector<240x128xf32>
    %20 = tpu.matmul %18, %19, %cst_19 {dimension_numbers = #tpu.dot_dimension_numbers<[1], [0], [0], [1], [0, 0, 1, 1], [], []>} : vector<240x384xbf16>, vector<384x128xbf16>, vector<240x128xf32> -> vector<240x128xf32>
    %21 = arith.addf %16, %20 : vector<240x128xf32>
    %c0_20 = arith.constant 0 : index
    %c56 = arith.constant 56 : index
    %c0_21 = arith.constant 0 : index
    %22 = vector.load %arg2[%c0_20, %c56, %c0_21] : memref<1x352x384xbf16, #tpu.memory_space<vmem>>, vector<1x240x384xbf16>
    %23 = vector.shape_cast %22 : vector<1x240x384xbf16> to vector<240x384xbf16>
    %c1536 = arith.constant 1536 : index
    %c0_22 = arith.constant 0 : index
    %24 = vector.load %arg3[%c1536, %c0_22] : memref<3456x128xbf16, #tpu.memory_space<vmem>>, vector<384x128xbf16>
    %cst_23 = arith.constant dense<0.000000e+00> : vector<240x128xf32>
    %25 = tpu.matmul %23, %24, %cst_23 {dimension_numbers = #tpu.dot_dimension_numbers<[1], [0], [0], [1], [0, 0, 1, 1], [], []>} : vector<240x384xbf16>, vector<384x128xbf16>, vector<240x128xf32> -> vector<240x128xf32>
    %26 = arith.addf %21, %25 : vector<240x128xf32>
    %c0_24 = arith.constant 0 : index
    %c64 = arith.constant 64 : index
    %c0_25 = arith.constant 0 : index
    %27 = vector.load %arg2[%c0_24, %c64, %c0_25] : memref<1x352x384xbf16, #tpu.memory_space<vmem>>, vector<1x240x384xbf16>
    %28 = vector.shape_cast %27 : vector<1x240x384xbf16> to vector<240x384xbf16>
    %c1920 = arith.constant 1920 : index
    %c0_26 = arith.constant 0 : index
    %29 = vector.load %arg3[%c1920, %c0_26] : memref<3456x128xbf16, #tpu.memory_space<vmem>>, vector<384x128xbf16>
    %cst_27 = arith.constant dense<0.000000e+00> : vector<240x128xf32>
    %30 = tpu.matmul %28, %29, %cst_27 {dimension_numbers = #tpu.dot_dimension_numbers<[1], [0], [0], [1], [0, 0, 1, 1], [], []>} : vector<240x384xbf16>, vector<384x128xbf16>, vector<240x128xf32> -> vector<240x128xf32>
    %31 = arith.addf %26, %30 : vector<240x128xf32>
    %c0_28 = arith.constant 0 : index
    %c96 = arith.constant 96 : index
    %c0_29 = arith.constant 0 : index
    %32 = vector.load %arg2[%c0_28, %c96, %c0_29] : memref<1x352x384xbf16, #tpu.memory_space<vmem>>, vector<1x240x384xbf16>
    %33 = vector.shape_cast %32 : vector<1x240x384xbf16> to vector<240x384xbf16>
    %c2304 = arith.constant 2304 : index
    %c0_30 = arith.constant 0 : index
    %34 = vector.load %arg3[%c2304, %c0_30] : memref<3456x128xbf16, #tpu.memory_space<vmem>>, vector<384x128xbf16>
    %cst_31 = arith.constant dense<0.000000e+00> : vector<240x128xf32>
    %35 = tpu.matmul %33, %34, %cst_31 {dimension_numbers = #tpu.dot_dimension_numbers<[1], [0], [0], [1], [0, 0, 1, 1], [], []>} : vector<240x384xbf16>, vector<384x128xbf16>, vector<240x128xf32> -> vector<240x128xf32>
    %36 = arith.addf %31, %35 : vector<240x128xf32>
    %c0_32 = arith.constant 0 : index
    %c104 = arith.constant 104 : index
    %c0_33 = arith.constant 0 : index
    %37 = vector.load %arg2[%c0_32, %c104, %c0_33] : memref<1x352x384xbf16, #tpu.memory_space<vmem>>, vector<1x240x384xbf16>
    %38 = vector.shape_cast %37 : vector<1x240x384xbf16> to vector<240x384xbf16>
    %c2688 = arith.constant 2688 : index
    %c0_34 = arith.constant 0 : index
    %39 = vector.load %arg3[%c2688, %c0_34] : memref<3456x128xbf16, #tpu.memory_space<vmem>>, vector<384x128xbf16>
    %cst_35 = arith.constant dense<0.000000e+00> : vector<240x128xf32>
    %40 = tpu.matmul %38, %39, %cst_35 {dimension_numbers = #tpu.dot_dimension_numbers<[1], [0], [0], [1], [0, 0, 1, 1], [], []>} : vector<240x384xbf16>, vector<384x128xbf16>, vector<240x128xf32> -> vector<240x128xf32>
    %41 = arith.addf %36, %40 : vector<240x128xf32>
    %c0_36 = arith.constant 0 : index
    %c112 = arith.constant 112 : index
    %c0_37 = arith.constant 0 : index
    %42 = vector.load %arg2[%c0_36, %c112, %c0_37] : memref<1x352x384xbf16, #tpu.memory_space<vmem>>, vector<1x240x384xbf16>
    %43 = vector.shape_cast %42 : vector<1x240x384xbf16> to vector<240x384xbf16>
    %c3072 = arith.constant 3072 : index
    %c0_38 = arith.constant 0 : index
    %44 = vector.load %arg3[%c3072, %c0_38] : memref<3456x128xbf16, #tpu.memory_space<vmem>>, vector<384x128xbf16>
    %cst_39 = arith.constant dense<0.000000e+00> : vector<240x128xf32>
    %45 = tpu.matmul %43, %44, %cst_39 {dimension_numbers = #tpu.dot_dimension_numbers<[1], [0], [0], [1], [0, 0, 1, 1], [], []>} : vector<240x384xbf16>, vector<384x128xbf16>, vector<240x128xf32> -> vector<240x128xf32>
    %46 = arith.addf %41, %45 : vector<240x128xf32>
    %47 = vector.broadcast %0 : vector<1x128xf32> to vector<240x128xf32>
    %48 = arith.addf %46, %47 : vector<240x128xf32>
    %cst_40 = arith.constant 0.000000e+00 : f32
    %49 = vector.broadcast %cst_40 : f32 to vector<240x128xf32>
    %50 = arith.maximumf %48, %49 : vector<240x128xf32>
    %51 = vector.broadcast %1 : vector<1x128xf32> to vector<240x128xf32>
    %52 = arith.mulf %50, %51 : vector<240x128xf32>
    %53 = vector.broadcast %2 : vector<1x128xf32> to vector<240x128xf32>
    %54 = arith.addf %52, %53 : vector<240x128xf32>
    %c0_41 = arith.constant 0 : index
    %c0_42 = arith.constant 0 : index
    %c0_43 = arith.constant 0 : index
    %55 = vector.load %arg5[%c0_41, %c0_42, %c0_43] : memref<1x240x128xf32, #tpu.memory_space<vmem>>, vector<1x240x128xf32>
    %56 = vector.shape_cast %55 : vector<1x240x128xf32> to vector<240x128xf32>
    %57 = vector.shape_cast %54 : vector<240x128xf32> to vector<1x240x128xf32>
    tpu.vector_store %arg5[%c0_41, %c0_42, %c0_43], %57 {strides = array<i32>} : memref<1x240x128xf32, #tpu.memory_space<vmem>>, vector<1x240x128xf32>,
    return
  }
  func.func @transform_0(%arg0: i32, %arg1: i32) -> (i32, i32, i32) {
    %c0_i32 = arith.constant 0 : i32
    %c0_i32_0 = arith.constant 0 : i32
    %c0_i32_1 = arith.constant 0 : i32
    return %arg0, %c0_i32, %c0_i32_0 : i32, i32, i32
  }
  func.func @transform_1(%arg0: i32, %arg1: i32) -> (i32, i32) {
    %c0_i32 = arith.constant 0 : i32
    %c0_i32_0 = arith.constant 0 : i32
    return %c0_i32, %arg1 : i32, i32
  }
  func.func @transform_2(%arg0: i32, %arg1: i32) -> (i32, i32) {
    %c0_i32 = arith.constant 0 : i32
    %c0_i32_0 = arith.constant 0 : i32
    return %c0_i32, %arg1 : i32, i32
  }
  func.func @transform_3(%arg0: i32, %arg1: i32) -> (i32, i32, i32) {
    %c0_i32 = arith.constant 0 : i32
    %c0_i32_0 = arith.constant 0 : i32
    return %arg0, %c0_i32, %arg1 : i32, i32, i32
  }
}

</mosaic_0001>

<bundles_post_ra>
// kernel: tpu_custom_call.1
= control target key start
LH: loop header
LB: loop body
LE: loop exit
PB: predicated region body
PF: predicated region fallthrough
CT: control target
= control target key end

     0   :  { %s13623_s0 = inlined_call_operand.hbm [shape: bf16[1,352,384], index: 0, kind: input, shape index: {}]   ;;  %s13624_s1 = inlined_call_operand.hbm [shape: bf16[3456,384], index: 1, kind: input, shape index: {}]   ;;  %s13625_s2 = inlined_call_operand.hbm [shape: f32[3,384], index: 2, kind: input, shape index: {}]   ;;  %s13626_s3 = inlined_call_operand.hbm [shape: f32[1,240,384], index: 3, kind: output, shape index: {}]  }
   0x1   :  { %13639 = sst [smem:[#allocation25_spill]] %s13624_s1 }
   0x2   :  { %8 = vsyncpa [#allocation3], 0 }
   0x3   :  { %9 = vsyncpa [#allocation6], 0 }
   0x4   :  { %11 = vsyncpa [#allocation6 + $0x1], 0 }
   0x5   :  { %12 = vsyncpa [#allocation4], 0 }
   0x6   :  { %14 = vsyncpa [#allocation4 + $0x1], 0  ;;  %s11144_s12 = smov 0   ;;  %s11146_s13 = smov 0  }
   0x7   :  { %s11148_s14 = smov 0   ;;  %s11150_s15 = smov 0  }
   0x8   :  { %s11152_s16 = smov 0   ;;  %s11154_s17 = smov 0  }
   0x9 LB: > { %s29_s18 = sadd.s32 1, %s11105_s16  ;;  %s65_s19 = sadd.s32 1, %s11097_s14  ;;  %s11109_s17 = sphi %s11154_s17, %s20_s17   ;;  %s11105_s16 = sphi %s11152_s16, %s13772_s16   ;;  %s11101_s15 = sphi %s11150_s15, %s13771_s15   ;;  %s11097_s14 = sphi %s11148_s14, %s13770_s14   ;;  %s11093_s13 = sphi %s11146_s13, %s13769_s13   ;;  %s11089_s12 = sphi %s11144_s12, %s13768_s12  }
   0xa   : > { %p30_p0 = scmp.ge.s32.totalorder %s29_s18, 3  ;;  %p72_p1 = scmp.ne.s32.totalorder %s11097_s14, %s11093_s13 }
   0xb   : > { %p73_p2 = scmp.eq.s32.totalorder %s11109_s17, 0  ;;  %p10258_p4 = scmp.lt.s32.totalorder %s11109_s17, 3 }
   0xc   : > { %s13774_s18 = smov (%p30_p0, %s29_s18), 0  ;;  %s172_s21 = sand.u32 1, %s11109_s17  }
   0xd   : > { %p74_p3 = por %p73_p2, %p72_p1  ;;  %s62_s20 = ssub.s32 %s11105_s16, %s13774_s18 }
   0xe   : > { %p63_p5 = scmp.eq.s32.totalorder %s62_s20, 0  ;;  %s174_s22 = sand.u32 1, %s11097_s14  }
   0xf   : > { %s10229_s24 = smul.u32 1728, %s174_s22  ;;  %s7751_s25 = sshll.u32 %s11105_s16, 6 }
  0x10   : > { %s11190_s23 = scalar_select %p63_p5, %s11097_s14, %s65_s19  }
  0x11   : > { %s13640_s1 = sld [smem:[#allocation25_spill]]  ;;  %p11200_p6 = pnand %p10258_p4, %p74_p3 }
  0x12   : > { %s176_s30 = scalar_lea.vmem [#allocation5], %s10229_s24  ;;  %s11204_s5 = scalar_lea.sflag [#allocation6], %s172_s21 }
  0x13   : > { %s182_s4 = sshll.u32 %s176_s30, 4  ;;  %p10945_p7 = pneg %p11200_p6  ;;  %s183_s4 = int_to_ptr.vmem [resolvable:$true] %s182_s4 }
  0x14   : > { %s10956_s6 = scalar_lea.vmem %s183_s4, 27648  ;;  %s11111_s7 = smov [#allocation5]  }
  0x15   : > { %p10957_p8 = scmp.ne.s32.totalorder %s183_s4, %s10956_s6  ;;  %s10961_s8 = sshll.u32 %s11111_s7, 4  ;;  %s10962_s8 = int_to_ptr.vmem [resolvable:$false] %s10961_s8 }
  0x16   : > { %s10963_s9 = scalar_lea.vmem %s10962_s8, 55296  ;;  %p10964_p11 = scmp.lt.s32.totalorder %s183_s4, %s10962_s8 }
  0x17   : > { %s181_s28 = scalar_lea.hbm %s13640_s1, %s7751_s25  ;;  %p10959_p9 = pnand %p10957_p8, %p10945_p7 }
  0x18   : > { %p10965_p12 = scmp.lt.s32.totalorder %s10963_s9, %s10956_s6 }
  0x19   : > { %p10960_p10 = pneg %p10959_p9 }
  0x1a   : > { %p10966_p13 = por %p10965_p12, %p10964_p11 }
  0x1c   : > { %p10967_p0 = pnand %p10966_p13, %p10960_p10 }
  0x1e   : > { %10970 = shalt.err (!%p10967_p0)
}
  0x1f   : > { %s13627_s10 = smov 192   ;;  %s11113_s11 = smov 64  }
  0x20   : > { %s11114_s19 = smov 4   ;;  %s11216_s20 = sadd.s32 4294967295, %s11109_s17  }
  0x21   : > { %10249 = dma.hbm_to_vmem [thread:$0]  (!%p11200_p6), %s181_s28, 27648, %s183_s4, %s11204_s5, %s13627_s10, %s11113_s11, %s11114_s19  }
  0x22   : > { %s7747_s21 = sadd.s32 4294967294, %s11109_s17   ;;  %p78_p2 = scmp.ne.s32.totalorder %s11093_s13, %s11089_s12 }
  0x23   : > { %p13629_p3 = scmp.eq.s32.totalorder %s11216_s20, 0  ;;  %p130_p4 = scmp.eq.s32.totalorder %s11216_s20, 2 }
  0x24   : > { %p136_p5 = scmp.eq.s32.totalorder %s7747_s21, 2  ;;  %p7748_p9 = scmp.ge.s32.totalorder %s11109_s17, 1 }
  0x25   : > { %p11225_p8 = por %p13629_p3, %p78_p2  ;;  %p11233_p10 = por %p130_p4, %p72_p1 }
  0x26   : > { %p11237_p11 = por %p136_p5, %p78_p2  ;;  %p143_p12 = scmp.lt.s32.totalorder %s11109_s17, 4 }
  0x27   : > { %s13642_s24 = scalar_select %p11225_p8, 1, 0 }
  0x28   : > { %s13643_s26 = scalar_select %p11233_p10, 1, 0 }
  0x29   : > { %s13644_s27 = scalar_select %p11237_p11, 1, 0 }
  0x2a   : > { %p11242_p13 = pnand %p7748_p9, %p143_p12  ;;  %s11115_s30 = smov [#allocation2]  }
  0x2b   : > { %s158_s4 = sshll.u32 %s11115_s30, 4  ;;  %s7752_s6 = sshll.u32 %s174_s22, 2  ;;  %s11246_s4 = int_to_ptr.vmem [resolvable:$true] %s158_s4 }
  0x2c   : > { %p10242_p1 = pneg %p11242_p13  ;;  %s201_s9 = scalar_lea.hbm %s13625_s2, %s7751_s25 }
  0x2d   : > { %s196_s11 = scalar_lea.vmem [#allocation7], %s7752_s6  ;;  %s11116_s22 = smov [#allocation7]  }
  0x2e   : > { %s203_s19 = sshll.u32 %s196_s11, 4  ;;  %p11259_p0 = pnand %p10242_p1, %p13629_p3  ;;  %s204_s19 = int_to_ptr.vmem [resolvable:$true] %s203_s19 }
  0x2f   : > { %s10984_s30 = scalar_lea.vmem %s204_s19, 64  ;;  %s10989_s10 = sshll.u32 %s11116_s22, 4  ;;  %s10990_s10 = int_to_ptr.vmem [resolvable:$false] %s10989_s10 }
  0x30   : > { %p10985_p2 = scmp.ne.s32.totalorder %s204_s19, %s10984_s30  ;;  %s10991_s1 = scalar_lea.vmem %s10990_s10, 128 }
  0x31   : > { %p10992_p9 = scmp.lt.s32.totalorder %s204_s19, %s10990_s10  ;;  %p10993_p12 = scmp.lt.s32.totalorder %s10991_s1, %s10984_s30 }
  0x32   : > { %p10987_p4 = pnand %p10985_p2, %p10945_p7 }
  0x33   : > { %p10994_p11 = por %p10993_p12, %p10992_p9 }
  0x34   : > { %p10988_p5 = pneg %p10987_p4 }
  0x36   : > { %p10995_p10 = pnand %p10994_p11, %p10988_p5 }
  0x38   : > { %10998 = shalt.err (!%p10995_p10)
}
  0x39   : > { %10252 = dma.hbm_to_vmem [thread:$0]  (!%p11200_p6), %s201_s9, 64, %s204_s19, %s11204_s5  }
  0x3a   : > { %p11001_p7 = pneg %p11259_p0  ;;  %s11010_s25 = scalar_lea.vmem %s11246_s4, 8448 }
  0x3b   : > { %p11011_p1 = scmp.ne.s32.totalorder %s11246_s4, %s11010_s25  ;;  %p11018_p3 = scmp.lt.s32.totalorder %s11246_s4, %s11246_s4 }
  0x3c   : > { %p11019_p8 = scmp.lt.s32.totalorder %s11010_s25, %s11010_s25 }
  0x3d   : > { %p11013_p2 = pnand %p11011_p1, %p11001_p7 }
  0x3e   : > { %p11020_p9 = por %p11019_p8, %p11018_p3 }
  0x3f   : > { %p11014_p4 = pneg %p11013_p2 }
  0x41   : > { %p11021_p11 = pnand %p11020_p9, %p11014_p4 }
  0x43   : > { %11024 = shalt.err (!%p11021_p11)
}
  0x44   : > { %s11117_s1 = smov 12   ;;  %s13647_s29 = smov 192  }
  0x45   : > { %10245 = dma.hbm_to_vmem [thread:$0]  (!%p11259_p0), %s13623_s0, 8448, %s11246_s4, [#allocation3], %s13647_s29, %s13647_s29, %s11117_s1  }
  0x46   : > { %212 = sbr.rel (%p11242_p13) target bundleno = 1417 (0x589), region = 32 }
  0x4b   : > { %p13648_p6 = scmp.eq.s32.totalorder %s11216_s20, 0 }
  0x4d   : > { %11076 = dma.done.wait (%p13648_p6), [#allocation3], 8448   ;;  %p13649_p3 = pmov %p13648_p6 }
  0x4e   : > { %s218_s6 = sand.u32 1, %s11216_s20   ;;  %s11291_s7 = sand.u32 1, %s11093_s13  }
  0x4f   : > { %11078 = vsyncadd (%p13649_p3), [#allocation3], 4294958848  ;;  %s10230_s8 = smul.u32 1728, %s11291_s7  ;;  %s219_s9 = scalar_lea.sflag [#allocation6], %s218_s6 }
  0x50   : > { %p13650_p8 = scmp.ne.s32.totalorder %s13642_s24, 0 }
  0x51   : > { %s11294_s11 = scalar_lea.vmem [#allocation5], %s10230_s8 }
  0x52   : > { %11080 = dma.done.wait (%p13650_p8), %s219_s9, 27712  }
  0x53   : > { %11082 = vsyncadd (%p13650_p8), %s219_s9, 4294939584  ;;  %v13636_v0 = vmov 0.0   ;;  %vm11119_vm0 = vmmov 0   ;;  %v10319_v1 = vld [vmem:[%s11294_s11 + $0x138] sm:$0xff]   ;;  %v10322_v4 = vld [vmem:[%s11294_s11 + $0x130] sm:$0xff]   ;;  %s7756_s20 = sshll.u32 %s11291_s7, 2 }
  0x54   : > { %9545 = vmatprep.subr.bf16.mxu1 %v13636_v0  ;;  %9561 = vmatprep.mubr.msk.bf16.mxu1 %vm11119_vm0, %v13636_v0  ;;  %v10320_v2 = vld [vmem:[%s11294_s11 + $0x178] sm:$0xff]   ;;  %v10323_v5 = vld [vmem:[%s11294_s11 + $0x170] sm:$0xff]   ;;  %v10325_v7 = vld [vmem:[%s11294_s11 + $0x128] sm:$0xff]   ;;  %s231_s24 = scalar_lea.vmem [#allocation7], %s7756_s20  ;;  %s10231_s28 = smul.u32 240, %s11291_s7 }
  0x55   : > { %8384 = vmatprep.subr.bf16.mxu0 %v10319_v1  ;;  %v10321_v3 = vld [vmem:[%s11294_s11 + $0xf8] sm:$0xff]   ;;  %9546 = vmatpush3.bf16.msra.mxu1 %v10320_v2  ;;  %v10324_v6 = vld [vmem:[%s11294_s11 + $0xf0] sm:$0xff]   ;;  %v10326_v8 = vld [vmem:[%s11294_s11 + $0x168] sm:$0xff]   ;;  %s8381_s19 = sshll.u32 %s11101_s15, 7  ;;  %s7615_s15 = scalar_lea.sflag [#allocation4], %s11291_s7 }
  0x56   : > { %8385 = vmatpush3.bf16.msra.mxu0 %v10321_v3  ;;  %9547 = vmatprep.subr.bf16.mxu1 %v13636_v0  ;;  %v10327_v9 = vld [vmem:[%s11294_s11 + $0xe8] sm:$0xff]   ;;  %v10328_v10 = vld [vmem:[%s11294_s11 + $0x120] sm:$0xff]   ;;  %v10331_v13 = vld [vmem:[%s11294_s11 + $0x118] sm:$0xff]   ;;  %s13424_s4 = scalar_lea.vmem [#allocation8], %s10231_s28  ;;  %s13572_s25 = scalar_lea.hbm %s13626_s3, %s8381_s19 }
  0x57   : > { %8386 = vmatprep.subr.bf16.mxu0 %v10322_v4  ;;  %v10329_v11 = vld [vmem:[%s11294_s11 + $0x160] sm:$0xff]   ;;  %v10332_v14 = vld [vmem:[%s11294_s11 + $0x158] sm:$0xff]   ;;  %v10334_v16 = vld [vmem:[%s11294_s11 + $0x110] sm:$0xff]   ;;  %s7629_s21 = sshll.u32 %s13424_s4, 4  ;;  %p13766_p13 = scmp.ne.s32.totalorder %s13643_s26, 0  ;;  %s13574_s21 = int_to_ptr.vmem [resolvable:$true] %s7629_s21 }
  0x58   : > { %v10330_v12 = vld [vmem:[%s11294_s11 + $0xe0] sm:$0xff]   ;;  %v10333_v15 = vld [vmem:[%s11294_s11 + $0xd8] sm:$0xff]   ;;  %v10335_v17 = vld [vmem:[%s11294_s11 + $0x150] sm:$0xff]   ;;  %s11025_s1 = scalar_lea.vmem %s13574_s21, 3840  ;;  %s11120_s29 = smov [#allocation8]  }
  0x59   : > { %9548 = vmatpush3.bf16.msra.mxu1 %v10323_v5  ;;  %v10336_v18 = vld [vmem:[%s11294_s11 + $0xd0] sm:$0xff]   ;;  %v10337_v19 = vld [vmem:[%s11294_s11 + $0x108] sm:$0xff]   ;;  %v265_v22 = vld [vmem:[#allocation2 + $0xc] sm:$0xff]  ;;  %p11026_p10 = scmp.ne.s32.totalorder %s13574_s21, %s11025_s1  ;;  %s11029_s10 = sshll.u32 %s11120_s29, 4  ;;  %s11030_s10 = int_to_ptr.vmem [resolvable:$false] %s11029_s10 }
  0x5a   : > { %8387 = vmatpush3.bf16.msra.mxu0 %v10324_v6  ;;  %9549 = vmatprep.subr.bf16.mxu1 %v13636_v0  ;;  %v10338_v20 = vld [vmem:[%s11294_s11 + $0x148] sm:$0xff]   ;;  %v10340_v24 = vld [vmem:[%s11294_s11 + $0x100] sm:$0xff]   ;;  %v11335_v28 = vld [vmem:[#allocation2 + $0x20] sm:$0xf]  ;;  %s11031_s5 = scalar_lea.vmem %s11030_s10, 7680  ;;  %p11032_p12 = scmp.lt.s32.totalorder %s13574_s21, %s11030_s10 }
  0x5b   : > { %8388 = vmatprep.subr.bf16.mxu0 %v10325_v7  ;;  %v10339_v21 = vld [vmem:[%s11294_s11 + $0xc8] sm:$0xff]   ;;  %v10341_v25 = vld [vmem:[%s11294_s11 + $0x140] sm:$0xff]   ;;  %v11339_v30 = vld [vmem:[#allocation2 + $0x24] sm:$0xff]  ;;  %p11027_p0 = pnand %p11026_p10, %p13766_p13  ;;  %p11033_p7 = scmp.lt.s32.totalorder %s11031_s5, %s11025_s1 }
  0x5c   : > { %v11330_v23 = vld [vmem:[#allocation2 + $0x18] sm:$0xff]  ;;  %v266_v27 = vld [vmem:[#allocation2 + $0x14] sm:$0xf]  ;;  %v10347_v31 = vld [vmem:[%s11294_s11 + $0x78] sm:$0xff]  }
  0x5d   : > { %9550 = vmatpush3.bf16.msra.mxu1 %v10326_v8  ;;  %v7758_v26 = vcombine.high %v265_v22, %v11330_v23  ;;  %v10342_v29 = vld [vmem:[%s11294_s11 + $0xc0] sm:$0xff]   ;;  %v11342_v32 = vld [vmem:[#allocation2 + $0x2c] sm:$0xf]  ;;  %v7759_v34 = vcombine.low %v266_v27, %v11335_v28  ;;  %v7757_v37 = vcombine.low %v265_v22, %v11330_v23  ;;  %v10355_v41 = vld [vmem:[%s11294_s11 + $0x70] sm:$0xff]   ;;  %p11028_p5 = pneg %p11027_p0  ;;  %p11034_p1 = por %p11033_p7, %p11032_p12 }
  0x5e   : > { %8389 = vmatpush3.bf16.msra.mxu0 %v10327_v9  ;;  %9551 = vmatprep.subr.bf16.mxu1 %v13636_v0  ;;  %v11347_v35 = vld [vmem:[#allocation2 + $0x30] sm:$0xff]  ;;  %v10349_v38 = vld [vmem:[%s11294_s11 + $0xb8] sm:$0xff]   ;;  %v11360_v43 = vld [vmem:[#allocation2 + $0x38] sm:$0xf] }
  0x5f   : > { %8390 = vmatprep.subr.bf16.mxu0 %v10328_v10  ;;  %837 = vmatprep.mubr.bf16.mxu0 %v7758_v26  ;;  %v10348_v39 = vld [vmem:[%s11294_s11 + $0x38] sm:$0xff]   ;;  %v7761_v40 = vcombine.high %v11339_v30, %v11347_v35  ;;  %v11362_v44 = vld [vmem:[#allocation2 + $0x3c] sm:$0xff]  ;;  %v11364_v45 = vld [vmem:[#allocation2 + $0x44] sm:$0xf]  ;;  %v7762_v52 = vcombine.low %v11342_v32, %v11360_v43  ;;  %v7760_v53 = vcombine.low %v11339_v30, %v11347_v35  ;;  %p11035_p2 = pnand %p11034_p1, %p11028_p5 }
  0x60   : > { %v10358_v46 = vld [vmem:[%s11294_s11 + $0xb0] sm:$0xff]   ;;  %v11374_v50 = vld [vmem:[#allocation2 + $0x48] sm:$0xff]  ;;  %v10362_v51 = vld [vmem:[%s11294_s11 + $0x68] sm:$0xff]  }
  0x61   : > { %9552 = vmatpush3.bf16.msra.mxu1 %v10329_v11  ;;  %v10357_v48 = vld [vmem:[%s11294_s11 + $0x30] sm:$0xff]   ;;  %v7764_v54 = vcombine.high %v11362_v44, %v11374_v50  ;;  %v11384_v55 = vld [vmem:[#allocation2 + $0x54] sm:$0xff]  ;;  %v11394_v60 = vld [vmem:[#allocation2 + $0x50] sm:$0xf]  ;;  %v7763_v5 = vcombine.low %v11362_v44, %v11374_v50 }
  0x62   : > { %8391 = vmatpush3.bf16.msra.mxu0 %v10330_v12  ;;  %9553 = vmatprep.subr.bf16.mxu1 %v13636_v0  ;;  %v10365_v56 = vld [vmem:[%s11294_s11 + $0x28] sm:$0xff]   ;;  %v10371_v59 = vld [vmem:[%s11294_s11 + $0x60] sm:$0xff]   ;;  %v11403_v2 = vld [vmem:[#allocation2 + $0x60] sm:$0xff]  ;;  %v7765_v4 = vcombine.low %v11364_v45, %v11394_v60 }
  0x63   : > { %8392 = vmatprep.subr.bf16.mxu0 %v10331_v13  ;;  %v10367_v57 = vld [vmem:[%s11294_s11 + $0xa8] sm:$0xff]   ;;  %v10372_v63 = vld [vmem:[%s11294_s11 + $0x20] sm:$0xff]   ;;  %v10380_v6 = vld [vmem:[%s11294_s11 + $0x58] sm:$0xff]   ;;  %v7767_v7 = vcombine.high %v11384_v55, %v11403_v2 }
  0x64   : > { %v11396_v61 = vld [vmem:[#allocation2 + $0x5c] sm:$0xf]  ;;  %v10376_v3 = vld [vmem:[%s11294_s11 + $0xa0] sm:$0xff]   ;;  %v10381_v8 = vld [vmem:[%s11294_s11 + $0x18] sm:$0xff]  }
  0x65   : > { %9554 = vmatpush3.bf16.msra.mxu1 %v10332_v14  ;;  %v11417_v10 = vld [vmem:[#allocation2 + $0x6c] sm:$0xff]  ;;  %v11422_v11 = vld [vmem:[#allocation2 + $0x68] sm:$0xf]  ;;  %v11424_v12 = vld [vmem:[#allocation2 + $0x74] sm:$0xf] }
  0x66   : > { %8393 = vmatpush3.bf16.msra.mxu0 %v10333_v15  ;;  %9555 = vmatprep.subr.bf16.mxu1 %v13636_v0  ;;  %v10385_v13 = vld [vmem:[%s11294_s11 + $0x98] sm:$0xff]   ;;  %v11429_v15 = vld [vmem:[#allocation2 + $0x78] sm:$0xff]  ;;  %v10394_v22 = vld [vmem:[%s11294_s11 + $0x90] sm:$0xff]  }
  0x67   : > { %8394 = vmatprep.subr.bf16.mxu0 %v10334_v16  ;;  %v11449_v27 = vld [vmem:[#allocation2 + $0x8c] sm:$0xf]  ;;  %v11597_v26 = vld [vmem:[#allocation2 + $0x110] sm:$0xf]  ;;  %v11603_v16 = vld [vmem:[#allocation2 + $0x114] sm:$0xff] }
  0x68   : > { %v11605_v14 = vld [vmem:[#allocation2 + $0x120] sm:$0xff]  ;;  %v11607_v9 = vld [vmem:[#allocation2 + $0x11c] sm:$0xf]  ;;  %v11625_v62 = vld [vmem:[#allocation2 + $0x12c] sm:$0xff] }
  0x69   : > { %9556 = vmatpush3.bf16.msra.mxu1 %v10335_v17  ;;  %v10389_v17 = vld [vmem:[%s11294_s11 + $0x50] sm:$0xff]   ;;  %v315_v58 = vld [vmem:[#allocation2 + $0x138] sm:$0xff]  ;;  %v11627_v49 = vld [vmem:[#allocation2 + $0x134] sm:$0xf] }
  0x6a   : > { %8395 = vmatpush3.bf16.msra.mxu0 %v10336_v18  ;;  %9557 = vmatprep.subr.bf16.mxu1 %v13636_v0  ;;  %v7768_v18 = vcombine.low %v11396_v61, %v11422_v11  ;;  %13655 = vst [vmem:[#allocation16_spill] sm:$0xff] %v11627_v49  ;;  %v7794_v47 = vcombine.high %v11625_v62, %v315_v58  ;;  %v319_v42 = vld [vmem:[#allocation2 + $0x150] sm:$0xff] }
  0x6b   : > { %8396 = vmatprep.subr.bf16.mxu0 %v10337_v19  ;;  %v10390_v19 = vld [vmem:[%s11294_s11 + $0x10] sm:$0xff]  }
  0x6d   : > { %9558 = vmatpush3.bf16.msra.mxu1 %v10338_v20  ;;  %v7766_v20 = vcombine.low %v11384_v55, %v11403_v2 }
  0x6e   : > { %8397 = vmatpush3.bf16.msra.mxu0 %v10339_v21  ;;  %9559 = vmatprep.subr.bf16.mxu1 %v13636_v0  ;;  %v7770_v21 = vcombine.high %v11417_v10, %v11429_v15 }
  0x6f   : > { %8398 = vmatprep.subr.bf16.mxu0 %v10340_v24  ;;  %v11443_v24 = vld [vmem:[#allocation2 + $0x80] sm:$0xf] }
  0x71   : > { %9560 = vmatpush3.bf16.msra.mxu1 %v10341_v25  ;;  %v11445_v25 = vld [vmem:[#allocation2 + $0x84] sm:$0xff] }
  0x72   : > { %8399 = vmatpush3.bf16.msra.mxu0 %v10342_v29  ;;  %9621 = vmatprep.subr.bf16.mxu1 %v13636_v0  ;;  %v10398_v29 = vld [vmem:[%s11294_s11 + $0x48] sm:$0xff]  }
  0x73   : > { %8513 = vmatprep.subr.bf16.mxu0 %v10347_v31  ;;  %v11585_v31 = vld [vmem:[#allocation2 + $0x104] sm:$0xf] }
  0x74   : > { %9562 = vmatmul.mubr.bf16.vlgmr.msra.gmra.mxu1 %v7759_v34  ;;  %v10399_v34 = vld [vmem:[%s11294_s11 + $0x8] sm:$0xff]  }
  0x75   : > { %838 = vmatmul.mubr.bf16.vlgmr.msra.gmra.mxu0 %v7757_v37  ;;  %9622 = vmatpush3.bf16.msra.mxu1 %v10349_v38  ;;  %v11459_v38 = vld [vmem:[#allocation2 + $0x90] sm:$0xff]  ;;  %v11583_v37 = vld [vmem:[#allocation2 + $0x108] sm:$0xff] }
  0x76   : > { %8514 = vmatpush3.bf16.msra.mxu0 %v10348_v39  ;;  %9565 = vmatprep.mubr.msk.bf16.mxu1 %vm11119_vm0, %v13636_v0  ;;  %v7771_v39 = vcombine.low %v11424_v12, %v11443_v24 }
  0x77   : > { %845 = vmatprep.mubr.bf16.mxu0 %v7761_v40  ;;  %8515 = vmatprep.subr.bf16.mxu0 %v10355_v41  ;;  %v10402_v40 = vld [vmem:[%s11294_s11 + $0x88] sm:$0xff]   ;;  %v7769_v41 = vcombine.low %v11417_v10, %v11429_v15 }
  0x78   : > { %9623 = vmatprep.subr.bf16.mxu1 %v13636_v0 }
  0x79   : > { %9624 = vmatpush3.bf16.msra.mxu1 %v10358_v46  ;;  %v11467_v46 = vld [vmem:[#allocation2 + $0x140] sm:$0xf] }
  0x7a   : > { %8516 = vmatpush3.bf16.msra.mxu0 %v10357_v48  ;;  %9625 = vmatprep.subr.bf16.mxu1 %v13636_v0  ;;  %13651 = vst [vmem:[#allocation12_spill] sm:$0xff] %v11467_v46  ;;  %v11469_v48 = vld [vmem:[#allocation2 + $0x14c] sm:$0xf]  ;;  %v7795_v36 = vcombine.low %v11627_v49, %v11467_v46 }
  0x7b   : > { %8517 = vmatprep.subr.bf16.mxu0 %v10362_v51  ;;  %13652 = vst [vmem:[#allocation13_spill] sm:$0xff] %v11469_v48  ;;  %v7773_v51 = vcombine.high %v11445_v25, %v11459_v38  ;;  %v10418_v49 = vld [vmem:[%s11294_s11 + $0x1b8] sm:$0xff]  }
  0x7c   : > { %9566 = vmatmul.mubr.bf16.gmra.mxu1 %v7762_v52  ;;  %v11473_v52 = vld [vmem:[#allocation2 + $0x9c] sm:$0xff] }
  0x7d   : > { %846 = vmatmul.mubr.bf16.gmra.mxu0 %v7760_v53  ;;  %9569 = vmatprep.mubr.msk.bf16.mxu1 %vm11119_vm0, %v13636_v0  ;;  %v11561_v53 = vld [vmem:[#allocation2 + $0xf0] sm:$0xff] }
  0x7e   : > { %853 = vmatprep.mubr.bf16.mxu0 %v7764_v54  ;;  %8518 = vmatpush3.bf16.msra.mxu0 %v10365_v56  ;;  %v10408_v54 = vld [vmem:[%s11294_s11 + $0x40] sm:$0xff]  }
  0x7f   : > { %9626 = vmatpush3.bf16.msra.mxu1 %v10367_v57  ;;  %8519 = vmatprep.subr.bf16.mxu0 %v10371_v59  ;;  %v10409_v56 = vld [vmem:[%s11294_s11] sm:$0xff]   ;;  %v11581_v57 = vld [vmem:[#allocation2 + $0xfc] sm:$0xff] }
  0x80   : > { %9627 = vmatprep.subr.bf16.mxu1 %v13636_v0  ;;  %v10410_v59 = vld [vmem:[%s11294_s11 + $0x80] sm:$0xff]  }
  0x82   : > { %8520 = vmatpush3.bf16.msra.mxu0 %v10372_v63  ;;  %v11485_v63 = vld [vmem:[#allocation2 + $0x98] sm:$0xf] }
  0x83   : > { %9628 = vmatpush3.bf16.msra.mxu1 %v10376_v3  ;;  %8521 = vmatprep.subr.bf16.mxu0 %v10380_v6  ;;  %v11487_v3 = vld [vmem:[#allocation2 + $0x158] sm:$0xf]  ;;  %v11493_v6 = vld [vmem:[#allocation2 + $0xa8] sm:$0xff] }
  0x84   : > { %9570 = vmatmul.mubr.bf16.gmra.mxu1 %v7765_v4  ;;  %9629 = vmatprep.subr.bf16.mxu1 %v13636_v0  ;;  %13653 = vst [vmem:[#allocation14_spill] sm:$0xff] %v11487_v3  ;;  %v11489_v4 = vld [vmem:[#allocation2 + $0x164] sm:$0xf] }
  0x85   : > { %854 = vmatmul.mubr.bf16.gmra.mxu0 %v7763_v5  ;;  %9573 = vmatprep.mubr.msk.bf16.mxu1 %vm11119_vm0, %v13636_v0  ;;  %13654 = vst [vmem:[#allocation15_spill] sm:$0xff] %v11489_v4  ;;  %v11575_v5 = vld [vmem:[#allocation2 + $0xf8] sm:$0xf] }
  0x86   : > { %861 = vmatprep.mubr.bf16.mxu0 %v7767_v7  ;;  %8522 = vmatpush3.bf16.msra.mxu0 %v10381_v8  ;;  %v11495_v7 = vld [vmem:[#allocation2 + $0xa4] sm:$0xf]  ;;  %v11563_v8 = vld [vmem:[#allocation2 + $0xec] sm:$0xf] }
  0x87   : > { %9630 = vmatpush3.bf16.msra.mxu1 %v10385_v13  ;;  %8523 = vmatprep.subr.bf16.mxu0 %v10389_v17  ;;  %v10417_v13 = vld [vmem:[%s11294_s11 + $0x1f8] sm:$0xff]  }
  0x88   : > { %9631 = vmatprep.subr.bf16.mxu1 %v13636_v0 }
  0x8a   : > { %8524 = vmatpush3.bf16.msra.mxu0 %v10390_v19  ;;  %v7772_v19 = vcombine.low %v11445_v25, %v11459_v38 }
  0x8b   : > { %9632 = vmatpush3.bf16.msra.mxu1 %v10394_v22  ;;  %8525 = vmatprep.subr.bf16.mxu0 %v10398_v29  ;;  %v11513_v29 = vld [vmem:[#allocation2 + $0xb4] sm:$0xff] }
  0x8c   : > { %9574 = vmatmul.mubr.bf16.gmra.mxu1 %v7768_v18  ;;  %9633 = vmatprep.subr.bf16.mxu1 %v13636_v0  ;;  %v7774_v18 = vcombine.low %v11449_v27, %v11485_v63 }
  0x8d   : > { %862 = vmatmul.mubr.bf16.gmra.mxu0 %v7766_v20  ;;  %9577 = vmatprep.mubr.msk.bf16.mxu1 %vm11119_vm0, %v13636_v0  ;;  %v7776_v20 = vcombine.high %v11473_v52, %v11493_v6 }
  0x8e   : > { %869 = vmatprep.mubr.bf16.mxu0 %v7770_v21  ;;  %8526 = vmatpush3.bf16.msra.mxu0 %v10399_v34  ;;  %v11509_v21 = vld [vmem:[#allocation2 + $0xb0] sm:$0xf]  ;;  %v11517_v34 = vld [vmem:[#allocation2 + $0xbc] sm:$0xf] }
  0x8f   : > { %9634 = vmatpush3.bf16.msra.mxu1 %v10402_v40  ;;  %8527 = vmatprep.subr.bf16.mxu0 %v10408_v54  ;;  %v7775_v54 = vcombine.low %v11473_v52, %v11493_v6 }
  0x90   : > { %9635 = vmatprep.subr.bf16.mxu1 %v13636_v0 }
  0x92   : > { %8528 = vmatpush3.bf16.msra.mxu0 %v10409_v56 }
  0x93   : > { %9636 = vmatpush3.bf16.msra.mxu1 %v10410_v59  ;;  %8642 = vmatprep.subr.bf16.mxu0 %v10417_v13  ;;  %v11531_v59 = vld [vmem:[#allocation2 + $0xcc] sm:$0xff]  ;;  %v11533_v13 = vld [vmem:[#allocation2 + $0xc8] sm:$0xf] }
  0x94   : > { %9578 = vmatmul.mubr.bf16.gmra.mxu1 %v7771_v39  ;;  %9697 = vmatprep.subr.bf16.mxu1 %v13636_v0  ;;  %v7780_v40 = vcombine.low %v11517_v34, %v11533_v13  ;;  %v7786_v39 = vcombine.low %v11563_v8, %v11575_v5 }
  0x95   : > { %870 = vmatmul.mubr.bf16.gmra.mxu0 %v7769_v41  ;;  %9581 = vmatprep.mubr.msk.bf16.mxu1 %vm11119_vm0, %v13636_v0  ;;  %v11523_v41 = vld [vmem:[#allocation2 + $0xc0] sm:$0xff] }
  0x96   : > { %877 = vmatprep.mubr.bf16.mxu0 %v7773_v51  ;;  %v7777_v51 = vcombine.low %v11495_v7, %v11509_v21  ;;  %v7779_v56 = vcombine.high %v11513_v29, %v11523_v41 }
  0x9c   : > { %9582 = vmatmul.mubr.bf16.gmra.mxu1 %v7774_v18  ;;  %v11553_v18 = vld [vmem:[#allocation2 + $0xe0] sm:$0xf] }
  0x9d   : > { %878 = vmatmul.mubr.bf16.gmra.mxu0 %v7772_v19  ;;  %9585 = vmatprep.mubr.msk.bf16.mxu1 %vm11119_vm0, %v13636_v0  ;;  %v11539_v19 = vld [vmem:[#allocation2 + $0xd8] sm:$0xff] }
  0x9e   : > { %885 = vmatprep.mubr.bf16.mxu0 %v7776_v20  ;;  %v11541_v20 = vld [vmem:[#allocation2 + $0xd4] sm:$0xf]  ;;  %v7781_v17 = vcombine.low %v11531_v59, %v11539_v19 }
  0x9f   : > { %v7783_v22 = vcombine.low %v11541_v20, %v11553_v18 }
  0xa4   : > { %9586 = vmatmul.mubr.bf16.gmra.mxu1 %v7777_v51  ;;  %v7778_v51 = vcombine.low %v11513_v29, %v11523_v41 }
  0xa5   : > { %886 = vmatmul.mubr.bf16.gmra.mxu0 %v7775_v54  ;;  %9589 = vmatprep.mubr.msk.bf16.mxu1 %vm11119_vm0, %v13636_v0  ;;  %v7782_v54 = vcombine.high %v11531_v59, %v11539_v19 }
  0xa6   : > { %893 = vmatprep.mubr.bf16.mxu0 %v7779_v56  ;;  %v11559_v56 = vld [vmem:[#allocation2 + $0xe4] sm:$0xff] }
  0xac   : > { %9590 = vmatmul.mubr.bf16.gmra.mxu1 %v7780_v40  ;;  %v7785_v40 = vcombine.high %v11559_v56, %v11561_v53 }
  0xad   : > { %894 = vmatmul.mubr.bf16.gmra.mxu0 %v7778_v51  ;;  %9593 = vmatprep.mubr.msk.bf16.mxu1 %vm11119_vm0, %v13636_v0  ;;  %v7784_v51 = vcombine.low %v11559_v56, %v11561_v53 }
  0xae   : > { %901 = vmatprep.mubr.bf16.mxu0 %v7782_v54  ;;  %v7789_v54 = vcombine.low %v11585_v31, %v11597_v26 }
  0xb4   : > { %9594 = vmatmul.mubr.bf16.gmra.mxu1 %v7783_v22  ;;  %v7788_v22 = vcombine.high %v11581_v57, %v11583_v37 }
  0xb5   : > { %902 = vmatmul.mubr.bf16.gmra.mxu0 %v7781_v17  ;;  %9597 = vmatprep.mubr.msk.bf16.mxu1 %vm11119_vm0, %v13636_v0  ;;  %v7787_v17 = vcombine.low %v11581_v57, %v11583_v37 }
  0xb6   : > { %909 = vmatprep.mubr.bf16.mxu0 %v7785_v40  ;;  %v7790_v40 = vcombine.low %v11603_v16, %v11605_v14 }
  0xbc   : > { %9598 = vmatmul.mubr.bf16.gmra.mxu1 %v7786_v39  ;;  %v7791_v39 = vcombine.high %v11603_v16, %v11605_v14 }
  0xbd   : > { %910 = vmatmul.mubr.bf16.gmra.mxu0 %v7784_v51  ;;  %9601 = vmatprep.mubr.msk.bf16.mxu1 %vm11119_vm0, %v13636_v0 }
  0xbe   : > { %917 = vmatprep.mubr.bf16.mxu0 %v7788_v22  ;;  %v11619_v22 = vld [vmem:[#allocation2 + $0x128] sm:$0xf] }
  0xbf   : > { %v7792_v51 = vcombine.low %v11607_v9, %v11619_v22 }
  0xc4   : > { %9602 = vmatmul.mubr.bf16.gmra.mxu1 %v7789_v54  ;;  %v7793_v54 = vcombine.low %v11625_v62, %v315_v58  ;;  %v372_v58 = vld [vmem:[#allocation2 + $0x170] sm:$0xf] }
  0xc5   : > { %918 = vmatmul.mubr.bf16.gmra.mxu0 %v7787_v17  ;;  %9605 = vmatprep.mubr.msk.bf16.mxu1 %vm11119_vm0, %v13636_v0 }
  0xc6   : > { %925 = vmatprep.mubr.bf16.mxu0 %v7791_v39  ;;  %v11642_v39 = vld [vmem:[#allocation2 + $0x144] sm:$0xff] }
  0xc7   : > { %v7797_v33 = vcombine.high %v11642_v39, %v319_v42  ;;  %v7796_v1 = vcombine.low %v11642_v39, %v319_v42  ;;  %v10938_v42 = vld [vmem:[#allocation2 + $0xc] sm:$0xff] }
  0xcc   : > { %9606 = vmatmul.mubr.bf16.gmra.mxu1 %v7792_v51  ;;  %v371_v51 = vld [vmem:[#allocation2 + $0x168] sm:$0xff] }
  0xcd   : > { %926 = vmatmul.mubr.bf16.gmra.mxu0 %v7790_v40  ;;  %9609 = vmatprep.mubr.msk.bf16.mxu1 %vm11119_vm0, %v13636_v0  ;;  %v11650_v40 = vld [vmem:[#allocation2 + $0x15c] sm:$0xff] }
  0xce   : > { %933 = vmatprep.mubr.bf16.mxu0 %v7794_v47  ;;  %v7798_v47 = vcombine.low %v11469_v48, %v11487_v3  ;;  %v7800_v17 = vcombine.high %v11650_v40, %v371_v51  ;;  %v264_v48 = vld [vmem:[#allocation2 + $0x8] sm:$0xf] }
  0xd4   : > { %9610 = vmatmul.mubr.bf16.gmra.mxu1 %v7795_v36  ;;  %v263_v36 = vld [vmem:[#allocation2] sm:$0xff] }
  0xd5   : > { %934 = vmatmul.mubr.bf16.gmra.mxu0 %v7793_v54  ;;  %9613 = vmatprep.mubr.msk.bf16.mxu1 %vm11119_vm0, %v13636_v0  ;;  %v7799_v54 = vcombine.low %v11650_v40, %v371_v51  ;;  %v7827_v3 = vcombine.high %v263_v36, %v10938_v42  ;;  %v7826_v46 = vcombine.low %v263_v36, %v10938_v42  ;;  %v10428_v51 = vld [vmem:[%s11294_s11 + $0x230] sm:$0xff]  }
  0xd6   : > { %941 = vmatprep.mubr.bf16.mxu0 %v7797_v33  ;;  %v7801_v33 = vcombine.low %v11489_v4, %v372_v58  ;;  %v10425_v58 = vld [vmem:[%s11294_s11 + $0x1f0] sm:$0xff]   ;;  %v13657_v36 = vcombine.low %v11335_v28, %v11342_v32  ;;  %v13658_v42 = vcombine.low %v11330_v23, %v11339_v30  ;;  %v10455_v28 = vld [vmem:[%s11294_s11 + $0x218] sm:$0xff]   ;;  %v13660_v32 = vcombine.low %v11360_v43, %v11364_v45  ;;  %v10472_v43 = vld [vmem:[%s11294_s11 + $0x208] sm:$0xff]  }
  0xd7   : > { %v10427_v4 = vld [vmem:[%s11294_s11 + $0x1b0] sm:$0xff]   ;;  %v13663_v45 = vcombine.low %v11394_v60, %v11396_v61  ;;  %v13668_v60 = vcombine.high %v11429_v15, %v11445_v25  ;;  %v13669_v61 = vcombine.low %v11443_v24, %v11449_v27  ;;  %v13675_v24 = vcombine.low %v11509_v21, %v11517_v34 }
  0xd8   : > { %v13677_v27 = vcombine.high %v11523_v41, %v11531_v59 }
  0xdc   : > { %9614 = vmatmul.mubr.bf16.gmra.mxu1 %v7798_v47 }
  0xdd   : > { %942 = vmatmul.mubr.bf16.gmra.mxu0 %v7796_v1  ;;  %9617 = vmatprep.mubr.msk.bf16.mxu1 %vm11119_vm0, %v13636_v0  ;;  %v10419_v1 = vld [vmem:[%s11294_s11 + $0x238] sm:$0xff]  }
  0xde   : > { %949 = vmatprep.mubr.bf16.mxu0 %v7800_v17  ;;  %v10939_v17 = vld [vmem:[#allocation2 + $0x14] sm:$0xf] }
  0xdf   : > { %v7828_v47 = vcombine.low %v264_v48, %v10939_v17  ;;  %v13656_v48 = vcombine.high %v11330_v23, %v11339_v30  ;;  %v10450_v17 = vld [vmem:[%s11294_s11 + $0x1d8] sm:$0xff]   ;;  %v10459_v30 = vld [vmem:[%s11294_s11 + $0x1d0] sm:$0xff]  }
  0xe0   : > { %v10451_v23 = vld [vmem:[%s11294_s11 + $0x198] sm:$0xff]  }
  0xe4   : > { %9618 = vmatmul.mubr.bf16.gmra.mxu1 %v7801_v33  ;;  %v10432_v33 = vld [vmem:[%s11294_s11 + $0x1e8] sm:$0xff]  }
  0xe5   : > { %950 = vmatmul.mubr.bf16.gmra.mxu0 %v7799_v54  ;;  %9637 = vmatprep.mubr.msk.bf16.mxu1 %vm11119_vm0, %v13636_v0  ;;  %v10442_v54 = vld [vmem:[%s11294_s11 + $0x1a0] sm:$0xff]  }
  0xe6   : > { %1382 = vmatprep.mubr.bf16.mxu0 %v7827_v3  ;;  %v10435_v3 = vld [vmem:[%s11294_s11 + $0x1a8] sm:$0xff]  }
  0xec   : > { %9638 = vmatmul.mubr.bf16.vlgmr.msra.gmra.mxu1 %v7828_v47  ;;  %v10460_v47 = vld [vmem:[%s11294_s11 + $0x190] sm:$0xff]  }
  0xed   : > { %1383 = vmatmul.mubr.bf16.vlgmr.msra.gmra.mxu0 %v7826_v46  ;;  %9698 = vmatpush3.bf16.msra.mxu1 %v10419_v1  ;;  %v10437_v46 = vld [vmem:[%s11294_s11 + $0x228] sm:$0xff]   ;;  %v10446_v1 = vld [vmem:[%s11294_s11 + $0x220] sm:$0xff]  }
  0xee   : > { %8643 = vmatpush3.bf16.msra.mxu0 %v10418_v49  ;;  %9641 = vmatprep.mubr.msk.bf16.mxu1 %vm11119_vm0, %v13636_v0  ;;  %v10441_v49 = vld [vmem:[%s11294_s11 + $0x1e0] sm:$0xff]  }
  0xef   : > { %1390 = vmatprep.mubr.bf16.mxu0 %v13656_v48  ;;  %8644 = vmatprep.subr.bf16.mxu0 %v10425_v58  ;;  %v13661_v58 = vcombine.low %v11347_v35, %v11362_v44  ;;  %v13662_v48 = vcombine.high %v11374_v50, %v11384_v55 }
  0xf0   : > { %9699 = vmatprep.subr.bf16.mxu1 %v13636_v0 }
  0xf1   : > { %9700 = vmatpush3.bf16.msra.mxu1 %v10428_v51  ;;  %v10464_v51 = vld [vmem:[%s11294_s11 + $0x210] sm:$0xff]  }
  0xf2   : > { %8645 = vmatpush3.bf16.msra.mxu0 %v10427_v4  ;;  %9701 = vmatprep.subr.bf16.mxu1 %v13636_v0  ;;  %v13659_v4 = vcombine.high %v11347_v35, %v11362_v44  ;;  %v10469_v35 = vld [vmem:[%s11294_s11 + $0x188] sm:$0xff]   ;;  %v10476_v44 = vld [vmem:[%s11294_s11 + $0x1c0] sm:$0xff]  }
  0xf3   : > { %8646 = vmatprep.subr.bf16.mxu0 %v10432_v33  ;;  %v10468_v33 = vld [vmem:[%s11294_s11 + $0x1c8] sm:$0xff]  }
  0xf4   : > { %9642 = vmatmul.mubr.bf16.gmra.mxu1 %v13657_v36  ;;  %v10478_v36 = vld [vmem:[%s11294_s11 + $0x200] sm:$0xff]  }
  0xf5   : > { %1391 = vmatmul.mubr.bf16.gmra.mxu0 %v13658_v42  ;;  %9645 = vmatprep.mubr.msk.bf16.mxu1 %vm11119_vm0, %v13636_v0 }
  0xf6   : > { %1398 = vmatprep.mubr.bf16.mxu0 %v13659_v4  ;;  %8647 = vmatpush3.bf16.msra.mxu0 %v10435_v3  ;;  %v10477_v3 = vld [vmem:[%s11294_s11 + $0x180] sm:$0xff]  }
  0xf7   : > { %9702 = vmatpush3.bf16.msra.mxu1 %v10437_v46  ;;  %8648 = vmatprep.subr.bf16.mxu0 %v10441_v49  ;;  %v13664_v46 = vcombine.low %v11374_v50, %v11384_v55  ;;  %v13665_v49 = vcombine.high %v11403_v2, %v11417_v10  ;;  %v13666_v50 = vcombine.low %v11422_v11, %v11424_v12 }
  0xf8   : > { %9703 = vmatprep.subr.bf16.mxu1 %v13636_v0  ;;  %v13667_v55 = vcombine.low %v11403_v2, %v11417_v10  ;;  %v13670_v11 = vcombine.low %v11429_v15, %v11445_v25  ;;  %v13671_v2 = vcombine.high %v11459_v38, %v11473_v52  ;;  %v13672_v10 = vcombine.low %v11485_v63, %v11495_v7 }
  0xf9   : > { %v13673_v12 = vcombine.low %v11459_v38, %v11473_v52  ;;  %v13674_v15 = vcombine.high %v11493_v6, %v11513_v29  ;;  %v13676_v25 = vcombine.low %v11493_v6, %v11513_v29  ;;  %v13678_v38 = vcombine.low %v11533_v13, %v11541_v20 }
  0xfa   : > { %8649 = vmatpush3.bf16.msra.mxu0 %v10442_v54  ;;  %v10485_v54 = vld [vmem:[%s11294_s11 + $0x2b8] sm:$0xff]   ;;  %v13679_v52 = vcombine.low %v11523_v41, %v11531_v59  ;;  %v13680_v63 = vcombine.high %v11539_v19, %v11559_v56  ;;  %v13681_v7 = vcombine.low %v11553_v18, %v11563_v8  ;;  %v13682_v29 = vcombine.low %v11539_v19, %v11559_v56 }
  0xfb   : > { %9704 = vmatpush3.bf16.msra.mxu1 %v10446_v1  ;;  %8650 = vmatprep.subr.bf16.mxu0 %v10450_v17  ;;  %v13683_v41 = vcombine.high %v11561_v53, %v11581_v57  ;;  %v13684_v19 = vcombine.low %v11575_v5, %v11585_v31 }
  0xfc   : > { %9646 = vmatmul.mubr.bf16.gmra.mxu1 %v13660_v32  ;;  %9705 = vmatprep.subr.bf16.mxu1 %v13636_v0  ;;  %v13686_v32 = vcombine.high %v11583_v37, %v11603_v16 }
  0xfd   : > { %1399 = vmatmul.mubr.bf16.gmra.mxu0 %v13661_v58  ;;  %9649 = vmatprep.mubr.msk.bf16.mxu1 %vm11119_vm0, %v13636_v0 }
  0xfe   : > { %1406 = vmatprep.mubr.bf16.mxu0 %v13662_v48  ;;  %8651 = vmatpush3.bf16.msra.mxu0 %v10451_v23  ;;  %v13685_v23 = vcombine.low %v11561_v53, %v11581_v57 }
  0xff   : > { %9706 = vmatpush3.bf16.msra.mxu1 %v10455_v28  ;;  %8652 = vmatprep.subr.bf16.mxu0 %v10459_v30 }
 0x100   : > { %9707 = vmatprep.subr.bf16.mxu1 %v13636_v0 }
 0x102   : > { %8653 = vmatpush3.bf16.msra.mxu0 %v10460_v47 }
 0x103   : > { %9708 = vmatpush3.bf16.msra.mxu1 %v10464_v51  ;;  %8654 = vmatprep.subr.bf16.mxu0 %v10468_v33 }
 0x104   : > { %9650 = vmatmul.mubr.bf16.gmra.mxu1 %v13663_v45  ;;  %9709 = vmatprep.subr.bf16.mxu1 %v13636_v0 }
 0x105   : > { %1407 = vmatmul.mubr.bf16.gmra.mxu0 %v13664_v46  ;;  %9653 = vmatprep.mubr.msk.bf16.mxu1 %vm11119_vm0, %v13636_v0  ;;  %v13689_v46 = vcombine.high %v11605_v14, %v11625_v62 }
 0x106   : > { %1414 = vmatprep.mubr.bf16.mxu0 %v13665_v49  ;;  %8655 = vmatpush3.bf16.msra.mxu0 %v10469_v35  ;;  %v13687_v35 = vcombine.low %v11597_v26, %v11607_v9 }
 0x107   : > { %9710 = vmatpush3.bf16.msra.mxu1 %v10472_v43  ;;  %8656 = vmatprep.subr.bf16.mxu0 %v10476_v44  ;;  %v13688_v44 = vcombine.low %v11583_v37, %v11603_v16 }
 0x108   : > { %9711 = vmatprep.subr.bf16.mxu1 %v13636_v0 }
 0x10a   : > { %8657 = vmatpush3.bf16.msra.mxu0 %v10477_v3 }
 0x10b   : > { %9712 = vmatpush3.bf16.msra.mxu1 %v10478_v36  ;;  %8771 = vmatprep.subr.bf16.mxu0 %v10485_v54 }
 0x10c   : > { %9654 = vmatmul.mubr.bf16.gmra.mxu1 %v13666_v50  ;;  %9773 = vmatprep.subr.bf16.mxu1 %v13636_v0 }
 0x10d   : > { %1415 = vmatmul.mubr.bf16.gmra.mxu0 %v13667_v55  ;;  %9657 = vmatprep.mubr.msk.bf16.mxu1 %vm11119_vm0, %v13636_v0  ;;  %v10940_v55 = vld [vmem:[#allocation2 + $0x138] sm:$0xff] }
 0x10e   : > { %1422 = vmatprep.mubr.bf16.mxu0 %v13668_v60  ;;  %v7866_v16 = vcombine.high %v10940_v55, %v11642_v39 }
 0x114   : > { %9658 = vmatmul.mubr.bf16.gmra.mxu1 %v13669_v61 }
 0x115   : > { %1423 = vmatmul.mubr.bf16.gmra.mxu0 %v13670_v11  ;;  %9661 = vmatprep.mubr.msk.bf16.mxu1 %vm11119_vm0, %v13636_v0  ;;  %v13690_v11 = vld [vmem:[#allocation16_spill] sm:$0xff] }
 0x116   : > { %1430 = vmatprep.mubr.bf16.mxu0 %v13671_v2  ;;  %v13691_v2 = vcombine.low %v11619_v22, %v13690_v11  ;;  %v10498_v11 = vld [vmem:[%s11294_s11 + $0x2f0] sm:$0xff]  }
 0x11c   : > { %9662 = vmatmul.mubr.bf16.gmra.mxu1 %v13672_v10 }
 0x11d   : > { %1431 = vmatmul.mubr.bf16.gmra.mxu0 %v13673_v12  ;;  %9665 = vmatprep.mubr.msk.bf16.mxu1 %vm11119_vm0, %v13636_v0  ;;  %v13692_v12 = vcombine.low %v11605_v14, %v11625_v62 }
 0x11e   : > { %1438 = vmatprep.mubr.bf16.mxu0 %v13674_v15 }
 0x124   : > { %9666 = vmatmul.mubr.bf16.gmra.mxu1 %v13675_v24 }
 0x125   : > { %1439 = vmatmul.mubr.bf16.gmra.mxu0 %v13676_v25  ;;  %9669 = vmatprep.mubr.msk.bf16.mxu1 %vm11119_vm0, %v13636_v0 }
 0x126   : > { %1446 = vmatprep.mubr.bf16.mxu0 %v13677_v27 }
 0x12c   : > { %9670 = vmatmul.mubr.bf16.gmra.mxu1 %v13678_v38 }
 0x12d   : > { %1447 = vmatmul.mubr.bf16.gmra.mxu0 %v13679_v52  ;;  %9673 = vmatprep.mubr.msk.bf16.mxu1 %vm11119_vm0, %v13636_v0 }
 0x12e   : > { %1454 = vmatprep.mubr.bf16.mxu0 %v13680_v63  ;;  %v7865_v63 = vcombine.low %v10940_v55, %v11642_v39  ;;  %v10496_v55 = vld [vmem:[%s11294_s11 + $0x2b0] sm:$0xff]  }
 0x134   : > { %v992_v6 = vpop.f32.mrf.mxu1  ;;  %9674 = vmatmul.mubr.bf16.gmra.mxu1 %v13681_v7  ;;  %v10941_v7 = vld [vmem:[#allocation2 + $0x150] sm:$0xff] }
 0x135   : > { %v8400_v21 = vpop.f32.mrf.mxu0  ;;  %1455 = vmatmul.mubr.bf16.gmra.mxu0 %v13682_v29  ;;  %9677 = vmatprep.mubr.msk.bf16.mxu1 %vm11119_vm0, %v13636_v0  ;;  %v7869_v62 = vcombine.high %v10941_v7, %v11650_v40 }
 0x136   : > { %v9563_v34 = vpop.f32.mrf.mxu1  ;;  %1462 = vmatprep.mubr.bf16.mxu0 %v13683_v41  ;;  %v13694_v41 = vld [vmem:[#allocation13_spill] sm:$0xff] }
 0x137   : > { %v8401_v59 = vpop.f32.mrf.mxu0  ;;  %v13693_v34 = vld [vmem:[#allocation12_spill] sm:$0xff] }
 0x138   : > { %v8402_v13 = vadd.f32 %v8401_v59, %v8400_v21  ;;  %v995_v20 = vpop.f32.mrf.mxu1  ;;  %v13695_v59 = vcombine.low %v13693_v34, %v13694_v41  ;;  %v10514_v34 = vld [vmem:[%s11294_s11 + $0x2a0] sm:$0xff]  }
 0x139   : > { %v8403_v42 = vpop.f32.mrf.mxu0 }
 0x13a   : > { %v11798_v4 = vadd.f32 %v8402_v13, %v992_v6  ;;  %v9564_v8 = vpop.f32.mrf.mxu1 }
 0x13b   : > { %v8404_v18 = vpop.f32.mrf.mxu0 }
 0x13c   : > { %v8405_v1 = vadd.f32 %v8404_v18, %v8403_v42  ;;  %v1000_v17 = vpop.f32.mrf.mxu1  ;;  %9678 = vmatmul.mubr.bf16.gmra.mxu1 %v13684_v19 }
 0x13d   : > { %v8406_v56 = vpop.f32.mrf.mxu0  ;;  %1463 = vmatmul.mubr.bf16.gmra.mxu0 %v13685_v23  ;;  %9681 = vmatprep.mubr.msk.bf16.mxu1 %vm11119_vm0, %v13636_v0  ;;  %v10483_v23 = vld [vmem:[#allocation2 + $0x1c] ss:$12 sps:$4 sm:$0xff]  }
 0x13e   : > { %v11808_v28 = vadd.f32 %v8405_v1, %v995_v20  ;;  %v9567_v30 = vpop.f32.mrf.mxu1  ;;  %1470 = vmatprep.mubr.bf16.mxu0 %v13686_v32  ;;  %v10942_v1 = vld [vmem:[#allocation2 + $0x15c] sm:$0xff] }
 0x13f   : > { %v8407_v47 = vpop.f32.mrf.mxu0 }
 0x140   : > { %v8408_v58 = vadd.f32 %v8407_v47, %v8406_v56  ;;  %v1003_v51 = vpop.f32.mrf.mxu1 }
 0x141   : > { %v8409_v31 = vpop.f32.mrf.mxu0 }
 0x142   : > { %v11813_v5 = vadd.f32 %v8408_v58, %v1000_v17  ;;  %v9568_v33 = vpop.f32.mrf.mxu1  ;;  %v7868_v17 = vcombine.low %v10941_v7, %v10942_v1  ;;  %v13696_v58 = vld [vmem:[#allocation14_spill] sm:$0xff]  ;;  %v10508_v7 = vld [vmem:[%s11294_s11 + $0x268] sm:$0xff]  }
 0x143   : > { %v8410_v48 = vpop.f32.mrf.mxu0 }
 0x144   : > { %v8411_v53 = vadd.f32 %v8410_v48, %v8409_v31  ;;  %v1008_v57 = vpop.f32.mrf.mxu1  ;;  %9682 = vmatmul.mubr.bf16.gmra.mxu1 %v13687_v35 }
 0x145   : > { %v8412_v43 = vpop.f32.mrf.mxu0  ;;  %1471 = vmatmul.mubr.bf16.gmra.mxu0 %v13688_v44  ;;  %9685 = vmatprep.mubr.msk.bf16.mxu1 %vm11119_vm0, %v13636_v0 }
 0x146   : > { %v11823_v45 = vadd.f32 %v8411_v53, %v1003_v51  ;;  %v9571_v3 = vpop.f32.mrf.mxu1  ;;  %1478 = vmatprep.mubr.bf16.mxu0 %v13689_v46  ;;  %v13697_v51 = vld [vmem:[#allocation15_spill] sm:$0xff]  ;;  %v10486_v46 = vld [vmem:[%s11294_s11 + $0x278] sm:$0xff]  }
 0x147   : > { %v8413_v49 = vpop.f32.mrf.mxu0  ;;  %v13698_v31 = vcombine.low %v13696_v58, %v13697_v51  ;;  %v10526_v58 = vld [vmem:[%s11294_s11 + $0x258] sm:$0xff]  }
 0x148   : > { %v8414_v36 = vadd.f32 %v8413_v49, %v8412_v43  ;;  %v1011_v54 = vpop.f32.mrf.mxu1  ;;  %v10481_v43 = vld [vmem:[#allocation2 + $0x18] ss:$12 sps:$4 sm:$0xff]   ;;  %v10487_v49 = vld [vmem:[%s11294_s11 + $0x2f8] sm:$0xff]  }
 0x149   : > { %v8415_v9 = vpop.f32.mrf.mxu0 }
 0x14a   : > { %v11828_v26 = vadd.f32 %v8414_v36, %v1008_v57  ;;  %v9572_v50 = vpop.f32.mrf.mxu1  ;;  %v10484_v57 = vld [vmem:[#allocation2 + $0x20] ss:$12 sps:$4 sm:$0xff]  }
 0x14b   : > { %v8416_v37 = vpop.f32.mrf.mxu0 }
 0x14c   : > { %v8417_v60 = vadd.f32 %v8416_v37, %v8415_v9  ;;  %v1016_v61 = vpop.f32.mrf.mxu1  ;;  %9686 = vmatmul.mubr.bf16.gmra.mxu1 %v13691_v2 }
 0x14d   : > { %v8418_v10 = vpop.f32.mrf.mxu0  ;;  %1479 = vmatmul.mubr.bf16.gmra.mxu0 %v13692_v12  ;;  %9689 = vmatprep.mubr.msk.bf16.mxu1 %vm11119_vm0, %v13636_v0 }
 0x14e   : > { %v11839_v15 = vadd.f32 %v8417_v60, %v1011_v54  ;;  %v9575_v24 = vpop.f32.mrf.mxu1  ;;  %1486 = vmatprep.mubr.bf16.mxu0 %v7866_v16  ;;  %v10490_v54 = vld [vmem:[#allocation2 + $0x34] ss:$12 sps:$4 sm:$0xff]  }
 0x14f   : > { %v8419_v25 = vpop.f32.mrf.mxu0 }
 0x150   : > { %v8420_v27 = vadd.f32 %v8419_v25, %v8418_v10  ;;  %v1019_v38 = vpop.f32.mrf.mxu1  ;;  %v10503_v10 = vld [vmem:[%s11294_s11 + $0x2a8] sm:$0xff]  }
 0x151   : > { %v8421_v52 = vpop.f32.mrf.mxu0  ;;  %v10491_v25 = vld [vmem:[#allocation2 + $0x38] ss:$12 sps:$4 sm:$0xff]  }
 0x152   : > { %v11842_v22 = vadd.f32 %v8420_v27, %v1016_v61  ;;  %v9576_v6 = vpop.f32.mrf.mxu1  ;;  %v10497_v61 = vld [vmem:[%s11294_s11 + $0x270] sm:$0xff]  }
 0x153   : > { %v8422_v14 = vpop.f32.mrf.mxu0  ;;  %v11873_v6 = vld [vmem:[#allocation2 + $0x4c] ss:$12 sps:$4 sm:$0xff]  }
 0x154   : > { %v8423_v21 = vadd.f32 %v8422_v14, %v8421_v52  ;;  %v1024_v29 = vpop.f32.mrf.mxu1  ;;  %9690 = vmatmul.mubr.bf16.gmra.mxu1 %v13695_v59  ;;  %v10509_v14 = vld [vmem:[%s11294_s11 + $0x2e8] sm:$0xff]  }
 0x155   : > { %v8424_v13 = vpop.f32.mrf.mxu0  ;;  %1487 = vmatmul.mubr.bf16.gmra.mxu0 %v7865_v63  ;;  %9693 = vmatprep.mubr.msk.bf16.mxu1 %vm11119_vm0, %v13636_v0 }
 0x156   : > { %v11850_v20 = vadd.f32 %v8423_v21, %v1019_v38  ;;  %v9579_v39 = vpop.f32.mrf.mxu1  ;;  %1494 = vmatprep.mubr.bf16.mxu0 %v7869_v62  ;;  %v10488_v38 = vld [vmem:[#allocation2 + $0x30] ss:$12 sps:$4 sm:$0xff]  }
 0x157   : > { %v8425_v42 = vpop.f32.mrf.mxu0  ;;  %v10515_v39 = vld [vmem:[%s11294_s11 + $0x260] sm:$0xff]  }
 0x158   : > { %v8426_v8 = vadd.f32 %v8425_v42, %v8424_v13  ;;  %v1027_v18 = vpop.f32.mrf.mxu1 }
 0x159   : > { %v8427_v40 = vpop.f32.mrf.mxu0 }
 0x15a   : > { %v11852_v19 = vadd.f32 %v8426_v8, %v1024_v29  ;;  %v9580_v56 = vpop.f32.mrf.mxu1  ;;  %v10520_v8 = vld [vmem:[%s11294_s11 + $0x2e0] sm:$0xff]  }
 0x15b   : > { %v8428_v30 = vpop.f32.mrf.mxu0 }
 0x15c   : > { %v8429_v32 = vadd.f32 %v8428_v30, %v8427_v40  ;;  %v1032_v47 = vpop.f32.mrf.mxu1  ;;  %9694 = vmatmul.mubr.bf16.gmra.mxu1 %v13698_v31  ;;  %v10531_v31 = vld [vmem:[%s11294_s11 + $0x2d8] sm:$0xff]  }
 0x15d   : > { %v8430_v33 = vpop.f32.mrf.mxu0  ;;  %1495 = vmatmul.mubr.bf16.gmra.mxu0 %v7868_v17  ;;  %9713 = vmatprep.mubr.msk.bf16.mxu1 %vm11119_vm0, %v13636_v0  ;;  %v10495_v17 = vld [vmem:[#allocation2 + $0x50] ss:$12 sps:$4 sm:$0xff]  }
 0x15e   : > { %v11859_v48 = vadd.f32 %v8429_v32, %v1027_v18  ;;  %v9583_v53 = vpop.f32.mrf.mxu1  ;;  %2180 = vmatprep.mubr.bf16.mxu0 %v10483_v23  ;;  %v10525_v18 = vld [vmem:[%s11294_s11 + $0x298] sm:$0xff]  }
 0x15f   : > { %v8431_v35 = vpop.f32.mrf.mxu0  ;;  %v11890_v23 = vld [vmem:[#allocation2 + $0x48] ss:$12 sps:$4 sm:$0xff]  }
 0x160   : > { %v8432_v44 = vadd.f32 %v8431_v35, %v8430_v33  ;;  %v1035_v3 = vpop.f32.mrf.mxu1 }
 0x161   : > { %v8433_v36 = vpop.f32.mrf.mxu0 }
 0x162   : > { %v11863_v9 = vadd.f32 %v8432_v44, %v1032_v47  ;;  %v9584_v50 = vpop.f32.mrf.mxu1  ;;  %v11892_v47 = vld [vmem:[#allocation2 + $0x64] ss:$12 sps:$4 sm:$0xff]  }
 0x163   : > { %v8434_v16 = vpop.f32.mrf.mxu0 }
 0x164   : > { %v8435_v37 = vadd.f32 %v8434_v16, %v8433_v36  ;;  %v1040_v60 = vpop.f32.mrf.mxu1  ;;  %9714 = vmatmul.mubr.bf16.vlgmr.msra.gmra.mxu1 %v10484_v57  ;;  %v10536_v57 = vld [vmem:[%s11294_s11 + $0x290] sm:$0xff]   ;;  %v10547_v36 = vld [vmem:[%s11294_s11 + $0x288] sm:$0xff]  }
 0x165   : > { %v8436_v2 = vpop.f32.mrf.mxu0  ;;  %2181 = vmatmul.mubr.bf16.vlgmr.msra.gmra.mxu0 %v10481_v43  ;;  %9774 = vmatpush3.bf16.msra.mxu1 %v10487_v49  ;;  %v10542_v49 = vld [vmem:[%s11294_s11 + $0x2d0] sm:$0xff]  }
 0x166   : > { %v11869_v12 = vadd.f32 %v8435_v37, %v1035_v3  ;;  %v9587_v24 = vpop.f32.mrf.mxu1  ;;  %8772 = vmatpush3.bf16.msra.mxu0 %v10486_v46  ;;  %9717 = vmatprep.mubr.msk.bf16.mxu1 %vm11119_vm0, %v13636_v0  ;;  %v10537_v3 = vld [vmem:[%s11294_s11 + $0x250] sm:$0xff]  }
 0x167   : > { %v8437_v27 = vpop.f32.mrf.mxu0  ;;  %2188 = vmatprep.mubr.bf16.mxu0 %v10490_v54  ;;  %8773 = vmatprep.subr.bf16.mxu0 %v10496_v55  ;;  %v10502_v55 = vld [vmem:[#allocation2 + $0x68] ss:$12 sps:$4 sm:$0xff]   ;;  %v11910_v37 = vld [vmem:[#allocation2 + $0x60] ss:$12 sps:$4 sm:$0xff]   ;;  %v10553_v24 = vld [vmem:[%s11294_s11 + $0x2c8] sm:$0xff]  }
 0x168   : > { %v8438_v52 = vadd.f32 %v8437_v27, %v8436_v2  ;;  %v1043_v63 = vpop.f32.mrf.mxu1  ;;  %9775 = vmatprep.subr.bf16.mxu1 %v13636_v0  ;;  %v10548_v2 = vld [vmem:[%s11294_s11 + $0x248] sm:$0xff]  }
 0x169   : > { %v8439_v62 = vpop.f32.mrf.mxu0  ;;  %9776 = vmatpush3.bf16.msra.mxu1 %v10498_v11  ;;  %v11912_v11 = vld [vmem:[#allocation2 + $0x7c] ss:$12 sps:$4 sm:$0xff]  }
 0x16a   : > { %v11878_v21 = vadd.f32 %v8438_v52, %v1040_v60  ;;  %v9588_v29 = vpop.f32.mrf.mxu1  ;;  %8774 = vmatpush3.bf16.msra.mxu0 %v10497_v61  ;;  %9777 = vmatprep.subr.bf16.mxu1 %v13636_v0 }
 0x16b   : > { %v8440_v41 = vpop.f32.mrf.mxu0  ;;  %8775 = vmatprep.subr.bf16.mxu0 %v10503_v10  ;;  %v10560_v29 = vld [vmem:[%s11294_s11 + $0x2c0] sm:$0xff]  }
 0x16c   : > { %v8441_v59 = vadd.f32 %v8440_v41, %v8439_v62  ;;  %v1048_v13 = vpop.f32.mrf.mxu1  ;;  %9718 = vmatmul.mubr.bf16.gmra.mxu1 %v10491_v25  ;;  %v10559_v62 = vld [vmem:[%s11294_s11 + $0x240] sm:$0xff]  }
 0x16d   : > { %v8442_v42 = vpop.f32.mrf.mxu0  ;;  %2189 = vmatmul.mubr.bf16.gmra.mxu0 %v10488_v38  ;;  %9721 = vmatprep.mubr.msk.bf16.mxu1 %vm11119_vm0, %v13636_v0  ;;  %v10558_v38 = vld [vmem:[%s11294_s11 + $0x280] sm:$0xff]  }
 0x16e   : > { %v11887_v40 = vadd.f32 %v8441_v59, %v1043_v63  ;;  %v9591_v1 = vpop.f32.mrf.mxu1  ;;  %2196 = vmatprep.mubr.bf16.mxu0 %v11873_v6  ;;  %8776 = vmatpush3.bf16.msra.mxu0 %v10508_v7 }
 0x16f   : > { %v8443_v56 = vpop.f32.mrf.mxu0  ;;  %9778 = vmatpush3.bf16.msra.mxu1 %v10509_v14  ;;  %8777 = vmatprep.subr.bf16.mxu0 %v10514_v34  ;;  %v10566_v34 = vld [vmem:[%s11294_s11 + $0x378] sm:$0xff]  }
 0x170   : > { %v8444_v30 = vadd.f32 %v8443_v56, %v8442_v42  ;;  %v1051_v32 = vpop.f32.mrf.mxu1  ;;  %9779 = vmatprep.subr.bf16.mxu1 %v13636_v0 }
 0x171   : > { %v8445_v51 = vpop.f32.mrf.mxu0 }
 0x172   : > { %v11897_v33 = vadd.f32 %v8444_v30, %v1048_v13  ;;  %v9592_v53 = vpop.f32.mrf.mxu1  ;;  %8778 = vmatpush3.bf16.msra.mxu0 %v10515_v39  ;;  %v11935_v30 = vld [vmem:[#allocation2 + $0x94] ss:$12 sps:$4 sm:$0xff]  }
 0x173   : > { %v8446_v35 = vpop.f32.mrf.mxu0  ;;  %9780 = vmatpush3.bf16.msra.mxu1 %v10520_v8  ;;  %8779 = vmatprep.subr.bf16.mxu0 %v10525_v18  ;;  %v11930_v8 = vld [vmem:[#allocation2 + $0x78] ss:$12 sps:$4 sm:$0xff]   ;;  %v10507_v18 = vld [vmem:[#allocation2 + $0x80] ss:$12 sps:$4 sm:$0xff]  }
 0x174   : > { %v8447_v43 = vadd.f32 %v8446_v35, %v8445_v51  ;;  %v1056_v44 = vpop.f32.mrf.mxu1  ;;  %9722 = vmatmul.mubr.bf16.gmra.mxu1 %v10495_v17  ;;  %9781 = vmatprep.subr.bf16.mxu1 %v13636_v0 }
 0x175   : > { %v8448_v46 = vpop.f32.mrf.mxu0  ;;  %2197 = vmatmul.mubr.bf16.gmra.mxu0 %v11890_v23  ;;  %9725 = vmatprep.mubr.msk.bf16.mxu1 %vm11119_vm0, %v13636_v0 }
 0x176   : > { %v11907_v54 = vadd.f32 %v8447_v43, %v1051_v32  ;;  %v9595_v50 = vpop.f32.mrf.mxu1  ;;  %2204 = vmatprep.mubr.bf16.mxu0 %v11892_v47  ;;  %8780 = vmatpush3.bf16.msra.mxu0 %v10526_v58 }
 0x177   : > { %v8449_v16 = vpop.f32.mrf.mxu0  ;;  %9782 = vmatpush3.bf16.msra.mxu1 %v10531_v31  ;;  %8781 = vmatprep.subr.bf16.mxu0 %v10536_v57 }
 0x178   : > { %v8450_v60 = vadd.f32 %v8449_v16, %v8448_v46  ;;  %v1059_v61 = vpop.f32.mrf.mxu1  ;;  %9783 = vmatprep.subr.bf16.mxu1 %v13636_v0 }
 0x179   : > { %v8451_v10 = vpop.f32.mrf.mxu0 }
 0x17a   : > { %v11917_v25 = vadd.f32 %v8450_v60, %v1056_v44  ;;  %v9596_v27 = vpop.f32.mrf.mxu1  ;;  %8782 = vmatpush3.bf16.msra.mxu0 %v10537_v3  ;;  %v10513_v3 = vld [vmem:[#allocation2 + $0x98] ss:$12 sps:$4 sm:$0xff]  }
 0x17b   : > { %v8452_v52 = vpop.f32.mrf.mxu0  ;;  %9784 = vmatpush3.bf16.msra.mxu1 %v10542_v49  ;;  %8783 = vmatprep.subr.bf16.mxu0 %v10547_v36  ;;  %v11944_v49 = vld [vmem:[#allocation2 + $0x90] ss:$12 sps:$4 sm:$0xff]  }
 0x17c   : > { %v8453_v63 = vadd.f32 %v8452_v52, %v8451_v10  ;;  %v1064_v7 = vpop.f32.mrf.mxu1  ;;  %9726 = vmatmul.mubr.bf16.gmra.mxu1 %v10502_v55  ;;  %9785 = vmatprep.subr.bf16.mxu1 %v13636_v0  ;;  %v11948_v55 = vld [vmem:[#allocation2 + $0xac] ss:$12 sps:$4 sm:$0xff]  }
 0x17d   : > { %v8454_v14 = vpop.f32.mrf.mxu0  ;;  %2205 = vmatmul.mubr.bf16.gmra.mxu0 %v11910_v37  ;;  %9729 = vmatprep.mubr.msk.bf16.mxu1 %vm11119_vm0, %v13636_v0 }
 0x17e   : > { %v11927_v41 = vadd.f32 %v8453_v63, %v1059_v61  ;;  %v9599_v59 = vpop.f32.mrf.mxu1  ;;  %2212 = vmatprep.mubr.bf16.mxu0 %v11912_v11  ;;  %8784 = vmatpush3.bf16.msra.mxu0 %v10548_v2  ;;  %v10519_v63 = vld [vmem:[#allocation2 + $0xb0] ss:$12 sps:$4 sm:$0xff]  }
 0x17f   : > { %v8455_v13 = vpop.f32.mrf.mxu0  ;;  %9786 = vmatpush3.bf16.msra.mxu1 %v10553_v24  ;;  %8785 = vmatprep.subr.bf16.mxu0 %v10558_v38 }
 0x180   : > { %v8456_v39 = vadd.f32 %v8455_v13, %v8454_v14  ;;  %v1067_v42 = vpop.f32.mrf.mxu1  ;;  %9787 = vmatprep.subr.bf16.mxu1 %v13636_v0 }
 0x181   : > { %v8457_v1 = vpop.f32.mrf.mxu0 }
 0x182   : > { %v11933_v17 = vadd.f32 %v8456_v39, %v1064_v7  ;;  %v9600_v56 = vpop.f32.mrf.mxu1  ;;  %8786 = vmatpush3.bf16.msra.mxu0 %v10559_v62  ;;  %v11956_v62 = vld [vmem:[#allocation2 + $0xa8] ss:$12 sps:$4 sm:$0xff]  }
 0x183   : > { %v8458_v32 = vpop.f32.mrf.mxu0  ;;  %9788 = vmatpush3.bf16.msra.mxu1 %v10560_v29  ;;  %8900 = vmatprep.subr.bf16.mxu0 %v10566_v34  ;;  %v11960_v34 = vld [vmem:[#allocation2 + $0xc4] ss:$12 sps:$4 sm:$0xff]  }
 0x184   : > { %v8459_v58 = vadd.f32 %v8458_v32, %v8457_v1  ;;  %v1072_v51 = vpop.f32.mrf.mxu1  ;;  %9730 = vmatmul.mubr.bf16.gmra.mxu1 %v10507_v18  ;;  %9849 = vmatprep.subr.bf16.mxu1 %v13636_v0 }
 0x185   : > { %v8460_v31 = vpop.f32.mrf.mxu0  ;;  %2213 = vmatmul.mubr.bf16.gmra.mxu0 %v11930_v8  ;;  %9733 = vmatprep.mubr.msk.bf16.mxu1 %vm11119_vm0, %v13636_v0 }
 0x186   : > { %v11941_v53 = vadd.f32 %v8459_v58, %v1067_v42  ;;  %v9603_v57 = vpop.f32.mrf.mxu1  ;;  %2220 = vmatprep.mubr.bf16.mxu0 %v11935_v30 }
 0x187   : > { %v8461_v35 = vpop.f32.mrf.mxu0  ;;  %v11968_v57 = vld [vmem:[#allocation2 + $0xc0] ss:$12 sps:$4 sm:$0xff]  }
 0x188   : > { %v8462_v43 = vadd.f32 %v8461_v35, %v8460_v31  ;;  %v1075_v44 = vpop.f32.mrf.mxu1 }
 0x189   : > { %v8463_v46 = vpop.f32.mrf.mxu0 }
 0x18a   : > { %v11946_v36 = vadd.f32 %v8462_v43, %v1072_v51  ;;  %v9604_v50 = vpop.f32.mrf.mxu1  ;;  %v10524_v51 = vld [vmem:[#allocation2 + $0xc8] ss:$12 sps:$4 sm:$0xff]  }
 0x18b   : > { %v8464_v16 = vpop.f32.mrf.mxu0 }
 0x18c   : > { %v8465_v60 = vadd.f32 %v8464_v16, %v8463_v46  ;;  %v1080_v61 = vpop.f32.mrf.mxu1  ;;  %9734 = vmatmul.mubr.bf16.gmra.mxu1 %v10513_v3 }
 0x18d   : > { %v8466_v2 = vpop.f32.mrf.mxu0  ;;  %2221 = vmatmul.mubr.bf16.gmra.mxu0 %v11944_v49  ;;  %9737 = vmatprep.mubr.msk.bf16.mxu1 %vm11119_vm0, %v13636_v0 }
 0x18e   : > { %v11953_v10 = vadd.f32 %v8465_v60, %v1075_v44  ;;  %v9607_v24 = vpop.f32.mrf.mxu1  ;;  %2228 = vmatprep.mubr.bf16.mxu0 %v11948_v55  ;;  %v11972_v44 = vld [vmem:[#allocation2 + $0xdc] ss:$12 sps:$4 sm:$0xff]  }
 0x18f   : > { %v8467_v27 = vpop.f32.mrf.mxu0 }
 0x190   : > { %v8468_v38 = vadd.f32 %v8467_v27, %v8466_v2  ;;  %v1083_v52 = vpop.f32.mrf.mxu1 }
 0x191   : > { %v8469_v7 = vpop.f32.mrf.mxu0 }
 0x192   : > { %v11958_v14 = vadd.f32 %v8468_v38, %v1080_v61  ;;  %v9608_v29 = vpop.f32.mrf.mxu1  ;;  %v10530_v38 = vld [vmem:[#allocation2 + $0xe0] ss:$12 sps:$4 sm:$0xff]  }
 0x193   : > { %v8470_v59 = vpop.f32.mrf.mxu0 }
 0x194   : > { %v8471_v13 = vadd.f32 %v8470_v59, %v8469_v7  ;;  %v1088_v39 = vpop.f32.mrf.mxu1  ;;  %9738 = vmatmul.mubr.bf16.gmra.mxu1 %v10519_v63  ;;  %v11980_v63 = vld [vmem:[#allocation2 + $0xd8] ss:$12 sps:$4 sm:$0xff]   ;;  %v11984_v59 = vld [vmem:[#allocation2 + $0xf4] ss:$12 sps:$4 sm:$0xff]  }
 0x195   : > { %v8472_v42 = vpop.f32.mrf.mxu0  ;;  %2229 = vmatmul.mubr.bf16.gmra.mxu0 %v11956_v62  ;;  %9741 = vmatprep.mubr.msk.bf16.mxu1 %vm11119_vm0, %v13636_v0 }
 0x196   : > { %v11965_v18 = vadd.f32 %v8471_v13, %v1083_v52  ;;  %v9611_v1 = vpop.f32.mrf.mxu1  ;;  %2236 = vmatprep.mubr.bf16.mxu0 %v11960_v34 }
 0x197   : > { %v8473_v56 = vpop.f32.mrf.mxu0 }
 0x198   : > { %v8474_v32 = vadd.f32 %v8473_v56, %v8472_v42  ;;  %v1091_v58 = vpop.f32.mrf.mxu1 }
 0x199   : > { %v8475_v31 = vpop.f32.mrf.mxu0 }
 0x19a   : > { %v11970_v35 = vadd.f32 %v8474_v32, %v1088_v39  ;;  %v9612_v43 = vpop.f32.mrf.mxu1 }
 0x19b   : > { %v8476_v3 = vpop.f32.mrf.mxu0  ;;  %v10535_v43 = vld [vmem:[#allocation2 + $0xf8] ss:$12 sps:$4 sm:$0xff]  }
 0x19c   : > { %v8477_v46 = vadd.f32 %v8476_v3, %v8475_v31  ;;  %v1096_v50 = vpop.f32.mrf.mxu1  ;;  %9742 = vmatmul.mubr.bf16.gmra.mxu1 %v10524_v51 }
 0x19d   : > { %v8478_v16 = vpop.f32.mrf.mxu0  ;;  %2237 = vmatmul.mubr.bf16.gmra.mxu0 %v11968_v57  ;;  %9745 = vmatprep.mubr.msk.bf16.mxu1 %vm11119_vm0, %v13636_v0 }
 0x19e   : > { %v11977_v60 = vadd.f32 %v8477_v46, %v1091_v58  ;;  %v9615_v61 = vpop.f32.mrf.mxu1  ;;  %2244 = vmatprep.mubr.bf16.mxu0 %v11972_v44  ;;  %v11992_v46 = vld [vmem:[#allocation2 + $0xf0] ss:$12 sps:$4 sm:$0xff]  }
 0x19f   : > { %v8479_v2 = vpop.f32.mrf.mxu0  ;;  %v11996_v61 = vld [vmem:[#allocation2 + $0x10c] ss:$12 sps:$4 sm:$0xff]  }
 0x1a0   : > { %v8480_v24 = vadd.f32 %v8479_v2, %v8478_v16  ;;  %v1099_v27 = vpop.f32.mrf.mxu1 }
 0x1a1   : > { %v8481_v52 = vpop.f32.mrf.mxu0 }
 0x1a2   : > { %v11982_v7 = vadd.f32 %v8480_v24, %v1096_v50  ;;  %v9616_v29 = vpop.f32.mrf.mxu1 }
 0x1a3   : > { %v8482_v13 = vpop.f32.mrf.mxu0 }
 0x1a4   : > { %v8483_v39 = vadd.f32 %v8482_v13, %v8481_v52  ;;  %v1104_v42 = vpop.f32.mrf.mxu1  ;;  %9746 = vmatmul.mubr.bf16.gmra.mxu1 %v10530_v38 }
 0x1a5   : > { %v8484_v1 = vpop.f32.mrf.mxu0  ;;  %2245 = vmatmul.mubr.bf16.gmra.mxu0 %v11980_v63  ;;  %9749 = vmatprep.mubr.msk.bf16.mxu1 %vm11119_vm0, %v13636_v0 }
 0x1a6   : > { %v11989_v56 = vadd.f32 %v8483_v39, %v1099_v27  ;;  %v9619_v32 = vpop.f32.mrf.mxu1  ;;  %2252 = vmatprep.mubr.bf16.mxu0 %v11984_v59 }
 0x1a7   : > { %v8485_v58 = vpop.f32.mrf.mxu0 }
 0x1a8   : > { %v8486_v51 = vadd.f32 %v8485_v58, %v8484_v1  ;;  %v1107_v31 = vpop.f32.mrf.mxu1  ;;  %v10541_v1 = vld [vmem:[#allocation2 + $0x110] ss:$12 sps:$4 sm:$0xff]   ;;  %v12004_v58 = vld [vmem:[#allocation2 + $0x108] ss:$12 sps:$4 sm:$0xff]  }
 0x1a9   : > { %v8487_v3 = vpop.f32.mrf.mxu0 }
 0x1aa   : > { %v11994_v50 = vadd.f32 %v8486_v51, %v1104_v42  ;;  %v9620_v16 = vpop.f32.mrf.mxu1 }
 0x1ab   : > { %v8488_v2 = vpop.f32.mrf.mxu0 }
 0x1ac   : > { %13699 = vst [vmem:[#allocation16_spill] sm:$0xff] %v11994_v50  ;;  %v8489_v24 = vadd.f32 %v8488_v2, %v8487_v3  ;;  %v1537_v38 = vpop.f32.mrf.mxu1  ;;  %9750 = vmatmul.mubr.bf16.gmra.mxu1 %v10535_v43  ;;  %v12007_v3 = vld [vmem:[#allocation2 + $0x124] ss:$12 sps:$4 sm:$0xff]  }
 0x1ad   : > { %v8529_v27 = vpop.f32.mrf.mxu0  ;;  %2253 = vmatmul.mubr.bf16.gmra.mxu0 %v11992_v46  ;;  %9753 = vmatprep.mubr.msk.bf16.mxu1 %vm11119_vm0, %v13636_v0 }
 0x1ae   : > { %v12001_v52 = vadd.f32 %v8489_v24, %v1107_v31  ;;  %v9639_v29 = vpop.f32.mrf.mxu1  ;;  %2260 = vmatprep.mubr.bf16.mxu0 %v11996_v61 }
 0x1af   : > { %v8530_v13 = vpop.f32.mrf.mxu0 }
 0x1b0   : > { %13700 = vst [vmem:[#allocation12_spill] sm:$0xff] %v12001_v52  ;;  %v8531_v39 = vadd.f32 %v8530_v13, %v8529_v27  ;;  %v1540_v42 = vpop.f32.mrf.mxu1  ;;  %v12021_v52 = vld [vmem:[#allocation2 + $0x13c] ss:$12 sps:$4 sm:$0xff]  }
 0x1b1   : > { %v8532_v32 = vpop.f32.mrf.mxu0 }
 0x1b2   : > { %v1385_v51 = vadd.f32 %v8531_v39, %v11798_v4  ;;  %v9640_v43 = vpop.f32.mrf.mxu1 }
 0x1b3   : > { %v8533_v16 = vpop.f32.mrf.mxu0 }
 0x1b4   : > { %v12009_v2 = vadd.f32 %v1537_v38, %v1385_v51  ;;  %v8534_v31 = vadd.f32 %v8533_v16, %v8532_v32  ;;  %v1545_v24 = vpop.f32.mrf.mxu1  ;;  %9754 = vmatmul.mubr.bf16.gmra.mxu1 %v10541_v1  ;;  %v10546_v51 = vld [vmem:[#allocation2 + $0x128] ss:$12 sps:$4 sm:$0xff]   ;;  %v12018_v16 = vld [vmem:[#allocation2 + $0x120] ss:$12 sps:$4 sm:$0xff]  }
 0x1b5   : > { %v8535_v29 = vpop.f32.mrf.mxu0  ;;  %2261 = vmatmul.mubr.bf16.gmra.mxu0 %v12004_v58  ;;  %9757 = vmatprep.mubr.msk.bf16.mxu1 %vm11119_vm0, %v13636_v0  ;;  %13703 = vst [vmem:[#allocation15_spill] sm:$0xff] %v12018_v16 }
 0x1b6   : > { %13701 = vst [vmem:[#allocation13_spill] sm:$0xff] %v12009_v2  ;;  %v1388_v27 = vadd.f32 %v8534_v31, %v11808_v28  ;;  %v9643_v13 = vpop.f32.mrf.mxu1  ;;  %2268 = vmatprep.mubr.bf16.mxu0 %v12007_v3 }
 0x1b7   : > { %v8536_v4 = vpop.f32.mrf.mxu0 }
 0x1b8   : > { %v12016_v39 = vadd.f32 %v1540_v42, %v1388_v27  ;;  %v8537_v43 = vadd.f32 %v8536_v4, %v8535_v29  ;;  %v1548_v38 = vpop.f32.mrf.mxu1  ;;  %v13705_v42 = vmov 0.0  }
 0x1b9   : > { %v8538_v32 = vpop.f32.mrf.mxu0 }
 0x1ba   : > { %13702 = vst [vmem:[#allocation14_spill] sm:$0xff] %v12016_v39  ;;  %v1393_v1 = vadd.f32 %v8537_v43, %v11813_v5  ;;  %v9644_v2 = vpop.f32.mrf.mxu1  ;;  %v10552_v43 = vld [vmem:[#allocation2 + $0x140] ss:$12 sps:$4 sm:$0xff]  }
 0x1bb   : > { %v8539_v0 = vpop.f32.mrf.mxu0 }
 0x1bc   : > { %v12023_v50 = vadd.f32 %v1545_v24, %v1393_v1  ;;  %v8540_v28 = vadd.f32 %v8539_v0, %v8538_v32  ;;  %v1553_v31 = vpop.f32.mrf.mxu1  ;;  %9758 = vmatmul.mubr.bf16.gmra.mxu1 %v10546_v51  ;;  %v12032_v32 = vld [vmem:[#allocation2 + $0x138] ss:$12 sps:$4 sm:$0xff]  }
 0x1bd   : > { %v8541_v13 = vpop.f32.mrf.mxu0  ;;  %2269 = vmatmul.mubr.bf16.gmra.mxu0 %v12018_v16  ;;  %9761 = vmatprep.mubr.msk.bf16.mxu1 %vm11119_vm0, %v13705_v42 }
 0x1be   : > { %13704 = vst [vmem:[#allocation17_spill] sm:$0xff] %v12023_v50  ;;  %v1396_v29 = vadd.f32 %v8540_v28, %v11823_v45  ;;  %v9647_v27 = vpop.f32.mrf.mxu1  ;;  %2276 = vmatprep.mubr.bf16.mxu0 %v12021_v52  ;;  %v12035_v50 = vld [vmem:[#allocation2 + $0x154] ss:$12 sps:$4 sm:$0xff]  }
 0x1bf   : > { %v8542_v5 = vpop.f32.mrf.mxu0 }
 0x1c0   : > { %v12030_v2 = vadd.f32 %v1548_v38, %v1396_v29  ;;  %v8543_v4 = vadd.f32 %v8542_v5, %v8541_v13  ;;  %v1556_v24 = vpop.f32.mrf.mxu1 }
 0x1c1   : > { %v8544_v0 = vpop.f32.mrf.mxu0 }
 0x1c2   : > { %13706 = vst [vmem:[#allocation18_spill] sm:$0xff] %v12030_v2  ;;  %v1401_v51 = vadd.f32 %v8543_v4, %v11828_v26  ;;  %v9648_v1 = vpop.f32.mrf.mxu1  ;;  %v10557_v4 = vld [vmem:[#allocation2 + $0x158] ss:$12 sps:$4 sm:$0xff]  }
 0x1c3   : > { %v8545_v39 = vpop.f32.mrf.mxu0  ;;  %v12049_v1 = vld [vmem:[#allocation2 + $0x16c] ss:$12 sps:$4 sm:$0xff]  }
 0x1c4   : > { %v12037_v16 = vadd.f32 %v1553_v31, %v1401_v51  ;;  %v8546_v45 = vadd.f32 %v8545_v39, %v8544_v0  ;;  %v1561_v28 = vpop.f32.mrf.mxu1  ;;  %9762 = vmatmul.mubr.bf16.gmra.mxu1 %v10552_v43  ;;  %v12046_v0 = vld [vmem:[#allocation2 + $0x150] ss:$12 sps:$4 sm:$0xff]  }
 0x1c5   : > { %v8547_v27 = vpop.f32.mrf.mxu0  ;;  %2277 = vmatmul.mubr.bf16.gmra.mxu0 %v12032_v32  ;;  %9765 = vmatprep.mubr.msk.bf16.mxu1 %vm11119_vm0, %v13705_v42 }
 0x1c6   : > { %13707 = vst [vmem:[#allocation19_spill] sm:$0xff] %v12037_v16  ;;  %v1404_v38 = vadd.f32 %v8546_v45, %v11839_v15  ;;  %v9651_v13 = vpop.f32.mrf.mxu1  ;;  %2284 = vmatprep.mubr.bf16.mxu0 %v12035_v50 }
 0x1c7   : > { %v8548_v26 = vpop.f32.mrf.mxu0 }
 0x1c8   : > { %v12044_v29 = vadd.f32 %v1556_v24, %v1404_v38  ;;  %v8549_v5 = vadd.f32 %v8548_v26, %v8547_v27  ;;  %v1564_v31 = vpop.f32.mrf.mxu1 }
 0x1c9   : > { %v8550_v39 = vpop.f32.mrf.mxu0 }
 0x1ca   : > { %v1409_v43 = vadd.f32 %v8549_v5, %v11842_v22  ;;  %v9652_v51 = vpop.f32.mrf.mxu1  ;;  %v10564_v5 = vld [vmem:[#allocation2 + $0x170] ss:$12 sps:$4 sm:$0xff]  }
 0x1cb   : > { %v8551_v16 = vpop.f32.mrf.mxu0 }
 0x1cc   : > { %v12051_v2 = vadd.f32 %v1561_v28, %v1409_v43  ;;  %v8552_v15 = vadd.f32 %v8551_v16, %v8550_v39  ;;  %v1569_v45 = vpop.f32.mrf.mxu1  ;;  %9766 = vmatmul.mubr.bf16.gmra.mxu1 %v10557_v4  ;;  %v12060_v39 = vld [vmem:[#allocation2 + $0x168] ss:$12 sps:$4 sm:$0xff]  }
 0x1cd   : > { %v8553_v13 = vpop.f32.mrf.mxu0  ;;  %2285 = vmatmul.mubr.bf16.gmra.mxu0 %v12046_v0  ;;  %9769 = vmatprep.mubr.msk.bf16.mxu1 %vm11119_vm0, %v13705_v42 }
 0x1ce   : > { %13708 = vst [vmem:[#allocation20_spill] sm:$0xff] %v12051_v2  ;;  %v1412_v24 = vadd.f32 %v8552_v15, %v11850_v20  ;;  %v9655_v27 = vpop.f32.mrf.mxu1  ;;  %2292 = vmatprep.mubr.bf16.mxu0 %v12049_v1 }
 0x1cf   : > { %v8554_v22 = vpop.f32.mrf.mxu0 }
 0x1d0   : > { %v12058_v38 = vadd.f32 %v1564_v31, %v1412_v24  ;;  %v8555_v26 = vadd.f32 %v8554_v22, %v8553_v13  ;;  %v1572_v28 = vpop.f32.mrf.mxu1 }
 0x1d1   : > { %v8556_v16 = vpop.f32.mrf.mxu0 }
 0x1d2   : > { %13709 = vst [vmem:[#allocation21_spill] sm:$0xff] %v12058_v38  ;;  %v1417_v4 = vadd.f32 %v8555_v26, %v11852_v19  ;;  %v9656_v43 = vpop.f32.mrf.mxu1  ;;  %v10565_v26 = vld [vmem:[#allocation2 + $0x50] ss:$12 sps:$4 sm:$0xff]   ;;  %v10571_v38 = vld [vmem:[%s11294_s11 + $0x370] sm:$0xff]  }
 0x1d3   : > { %v8557_v51 = vpop.f32.mrf.mxu0 }
 0x1d4   : > { %v12063_v2 = vadd.f32 %v1569_v45, %v1417_v4  ;;  %v8558_v20 = vadd.f32 %v8557_v51, %v8556_v16  ;;  %v1577_v15 = vpop.f32.mrf.mxu1  ;;  %9770 = vmatmul.mubr.bf16.gmra.mxu1 %v10564_v5  ;;  %v10568_v16 = vld [vmem:[%s11294_s11 + $0x3b8] sm:$0xff]  }
 0x1d5   : > { %v8559_v27 = vpop.f32.mrf.mxu0  ;;  %2293 = vmatmul.mubr.bf16.gmra.mxu0 %v12060_v39  ;;  %9789 = vmatprep.mubr.msk.bf16.mxu1 %vm11119_vm0, %v13705_v42  ;;  %v10567_v51 = vld [vmem:[%s11294_s11 + $0x338] sm:$0xff]  }
 0x1d6   : > { %13710 = vst [vmem:[#allocation22_spill] sm:$0xff] %v12063_v2  ;;  %v1420_v31 = vadd.f32 %v8558_v20, %v11859_v48  ;;  %v9659_v13 = vpop.f32.mrf.mxu1  ;;  %3008 = vmatprep.mubr.bf16.mxu0 %v11873_v6 }
 0x1d7   : > { %v8560_v19 = vpop.f32.mrf.mxu0 }
 0x1d8   : > { %v12070_v45 = vadd.f32 %v1572_v28, %v1420_v31  ;;  %v8561_v24 = vadd.f32 %v8560_v19, %v8559_v27  ;;  %v1580_v22 = vpop.f32.mrf.mxu1  ;;  %v10573_v27 = vld [vmem:[%s11294_s11 + $0x3b0] sm:$0xff]  }
 0x1d9   : > { %v8562_v5 = vpop.f32.mrf.mxu0 }
 0x1da   : > { %v1425_v4 = vadd.f32 %v8561_v24, %v11863_v9  ;;  %v9660_v43 = vpop.f32.mrf.mxu1  ;;  %v10572_v9 = vld [vmem:[%s11294_s11 + $0x330] sm:$0xff]  }
 0x1db   : > { %v8563_v2 = vpop.f32.mrf.mxu0 }
 0x1dc   : > { %v12076_v48 = vadd.f32 %v1577_v15, %v1425_v4  ;;  %v8564_v6 = vadd.f32 %v8563_v2, %v8562_v5  ;;  %v1585_v20 = vpop.f32.mrf.mxu1  ;;  %9790 = vmatmul.mubr.bf16.vlgmr.msra.gmra.mxu1 %v10565_v26  ;;  %v10575_v2 = vld [vmem:[%s11294_s11 + $0x368] sm:$0xff]   ;;  %v10569_v26 = vld [vmem:[#allocation2 + $0x68] ss:$12 sps:$4 sm:$0xff]  }
 0x1dd   : > { %v8565_v28 = vpop.f32.mrf.mxu0  ;;  %3009 = vmatmul.mubr.bf16.vlgmr.msra.gmra.mxu0 %v11890_v23  ;;  %9850 = vmatpush3.bf16.msra.mxu1 %v10568_v16  ;;  %v10577_v4 = vld [vmem:[%s11294_s11 + $0x328] sm:$0xff]  }
 0x1de   : > { %v1428_v31 = vadd.f32 %v8564_v6, %v11869_v12  ;;  %v9663_v13 = vpop.f32.mrf.mxu1  ;;  %8901 = vmatpush3.bf16.msra.mxu0 %v10567_v51  ;;  %9793 = vmatprep.mubr.msk.bf16.mxu1 %vm11119_vm0, %v13705_v42 }
 0x1df   : > { %v8566_v15 = vpop.f32.mrf.mxu0  ;;  %3016 = vmatprep.mubr.bf16.mxu0 %v11892_v47  ;;  %8902 = vmatprep.subr.bf16.mxu0 %v10571_v38  ;;  %v10578_v38 = vld [vmem:[%s11294_s11 + $0x3a8] sm:$0xff]   ;;  %v10583_v13 = vld [vmem:[%s11294_s11 + $0x3a0] sm:$0xff]  }
 0x1e0   : > { %v12086_v19 = vadd.f32 %v1580_v22, %v1428_v31  ;;  %v8567_v23 = vadd.f32 %v8566_v15, %v8565_v28  ;;  %v1588_v24 = vpop.f32.mrf.mxu1  ;;  %9851 = vmatprep.subr.bf16.mxu1 %v13705_v42  ;;  %v10580_v22 = vld [vmem:[%s11294_s11 + $0x360] sm:$0xff]  }
 0x1e1   : > { %v8568_v12 = vpop.f32.mrf.mxu0  ;;  %9852 = vmatpush3.bf16.msra.mxu1 %v10573_v27  ;;  %v10581_v31 = vld [vmem:[%s11294_s11 + $0x320] sm:$0xff]  }
 0x1e2   : > { %v1433_v5 = vadd.f32 %v8567_v23, %v11878_v21  ;;  %v9664_v16 = vpop.f32.mrf.mxu1  ;;  %8903 = vmatpush3.bf16.msra.mxu0 %v10572_v9  ;;  %9853 = vmatprep.subr.bf16.mxu1 %v13705_v42  ;;  %v10585_v9 = vld [vmem:[%s11294_s11 + $0x358] sm:$0xff]  }
 0x1e3   : > { %v8569_v47 = vpop.f32.mrf.mxu0  ;;  %8904 = vmatprep.subr.bf16.mxu0 %v10575_v2  ;;  %v10570_v23 = vld [vmem:[#allocation2 + $0x80] ss:$12 sps:$4 sm:$0xff]  }
 0x1e4   : > { %v12094_v43 = vadd.f32 %v1585_v20, %v1433_v5  ;;  %v8570_v51 = vadd.f32 %v8569_v47, %v8568_v12  ;;  %v1593_v6 = vpop.f32.mrf.mxu1  ;;  %9794 = vmatmul.mubr.bf16.gmra.mxu1 %v10569_v26  ;;  %v10586_v12 = vld [vmem:[%s11294_s11 + $0x318] sm:$0xff]  }
 0x1e5   : > { %v8571_v28 = vpop.f32.mrf.mxu0  ;;  %3017 = vmatmul.mubr.bf16.gmra.mxu0 %v11910_v37  ;;  %9797 = vmatprep.mubr.msk.bf16.mxu1 %vm11119_vm0, %v13705_v42  ;;  %v10588_v16 = vld [vmem:[%s11294_s11 + $0x398] sm:$0xff]  }
 0x1e6   : > { %v1436_v21 = vadd.f32 %v8570_v51, %v11887_v40  ;;  %v9667_v27 = vpop.f32.mrf.mxu1  ;;  %3024 = vmatprep.mubr.bf16.mxu0 %v11912_v11  ;;  %8905 = vmatpush3.bf16.msra.mxu0 %v10577_v4  ;;  %v10590_v4 = vld [vmem:[%s11294_s11 + $0x350] sm:$0xff]  }
 0x1e7   : > { %v8572_v20 = vpop.f32.mrf.mxu0  ;;  %9854 = vmatpush3.bf16.msra.mxu1 %v10578_v38  ;;  %8906 = vmatprep.subr.bf16.mxu0 %v10580_v22  ;;  %v10595_v27 = vld [vmem:[%s11294_s11 + $0x348] sm:$0xff]  }
 0x1e8   : > { %v12104_v15 = vadd.f32 %v1588_v24, %v1436_v21  ;;  %v8573_v37 = vadd.f32 %v8572_v20, %v8571_v28  ;;  %v1596_v2 = vpop.f32.mrf.mxu1  ;;  %9855 = vmatprep.subr.bf16.mxu1 %v13705_v42  ;;  %v10593_v21 = vld [vmem:[%s11294_s11 + $0x390] sm:$0xff]  }
 0x1e9   : > { %v8574_v40 = vpop.f32.mrf.mxu0 }
 0x1ea   : > { %v1441_v11 = vadd.f32 %v8573_v37, %v11897_v33  ;;  %v9668_v26 = vpop.f32.mrf.mxu1  ;;  %8907 = vmatpush3.bf16.msra.mxu0 %v10581_v31  ;;  %v10596_v37 = vld [vmem:[%s11294_s11 + $0x308] sm:$0xff]  }
 0x1eb   : > { %v8575_v5 = vpop.f32.mrf.mxu0  ;;  %9856 = vmatpush3.bf16.msra.mxu1 %v10583_v13  ;;  %8908 = vmatprep.subr.bf16.mxu0 %v10585_v9  ;;  %v10574_v13 = vld [vmem:[#allocation2 + $0x98] ss:$12 sps:$4 sm:$0xff]  }
 0x1ec   : > { %v12111_v47 = vadd.f32 %v1593_v6, %v1441_v11  ;;  %v8576_v24 = vadd.f32 %v8575_v5, %v8574_v40  ;;  %v1601_v38 = vpop.f32.mrf.mxu1  ;;  %9798 = vmatmul.mubr.bf16.gmra.mxu1 %v10570_v23  ;;  %9857 = vmatprep.subr.bf16.mxu1 %v13705_v42  ;;  %v10591_v6 = vld [vmem:[%s11294_s11 + $0x310] sm:$0xff]   ;;  %v10598_v40 = vld [vmem:[%s11294_s11 + $0x388] sm:$0xff]   ;;  %v10602_v11 = vld [vmem:[%s11294_s11 + $0x340] sm:$0xff]  }
 0x1ed   : > { %v8577_v22 = vpop.f32.mrf.mxu0  ;;  %3025 = vmatmul.mubr.bf16.gmra.mxu0 %v11930_v8  ;;  %9801 = vmatprep.mubr.msk.bf16.mxu1 %vm11119_vm0, %v13705_v42 }
 0x1ee   : > { %v1444_v33 = vadd.f32 %v8576_v24, %v11907_v54  ;;  %v9671_v51 = vpop.f32.mrf.mxu1  ;;  %3032 = vmatprep.mubr.bf16.mxu0 %v11935_v30  ;;  %8909 = vmatpush3.bf16.msra.mxu0 %v10586_v12 }
 0x1ef   : > { %v8578_v28 = vpop.f32.mrf.mxu0  ;;  %9858 = vmatpush3.bf16.msra.mxu1 %v10588_v16  ;;  %8910 = vmatprep.subr.bf16.mxu0 %v10590_v4  ;;  %v10603_v4 = vld [vmem:[%s11294_s11 + $0x300] sm:$0xff]  }
 0x1f0   : > { %v12122_v31 = vadd.f32 %v1596_v2, %v1444_v33  ;;  %v8579_v8 = vadd.f32 %v8578_v28, %v8577_v22  ;;  %v1604_v20 = vpop.f32.mrf.mxu1  ;;  %9859 = vmatprep.subr.bf16.mxu1 %v13705_v42  ;;  %v10611_v22 = vld [vmem:[%s11294_s11 + $0x438] sm:$0xff]  }
 0x1f1   : > { %v8580_v54 = vpop.f32.mrf.mxu0 }
 0x1f2   : > { %v1449_v30 = vadd.f32 %v8579_v8, %v11917_v25  ;;  %v9672_v9 = vpop.f32.mrf.mxu1  ;;  %8911 = vmatpush3.bf16.msra.mxu0 %v10591_v6 }
 0x1f3   : > { %v8581_v23 = vpop.f32.mrf.mxu0  ;;  %9860 = vmatpush3.bf16.msra.mxu1 %v10593_v21  ;;  %8912 = vmatprep.subr.bf16.mxu0 %v10595_v27 }
 0x1f4   : > { %v12129_v26 = vadd.f32 %v1601_v38, %v1449_v30  ;;  %v8582_v2 = vadd.f32 %v8581_v23, %v8580_v54  ;;  %v1609_v12 = vpop.f32.mrf.mxu1  ;;  %9802 = vmatmul.mubr.bf16.gmra.mxu1 %v10574_v13  ;;  %9861 = vmatprep.subr.bf16.mxu1 %v13705_v42  ;;  %v10604_v38 = vld [vmem:[%s11294_s11 + $0x380] sm:$0xff]  }
 0x1f5   : > { %v8583_v5 = vpop.f32.mrf.mxu0  ;;  %3033 = vmatmul.mubr.bf16.gmra.mxu0 %v11944_v49  ;;  %9805 = vmatprep.mubr.msk.bf16.mxu1 %vm11119_vm0, %v13705_v42  ;;  %v10576_v49 = vld [vmem:[#allocation2 + $0xb0] ss:$12 sps:$4 sm:$0xff]  }
 0x1f6   : > { %v1452_v25 = vadd.f32 %v8582_v2, %v11927_v41  ;;  %v9675_v16 = vpop.f32.mrf.mxu1  ;;  %3040 = vmatprep.mubr.bf16.mxu0 %v11948_v55  ;;  %8913 = vmatpush3.bf16.msra.mxu0 %v10596_v37 }
 0x1f7   : > { %v8584_v24 = vpop.f32.mrf.mxu0  ;;  %9862 = vmatpush3.bf16.msra.mxu1 %v10598_v40  ;;  %8914 = vmatprep.subr.bf16.mxu0 %v10602_v11  ;;  %v10579_v40 = vld [vmem:[#allocation2 + $0xc8] ss:$12 sps:$4 sm:$0xff]  }
 0x1f8   : > { %v12140_v33 = vadd.f32 %v1604_v20, %v1452_v25  ;;  %v8585_v51 = vadd.f32 %v8584_v24, %v8583_v5  ;;  %v1612_v6 = vpop.f32.mrf.mxu1  ;;  %9863 = vmatprep.subr.bf16.mxu1 %v13705_v42 }
 0x1f9   : > { %v8586_v28 = vpop.f32.mrf.mxu0 }
 0x1fa   : > { %v1457_v41 = vadd.f32 %v8585_v51, %v11933_v17  ;;  %v9676_v21 = vpop.f32.mrf.mxu1  ;;  %8915 = vmatpush3.bf16.msra.mxu0 %v10603_v4  ;;  %v10582_v51 = vld [vmem:[#allocation2 + $0xe0] ss:$12 sps:$4 sm:$0xff]  }
 0x1fb   : > { %v8587_v55 = vpop.f32.mrf.mxu0  ;;  %9864 = vmatpush3.bf16.msra.mxu1 %v10604_v38  ;;  %9029 = vmatprep.subr.bf16.mxu0 %v10611_v22 }
 0x1fc   : > { %v12144_v27 = vadd.f32 %v1609_v12, %v1457_v41  ;;  %v8588_v8 = vadd.f32 %v8587_v55, %v8586_v28  ;;  %v1617_v13 = vpop.f32.mrf.mxu1  ;;  %9806 = vmatmul.mubr.bf16.gmra.mxu1 %v10576_v49  ;;  %9925 = vmatprep.subr.bf16.mxu1 %v13705_v42 }
 0x1fd   : > { %v8589_v20 = vpop.f32.mrf.mxu0  ;;  %3041 = vmatmul.mubr.bf16.gmra.mxu0 %v11956_v62  ;;  %9809 = vmatprep.mubr.msk.bf16.mxu1 %vm11119_vm0, %v13705_v42 }
 0x1fe   : > { %v1460_v17 = vadd.f32 %v8588_v8, %v11941_v53  ;;  %v9679_v54 = vpop.f32.mrf.mxu1  ;;  %3048 = vmatprep.mubr.bf16.mxu0 %v11960_v34 }
 0x1ff   : > { %v8590_v30 = vpop.f32.mrf.mxu0  ;;  %v10584_v54 = vld [vmem:[#allocation2 + $0xf8] ss:$12 sps:$4 sm:$0xff]  }
 0x200   : > { %v12152_v9 = vadd.f32 %v1612_v6, %v1460_v17  ;;  %v8591_v37 = vadd.f32 %v8590_v30, %v8589_v20  ;;  %v1620_v23 = vpop.f32.mrf.mxu1 }
 0x201   : > { %v8592_v11 = vpop.f32.mrf.mxu0 }
 0x202   : > { %v1465_v2 = vadd.f32 %v8591_v37, %v11946_v36  ;;  %v9680_v12 = vpop.f32.mrf.mxu1 }
 0x203   : > { %v8593_v5 = vpop.f32.mrf.mxu0 }
 0x204   : > { %v12155_v62 = vadd.f32 %v1617_v13, %v1465_v2  ;;  %v8594_v25 = vadd.f32 %v8593_v5, %v8592_v11  ;;  %v1625_v16 = vpop.f32.mrf.mxu1  ;;  %9810 = vmatmul.mubr.bf16.gmra.mxu1 %v10579_v40 }
 0x205   : > { %v8595_v53 = vpop.f32.mrf.mxu0  ;;  %3049 = vmatmul.mubr.bf16.gmra.mxu0 %v11968_v57  ;;  %9813 = vmatprep.mubr.msk.bf16.mxu1 %vm11119_vm0, %v13705_v42 }
 0x206   : > { %v1468_v34 = vadd.f32 %v8594_v25, %v11953_v10  ;;  %v9683_v4 = vpop.f32.mrf.mxu1  ;;  %3056 = vmatprep.mubr.bf16.mxu0 %v11972_v44 }
 0x207   : > { %v8596_v24 = vpop.f32.mrf.mxu0 }
 0x208   : > { %v12162_v36 = vadd.f32 %v1620_v23, %v1468_v34  ;;  %v8597_v38 = vadd.f32 %v8596_v24, %v8595_v53  ;;  %v1628_v22 = vpop.f32.mrf.mxu1  ;;  %v10587_v53 = vld [vmem:[#allocation2 + $0x110] ss:$12 sps:$4 sm:$0xff]  }
 0x209   : > { %v8598_v6 = vpop.f32.mrf.mxu0 }
 0x20a   : > { %v1473_v49 = vadd.f32 %v8597_v38, %v11958_v14  ;;  %v9684_v28 = vpop.f32.mrf.mxu1 }
 0x20b   : > { %v8599_v41 = vpop.f32.mrf.mxu0 }
 0x20c   : > { %v12165_v57 = vadd.f32 %v1625_v16, %v1473_v49  ;;  %v8600_v21 = vadd.f32 %v8599_v41, %v8598_v6  ;;  %v1633_v55 = vpop.f32.mrf.mxu1  ;;  %9814 = vmatmul.mubr.bf16.gmra.mxu1 %v10582_v51 }
 0x20d   : > { %v8601_v10 = vpop.f32.mrf.mxu0  ;;  %3057 = vmatmul.mubr.bf16.gmra.mxu0 %v11980_v63  ;;  %9817 = vmatprep.mubr.msk.bf16.mxu1 %vm11119_vm0, %v13705_v42 }
 0x20e   : > { %v1476_v44 = vadd.f32 %v8600_v21, %v11965_v18  ;;  %v9687_v8 = vpop.f32.mrf.mxu1  ;;  %3064 = vmatprep.mubr.bf16.mxu0 %v11984_v59  ;;  %v10589_v21 = vld [vmem:[#allocation2 + $0x128] ss:$12 sps:$4 sm:$0xff]  }
 0x20f   : > { %v8602_v13 = vpop.f32.mrf.mxu0 }
 0x210   : > { %v12172_v14 = vadd.f32 %v1628_v22, %v1476_v44  ;;  %v8603_v20 = vadd.f32 %v8602_v13, %v8601_v10  ;;  %v1636_v17 = vpop.f32.mrf.mxu1  ;;  %v13711_v10 = vld [vmem:[#allocation16_spill] sm:$0xff] }
 0x211   : > { %v8604_v30 = vpop.f32.mrf.mxu0 }
 0x212   : > { %v1481_v37 = vadd.f32 %v8603_v20, %v11970_v35  ;;  %v9688_v23 = vpop.f32.mrf.mxu1 }
 0x213   : > { %v8605_v40 = vpop.f32.mrf.mxu0 }
 0x214   : > { %v12175_v63 = vadd.f32 %v1633_v55, %v1481_v37  ;;  %v8606_v11 = vadd.f32 %v8605_v40, %v8604_v30  ;;  %v1641_v2 = vpop.f32.mrf.mxu1  ;;  %9818 = vmatmul.mubr.bf16.gmra.mxu1 %v10584_v54  ;;  %v13712_v54 = vld [vmem:[#allocation15_spill] sm:$0xff] }
 0x215   : > { %v8607_v18 = vpop.f32.mrf.mxu0  ;;  %3065 = vmatmul.mubr.bf16.gmra.mxu0 %v11992_v46  ;;  %9821 = vmatprep.mubr.msk.bf16.mxu1 %vm11119_vm0, %v13705_v42 }
 0x216   : > { %v1484_v59 = vadd.f32 %v8606_v11, %v11977_v60  ;;  %v9691_v12 = vpop.f32.mrf.mxu1  ;;  %3072 = vmatprep.mubr.bf16.mxu0 %v11996_v61 }
 0x217   : > { %v8608_v5 = vpop.f32.mrf.mxu0 }
 0x218   : > { %v12182_v35 = vadd.f32 %v1636_v17, %v1484_v59  ;;  %v8609_v25 = vadd.f32 %v8608_v5, %v8607_v18  ;;  %v1644_v16 = vpop.f32.mrf.mxu1  ;;  %v10592_v18 = vld [vmem:[#allocation2 + $0x140] ss:$12 sps:$4 sm:$0xff]  }
 0x219   : > { %v8610_v34 = vpop.f32.mrf.mxu0 }
 0x21a   : > { %v1489_v4 = vadd.f32 %v8609_v25, %v11982_v7  ;;  %v9692_v24 = vpop.f32.mrf.mxu1 }
 0x21b   : > { %v8611_v38 = vpop.f32.mrf.mxu0 }
 0x21c   : > { %v12185_v46 = vadd.f32 %v1641_v2, %v1489_v4  ;;  %v8612_v22 = vadd.f32 %v8611_v38, %v8610_v34  ;;  %v1649_v51 = vpop.f32.mrf.mxu1  ;;  %9822 = vmatmul.mubr.bf16.gmra.mxu1 %v10587_v53 }
 0x21d   : > { %v8613_v60 = vpop.f32.mrf.mxu0  ;;  %3073 = vmatmul.mubr.bf16.gmra.mxu0 %v12004_v58  ;;  %9825 = vmatprep.mubr.msk.bf16.mxu1 %vm11119_vm0, %v13705_v42 }
 0x21e   : > { %v1492_v61 = vadd.f32 %v8612_v22, %v11989_v56  ;;  %v9695_v6 = vpop.f32.mrf.mxu1  ;;  %3080 = vmatprep.mubr.bf16.mxu0 %v12007_v3  ;;  %v13713_v3 = vld [vmem:[#allocation12_spill] sm:$0xff] }
 0x21f   : > { %v8614_v49 = vpop.f32.mrf.mxu0 }
 0x220   : > { %v12192_v7 = vadd.f32 %v1644_v16, %v1492_v61  ;;  %v8615_v28 = vadd.f32 %v8614_v49, %v8613_v60  ;;  %v1652_v41 = vpop.f32.mrf.mxu1  ;;  %v13714_v16 = vld [vmem:[#allocation13_spill] sm:$0xff] }
 0x221   : > { %v8616_v55 = vpop.f32.mrf.mxu0  ;;  %v10594_v49 = vld [vmem:[#allocation2 + $0x158] ss:$12 sps:$4 sm:$0xff]  }
 0x222   : > { %v1497_v44 = vadd.f32 %v8615_v28, %v13711_v10  ;;  %v9696_v8 = vpop.f32.mrf.mxu1  ;;  %v13716_v10 = vld [vmem:[#allocation17_spill] sm:$0xff] }
 0x223   : > { %v8617_v13 = vpop.f32.mrf.mxu0 }
 0x224   : > { %v12195_v58 = vadd.f32 %v1649_v51, %v1497_v44  ;;  %v8618_v20 = vadd.f32 %v8617_v13, %v8616_v55  ;;  %v2335_v17 = vpop.f32.mrf.mxu1  ;;  %9826 = vmatmul.mubr.bf16.gmra.mxu1 %v10589_v21  ;;  %v13715_v51 = vld [vmem:[#allocation14_spill] sm:$0xff] }
 0x225   : > { %v8658_v56 = vpop.f32.mrf.mxu0  ;;  %3081 = vmatmul.mubr.bf16.gmra.mxu0 %v13712_v54  ;;  %9829 = vmatprep.mubr.msk.bf16.mxu1 %vm11119_vm0, %v13705_v42  ;;  %v12223_v54 = vld [vmem:[#allocation2 + $0x18c] sm:$0xff] }
 0x226   : > { %v1500_v30 = vadd.f32 %v8618_v20, %v13713_v3  ;;  %v9715_v37 = vpop.f32.mrf.mxu1  ;;  %3088 = vmatprep.mubr.bf16.mxu0 %v12021_v52  ;;  %v13717_v3 = vld [vmem:[#allocation18_spill] sm:$0xff] }
 0x227   : > { %v8659_v23 = vpop.f32.mrf.mxu0 }
 0x228   : > { %v12202_v40 = vadd.f32 %v1652_v41, %v1500_v30  ;;  %v8660_v11 = vadd.f32 %v8659_v23, %v8658_v56  ;;  %v2338_v2 = vpop.f32.mrf.mxu1  ;;  %v12221_v56 = vld [vmem:[#allocation2 + $0x180] sm:$0xff] }
 0x229   : > { %v8661_v59 = vpop.f32.mrf.mxu0 }
 0x22a   : > { %v2336_v12 = vadd.f32 %v8660_v11, %v2335_v17  ;;  %v9716_v5 = vpop.f32.mrf.mxu1  ;;  %v10597_v11 = vld [vmem:[#allocation2 + $0x170] ss:$12 sps:$4 sm:$0xff]  }
 0x22b   : > { %v8662_v25 = vpop.f32.mrf.mxu0  ;;  %v13718_v5 = vld [vmem:[#allocation19_spill] sm:$0xff] }
 0x22c   : > { %v12205_v53 = vadd.f32 %v2336_v12, %v13714_v16  ;;  %v8663_v34 = vadd.f32 %v8662_v25, %v8661_v59  ;;  %v2343_v4 = vpop.f32.mrf.mxu1  ;;  %9830 = vmatmul.mubr.bf16.gmra.mxu1 %v10592_v18  ;;  %v8004_v59 = vcombine.high %v12221_v56, %v12223_v54 }
 0x22d   : > { %v8664_v24 = vpop.f32.mrf.mxu0  ;;  %3089 = vmatmul.mubr.bf16.gmra.mxu0 %v12032_v32  ;;  %9833 = vmatprep.mubr.msk.bf16.mxu1 %vm11119_vm0, %v13705_v42 }
 0x22e   : > { %v2339_v52 = vadd.f32 %v8663_v34, %v2338_v2  ;;  %v9719_v38 = vpop.f32.mrf.mxu1  ;;  %3096 = vmatprep.mubr.bf16.mxu0 %v12035_v50 }
 0x22f   : > { %v8665_v22 = vpop.f32.mrf.mxu0  ;;  %v12236_v38 = vld [vmem:[#allocation2 + $0x198] sm:$0xff] }
 0x230   : > { %v12212_v60 = vadd.f32 %v2339_v52, %v13715_v51  ;;  %v8666_v61 = vadd.f32 %v8665_v22, %v8664_v24  ;;  %v2346_v6 = vpop.f32.mrf.mxu1  ;;  %v12238_v22 = vld [vmem:[#allocation2 + $0x1a4] sm:$0xff] }
 0x231   : > { %v8667_v28 = vpop.f32.mrf.mxu0 }
 0x232   : > { %v2344_v41 = vadd.f32 %v8666_v61, %v2343_v4  ;;  %v9720_v21 = vpop.f32.mrf.mxu1 }
 0x233   : > { %v8668_v55 = vpop.f32.mrf.mxu0 }
 0x234   : > { %v12215_v32 = vadd.f32 %v2344_v41, %v13716_v10  ;;  %v8669_v44 = vadd.f32 %v8668_v55, %v8667_v28  ;;  %v2351_v8 = vpop.f32.mrf.mxu1  ;;  %9834 = vmatmul.mubr.bf16.gmra.mxu1 %v10594_v49  ;;  %v10601_v49 = vld [vmem:[#allocation2 + $0x188] ss:$12 sps:$4 sm:$0xff]   ;;  %v8007_v55 = vcombine.high %v12236_v38, %v12238_v22 }
 0x235   : > { %v8670_v13 = vpop.f32.mrf.mxu0  ;;  %3097 = vmatmul.mubr.bf16.gmra.mxu0 %v12046_v0  ;;  %9837 = vmatprep.mubr.msk.bf16.mxu1 %vm11119_vm0, %v13705_v42 }
 0x236   : > { %v2347_v50 = vadd.f32 %v8669_v44, %v2346_v6  ;;  %v9723_v20 = vpop.f32.mrf.mxu1  ;;  %3104 = vmatprep.mubr.bf16.mxu0 %v12049_v1  ;;  %v13719_v44 = vld [vmem:[#allocation20_spill] sm:$0xff] }
 0x237   : > { %v8671_v17 = vpop.f32.mrf.mxu0 }
 0x238   : > { %v12226_v30 = vadd.f32 %v2347_v50, %v13717_v3  ;;  %v8672_v37 = vadd.f32 %v8671_v17, %v8670_v13  ;;  %v2354_v23 = vpop.f32.mrf.mxu1 }
 0x239   : > { %v8673_v2 = vpop.f32.mrf.mxu0 }
 0x23a   : > { %v2352_v0 = vadd.f32 %v8672_v37, %v2351_v8  ;;  %v9724_v18 = vpop.f32.mrf.mxu1  ;;  %v3312_v37 = vld [vmem:[#allocation2 + $0x54] sm:$0xff] }
 0x23b   : > { %v8674_v12 = vpop.f32.mrf.mxu0 }
 0x23c   : > { %v12231_v1 = vadd.f32 %v2352_v0, %v13718_v5  ;;  %v8675_v25 = vadd.f32 %v8674_v12, %v8673_v2  ;;  %v2359_v16 = vpop.f32.mrf.mxu1  ;;  %9838 = vmatmul.mubr.bf16.gmra.mxu1 %v10597_v11  ;;  %v13720_v11 = vld [vmem:[#allocation21_spill] sm:$0xff]  ;;  %v8006_v5 = vcombine.low %v12236_v38, %v12238_v22 }
 0x23d   : > { %v8676_v34 = vpop.f32.mrf.mxu0  ;;  %3105 = vmatmul.mubr.bf16.gmra.mxu0 %v12060_v39  ;;  %9841 = vmatprep.mubr.msk.bf16.mxu1 %vm11119_vm0, %v13705_v42  ;;  %v8003_v39 = vcombine.low %v12221_v56, %v12223_v54 }
 0x23e   : > { %v2355_v4 = vadd.f32 %v8675_v25, %v2354_v23  ;;  %v9727_v24 = vpop.f32.mrf.mxu1  ;;  %3112 = vmatprep.mubr.bf16.mxu0 %v8004_v59  ;;  %v12252_v23 = vld [vmem:[#allocation2 + $0x60] sm:$0xff] }
 0x23f   : > { %v8677_v52 = vpop.f32.mrf.mxu0  ;;  %v10607_v59 = vld [vmem:[#allocation2 + $0x1a0] ss:$12 sps:$4 sm:$0xff]  }
 0x240   : > { %v12241_v51 = vadd.f32 %v2355_v4, %v12044_v29  ;;  %v8678_v61 = vadd.f32 %v8677_v52, %v8676_v34  ;;  %v2362_v6 = vpop.f32.mrf.mxu1  ;;  %v8034_v34 = vcombine.high %v3312_v37, %v12252_v23  ;;  %v13721_v24 = vld [vmem:[#allocation22_spill] sm:$0xff] }
 0x241   : > { %v8679_v28 = vpop.f32.mrf.mxu0 }
 0x242   : > { %v2360_v41 = vadd.f32 %v8678_v61, %v2359_v16  ;;  %v9728_v21 = vpop.f32.mrf.mxu1 }
 0x243   : > { %v8680_v10 = vpop.f32.mrf.mxu0 }
 0x244   : > { %v12248_v8 = vadd.f32 %v2360_v41, %v13719_v44  ;;  %v8681_v13 = vadd.f32 %v8680_v10, %v8679_v28  ;;  %v2367_v50 = vpop.f32.mrf.mxu1  ;;  %9842 = vmatmul.mubr.bf16.gmra.mxu1 %v10601_v49  ;;  %v10610_v44 = vld [vmem:[#allocation2 + $0x5c] ss:$12 sps:$4 sm:$0xff]  }
 0x245   : > { %v8682_v29 = vpop.f32.mrf.mxu0  ;;  %3113 = vmatmul.mubr.bf16.gmra.mxu0 %v8003_v39  ;;  %9845 = vmatprep.mubr.msk.bf16.mxu1 %vm11119_vm0, %v13705_v42 }
 0x246   : > { %v2363_v20 = vadd.f32 %v8681_v13, %v2362_v6  ;;  %v9731_v17 = vpop.f32.mrf.mxu1  ;;  %3120 = vmatprep.mubr.bf16.mxu0 %v8007_v55  ;;  %v12268_v13 = vld [vmem:[#allocation2 + $0x6c] sm:$0xff] }
 0x247   : > { %v8683_v3 = vpop.f32.mrf.mxu0  ;;  %v10613_v17 = vld [vmem:[%s11294_s11 + $0x478] sm:$0xff]  }
 0x248   : > { %v12255_v2 = vadd.f32 %v2363_v20, %v13720_v11  ;;  %v8684_v0 = vadd.f32 %v8683_v3, %v8682_v29  ;;  %v2370_v18 = vpop.f32.mrf.mxu1  ;;  %v8033_v20 = vcombine.low %v3312_v37, %v12252_v23  ;;  %v10622_v37 = vld [vmem:[%s11294_s11 + $0x470] sm:$0xff]  }
 0x249   : > { %v8685_v12 = vpop.f32.mrf.mxu0 }
 0x24a   : > { %v2368_v25 = vadd.f32 %v8684_v0, %v2367_v50  ;;  %v9732_v16 = vpop.f32.mrf.mxu1  ;;  %v12270_v50 = vld [vmem:[#allocation2 + $0x78] sm:$0xff]  ;;  %v10612_v0 = vld [vmem:[%s11294_s11 + $0x3f8] sm:$0xff]  }
 0x24b   : > { %v8686_v4 = vpop.f32.mrf.mxu0 }
 0x24c   : > { %v12261_v52 = vadd.f32 %v2368_v25, %v13721_v24  ;;  %v8687_v61 = vadd.f32 %v8686_v4, %v8685_v12  ;;  %v2375_v6 = vpop.f32.mrf.mxu1  ;;  %9846 = vmatmul.mubr.bf16.gmra.mxu1 %v10607_v59  ;;  %v10620_v59 = vld [vmem:[%s11294_s11 + $0x430] sm:$0xff]  }
 0x24d   : > { %v8688_v49 = vpop.f32.mrf.mxu0  ;;  %3121 = vmatmul.mubr.bf16.gmra.mxu0 %v8006_v5  ;;  %9865 = vmatprep.mubr.msk.bf16.mxu1 %vm11119_vm0, %v13705_v42  ;;  %v10621_v24 = vld [vmem:[%s11294_s11 + $0x3f0] sm:$0xff]  }
 0x24e   : > { %v2371_v28 = vadd.f32 %v8687_v61, %v2370_v18  ;;  %v9735_v39 = vpop.f32.mrf.mxu1  ;;  %3836 = vmatprep.mubr.bf16.mxu0 %v8034_v34 }
 0x24f   : > { %v8689_v41 = vpop.f32.mrf.mxu0 }
 0x250   : > { %v12266_v21 = vadd.f32 %v2371_v28, %v12070_v45  ;;  %v8690_v55 = vadd.f32 %v8689_v41, %v8688_v49  ;;  %v2378_v10 = vpop.f32.mrf.mxu1  ;;  %v8037_v45 = vcombine.high %v12268_v13, %v12270_v50  ;;  %v10626_v49 = vld [vmem:[%s11294_s11 + $0x428] sm:$0xff]  }
 0x251   : > { %v8691_v29 = vpop.f32.mrf.mxu0 }
 0x252   : > { %v2376_v3 = vadd.f32 %v8690_v55, %v2375_v6  ;;  %v9736_v11 = vpop.f32.mrf.mxu1  ;;  %v12285_v6 = vld [vmem:[#allocation2 + $0x84] sm:$0xff]  ;;  %v10616_v55 = vld [vmem:[#allocation2 + $0x74] ss:$12 sps:$4 sm:$0xff]  }
 0x253   : > { %v8692_v18 = vpop.f32.mrf.mxu0  ;;  %v10631_v11 = vld [vmem:[%s11294_s11 + $0x468] sm:$0xff]  }
 0x254   : > { %v12279_v12 = vadd.f32 %v2376_v3, %v12076_v48  ;;  %v8693_v5 = vadd.f32 %v8692_v18, %v8691_v29  ;;  %v2383_v25 = vpop.f32.mrf.mxu1  ;;  %9866 = vmatmul.mubr.bf16.vlgmr.msra.gmra.mxu1 %v10610_v44  ;;  %v12287_v48 = vld [vmem:[#allocation2 + $0x90] sm:$0xff]  ;;  %v8036_v44 = vcombine.low %v12268_v13, %v12270_v50 }
 0x255   : > { %v8694_v16 = vpop.f32.mrf.mxu0  ;;  %3837 = vmatmul.mubr.bf16.vlgmr.msra.gmra.mxu0 %v8033_v20  ;;  %9926 = vmatpush3.bf16.msra.mxu1 %v10613_v17  ;;  %v8040_v17 = vcombine.high %v12285_v6, %v12287_v48 }
 0x256   : > { %v2379_v34 = vadd.f32 %v8693_v5, %v2378_v10  ;;  %v9739_v4 = vpop.f32.mrf.mxu1  ;;  %9030 = vmatpush3.bf16.msra.mxu0 %v10612_v0  ;;  %9869 = vmatprep.mubr.msk.bf16.mxu1 %vm11119_vm0, %v13705_v42  ;;  %v10635_v0 = vld [vmem:[%s11294_s11 + $0x420] sm:$0xff]  }
 0x257   : > { %v8695_v61 = vpop.f32.mrf.mxu0  ;;  %3844 = vmatprep.mubr.bf16.mxu0 %v8037_v45  ;;  %9031 = vmatprep.subr.bf16.mxu0 %v10620_v59 }
 0x258   : > { %v12291_v28 = vadd.f32 %v2379_v34, %v12086_v19  ;;  %v8696_v39 = vadd.f32 %v8695_v61, %v8694_v16  ;;  %v2386_v41 = vpop.f32.mrf.mxu1  ;;  %9927 = vmatprep.subr.bf16.mxu1 %v13705_v42  ;;  %v10630_v19 = vld [vmem:[%s11294_s11 + $0x3e8] sm:$0xff]   ;;  %v10636_v34 = vld [vmem:[%s11294_s11 + $0x3e0] sm:$0xff]   ;;  %v10644_v61 = vld [vmem:[%s11294_s11 + $0x418] sm:$0xff]  }
 0x259   : > { %v8697_v10 = vpop.f32.mrf.mxu0  ;;  %9928 = vmatpush3.bf16.msra.mxu1 %v10622_v37  ;;  %v12307_v37 = vld [vmem:[#allocation2 + $0x9c] sm:$0xff] }
 0x25a   : > { %v2384_v29 = vadd.f32 %v8696_v39, %v2383_v25  ;;  %v9740_v20 = vpop.f32.mrf.mxu1  ;;  %9032 = vmatpush3.bf16.msra.mxu0 %v10621_v24  ;;  %9929 = vmatprep.subr.bf16.mxu1 %v13705_v42  ;;  %v10640_v24 = vld [vmem:[%s11294_s11 + $0x460] sm:$0xff]  }
 0x25b   : > { %v8698_v3 = vpop.f32.mrf.mxu0  ;;  %9033 = vmatprep.subr.bf16.mxu0 %v10626_v49 }
 0x25c   : > { %v12303_v18 = vadd.f32 %v2384_v29, %v12094_v43  ;;  %v8699_v45 = vadd.f32 %v8698_v3, %v8697_v10  ;;  %v2391_v59 = vpop.f32.mrf.mxu1  ;;  %9870 = vmatmul.mubr.bf16.gmra.mxu1 %v10616_v55  ;;  %v12310_v43 = vld [vmem:[#allocation2 + $0xa8] sm:$0xff] }
 0x25d   : > { %v8700_v5 = vpop.f32.mrf.mxu0  ;;  %3845 = vmatmul.mubr.bf16.gmra.mxu0 %v8036_v44  ;;  %9873 = vmatprep.mubr.msk.bf16.mxu1 %vm11119_vm0, %v13705_v42  ;;  %v10619_v55 = vld [vmem:[#allocation2 + $0x8c] ss:$12 sps:$4 sm:$0xff]   ;;  %v8039_v44 = vcombine.low %v12285_v6, %v12287_v48 }
 0x25e   : > { %v2387_v25 = vadd.f32 %v8699_v45, %v2386_v41  ;;  %v9743_v16 = vpop.f32.mrf.mxu1  ;;  %3852 = vmatprep.mubr.bf16.mxu0 %v8040_v17  ;;  %9034 = vmatpush3.bf16.msra.mxu0 %v10630_v19  ;;  %v8043_v17 = vcombine.high %v12307_v37, %v12310_v43  ;;  %v10645_v19 = vld [vmem:[%s11294_s11 + $0x3d8] sm:$0xff]  }
 0x25f   : > { %v8701_v4 = vpop.f32.mrf.mxu0  ;;  %9930 = vmatpush3.bf16.msra.mxu1 %v10631_v11  ;;  %9035 = vmatprep.subr.bf16.mxu0 %v10635_v0  ;;  %v10653_v11 = vld [vmem:[%s11294_s11 + $0x410] sm:$0xff]  }
 0x260   : > { %v12315_v49 = vadd.f32 %v2387_v25, %v12104_v15  ;;  %v8702_v39 = vadd.f32 %v8701_v4, %v8700_v5  ;;  %v2394_v41 = vpop.f32.mrf.mxu1  ;;  %9931 = vmatprep.subr.bf16.mxu1 %v13705_v42  ;;  %v10649_v15 = vld [vmem:[%s11294_s11 + $0x458] sm:$0xff]  }
 0x261   : > { %v8703_v10 = vpop.f32.mrf.mxu0 }
 0x262   : > { %v2392_v29 = vadd.f32 %v8702_v39, %v2391_v59  ;;  %v9744_v20 = vpop.f32.mrf.mxu1  ;;  %9036 = vmatpush3.bf16.msra.mxu0 %v10636_v34  ;;  %v12331_v34 = vld [vmem:[#allocation2 + $0xb4] sm:$0xff] }
 0x263   : > { %v8704_v3 = vpop.f32.mrf.mxu0  ;;  %9932 = vmatpush3.bf16.msra.mxu1 %v10640_v24  ;;  %9037 = vmatprep.subr.bf16.mxu0 %v10644_v61  ;;  %v12334_v24 = vld [vmem:[#allocation2 + $0xc0] sm:$0xff]  ;;  %v10662_v39 = vld [vmem:[%s11294_s11 + $0x408] sm:$0xff]   ;;  %v8042_v20 = vcombine.low %v12307_v37, %v12310_v43 }
 0x264   : > { %v12326_v0 = vadd.f32 %v2392_v29, %v12111_v47  ;;  %v8705_v45 = vadd.f32 %v8704_v3, %v8703_v10  ;;  %v2399_v5 = vpop.f32.mrf.mxu1  ;;  %9874 = vmatmul.mubr.bf16.gmra.mxu1 %v10619_v55  ;;  %9933 = vmatprep.subr.bf16.mxu1 %v13705_v42  ;;  %v10654_v47 = vld [vmem:[%s11294_s11 + $0x3d0] sm:$0xff]   ;;  %v8046_v3 = vcombine.high %v12331_v34, %v12334_v24 }
 0x265   : > { %v8706_v59 = vpop.f32.mrf.mxu0  ;;  %3853 = vmatmul.mubr.bf16.gmra.mxu0 %v8039_v44  ;;  %9877 = vmatprep.mubr.msk.bf16.mxu1 %vm11119_vm0, %v13705_v42  ;;  %v10658_v61 = vld [vmem:[%s11294_s11 + $0x450] sm:$0xff]  }
 0x266   : > { %v2395_v25 = vadd.f32 %v8705_v45, %v2394_v41  ;;  %v9747_v16 = vpop.f32.mrf.mxu1  ;;  %3860 = vmatprep.mubr.bf16.mxu0 %v8043_v17  ;;  %9038 = vmatpush3.bf16.msra.mxu0 %v10645_v19  ;;  %v10625_v44 = vld [vmem:[#allocation2 + $0xa4] ss:$12 sps:$4 sm:$0xff]  }
 0x267   : > { %v8707_v4 = vpop.f32.mrf.mxu0  ;;  %9934 = vmatpush3.bf16.msra.mxu1 %v10649_v15  ;;  %9039 = vmatprep.subr.bf16.mxu0 %v10653_v11  ;;  %v10663_v15 = vld [vmem:[%s11294_s11 + $0x3c8] sm:$0xff]   ;;  %v10671_v45 = vld [vmem:[%s11294_s11 + $0x400] sm:$0xff]  }
 0x268   : > { %v12339_v55 = vadd.f32 %v2395_v25, %v12122_v31  ;;  %v8708_v41 = vadd.f32 %v8707_v4, %v8706_v59  ;;  %v2402_v10 = vpop.f32.mrf.mxu1  ;;  %9935 = vmatprep.subr.bf16.mxu1 %v13705_v42  ;;  %v10667_v31 = vld [vmem:[%s11294_s11 + $0x448] sm:$0xff]  }
 0x269   : > { %v8709_v29 = vpop.f32.mrf.mxu0 }
 0x26a   : > { %v2400_v17 = vadd.f32 %v8708_v41, %v2399_v5  ;;  %v9748_v19 = vpop.f32.mrf.mxu1  ;;  %9040 = vmatpush3.bf16.msra.mxu0 %v10654_v47  ;;  %v12358_v41 = vld [vmem:[#allocation2 + $0xd8] sm:$0xff] }
 0x26b   : > { %v8710_v11 = vpop.f32.mrf.mxu0  ;;  %9936 = vmatpush3.bf16.msra.mxu1 %v10658_v61  ;;  %9041 = vmatprep.subr.bf16.mxu0 %v10662_v39  ;;  %v12355_v61 = vld [vmem:[#allocation2 + $0xcc] sm:$0xff] }
 0x26c   : > { %v12350_v59 = vadd.f32 %v2400_v17, %v12129_v26  ;;  %v8711_v25 = vadd.f32 %v8710_v11, %v8709_v29  ;;  %v2407_v16 = vpop.f32.mrf.mxu1  ;;  %9878 = vmatmul.mubr.bf16.gmra.mxu1 %v10625_v44  ;;  %9937 = vmatprep.subr.bf16.mxu1 %v13705_v42  ;;  %v10672_v26 = vld [vmem:[%s11294_s11 + $0x3c0] sm:$0xff]   ;;  %v10680_v29 = vld [vmem:[%s11294_s11 + $0x4f8] sm:$0xff]  }
 0x26d   : > { %v8712_v5 = vpop.f32.mrf.mxu0  ;;  %3861 = vmatmul.mubr.bf16.gmra.mxu0 %v8042_v20  ;;  %9881 = vmatprep.mubr.msk.bf16.mxu1 %vm11119_vm0, %v13705_v42  ;;  %v10673_v44 = vld [vmem:[%s11294_s11 + $0x440] sm:$0xff]   ;;  %v10629_v11 = vld [vmem:[#allocation2 + $0xbc] ss:$12 sps:$4 sm:$0xff]  }
 0x26e   : > { %v2403_v47 = vadd.f32 %v8711_v25, %v2402_v10  ;;  %v9751_v4 = vpop.f32.mrf.mxu1  ;;  %3868 = vmatprep.mubr.bf16.mxu0 %v8046_v3  ;;  %9042 = vmatpush3.bf16.msra.mxu0 %v10663_v15  ;;  %v8045_v3 = vcombine.low %v12331_v34, %v12334_v24 }
 0x26f   : > { %v8713_v39 = vpop.f32.mrf.mxu0  ;;  %9938 = vmatpush3.bf16.msra.mxu1 %v10667_v31  ;;  %9043 = vmatprep.subr.bf16.mxu0 %v10671_v45  ;;  %v8049_v31 = vcombine.high %v12355_v61, %v12358_v41 }
 0x270   : > { %v12363_v17 = vadd.f32 %v2403_v47, %v12140_v33  ;;  %v8714_v20 = vadd.f32 %v8713_v39, %v8712_v5  ;;  %v2410_v19 = vpop.f32.mrf.mxu1  ;;  %9939 = vmatprep.subr.bf16.mxu1 %v13705_v42 }
 0x271   : > { %v8715_v10 = vpop.f32.mrf.mxu0 }
 0x272   : > { %v2408_v15 = vadd.f32 %v8714_v20, %v2407_v16  ;;  %v9752_v25 = vpop.f32.mrf.mxu1  ;;  %9044 = vmatpush3.bf16.msra.mxu0 %v10672_v26  ;;  %v12376_v20 = vld [vmem:[#allocation2 + $0xe4] sm:$0xff] }
 0x273   : > { %v8716_v45 = vpop.f32.mrf.mxu0  ;;  %9940 = vmatpush3.bf16.msra.mxu1 %v10673_v44  ;;  %9158 = vmatprep.subr.bf16.mxu0 %v10680_v29  ;;  %v12378_v44 = vld [vmem:[#allocation2 + $0xf0] sm:$0xff] }
 0x274   : > { %v12371_v33 = vadd.f32 %v2408_v15, %v12144_v27  ;;  %v8717_v5 = vadd.f32 %v8716_v45, %v8715_v10  ;;  %v2415_v47 = vpop.f32.mrf.mxu1  ;;  %9882 = vmatmul.mubr.bf16.gmra.mxu1 %v10629_v11  ;;  %10001 = vmatprep.subr.bf16.mxu1 %v13705_v42  ;;  %v10634_v10 = vld [vmem:[#allocation2 + $0xd4] ss:$12 sps:$4 sm:$0xff]  }
 0x275   : > { %v8718_v4 = vpop.f32.mrf.mxu0  ;;  %3869 = vmatmul.mubr.bf16.gmra.mxu0 %v8045_v3  ;;  %9885 = vmatprep.mubr.msk.bf16.mxu1 %vm11119_vm0, %v13705_v42  ;;  %v8048_v3 = vcombine.low %v12355_v61, %v12358_v41 }
 0x276   : > { %13722 = vst [vmem:[#allocation16_spill] sm:$0xff] %v12371_v33  ;;  %v2411_v16 = vadd.f32 %v8717_v5, %v2410_v19  ;;  %v9755_v39 = vpop.f32.mrf.mxu1  ;;  %3876 = vmatprep.mubr.bf16.mxu0 %v8049_v31  ;;  %v8052_v19 = vcombine.high %v12376_v20, %v12378_v44 }
 0x277   : > { %v8719_v26 = vpop.f32.mrf.mxu0 }
 0x278   : > { %v12381_v27 = vadd.f32 %v2411_v16, %v12152_v9  ;;  %v8720_v29 = vadd.f32 %v8719_v26, %v8718_v4  ;;  %v2418_v11 = vpop.f32.mrf.mxu1  ;;  %v12392_v26 = vld [vmem:[#allocation2 + $0xfc] sm:$0xff] }
 0x279   : > { %v8721_v15 = vpop.f32.mrf.mxu0 }
 0x27a   : > { %13723 = vst [vmem:[#allocation15_spill] sm:$0xff] %v12381_v27  ;;  %v2416_v25 = vadd.f32 %v8720_v29, %v2415_v47  ;;  %v9756_v45 = vpop.f32.mrf.mxu1  ;;  %v12394_v29 = vld [vmem:[#allocation2 + $0x108] sm:$0xff] }
 0x27b   : > { %v8722_v31 = vpop.f32.mrf.mxu0 }
 0x27c   : > { %v12388_v5 = vadd.f32 %v2416_v25, %v12155_v62  ;;  %v8723_v39 = vadd.f32 %v8722_v31, %v8721_v15  ;;  %v2423_v33 = vpop.f32.mrf.mxu1  ;;  %9886 = vmatmul.mubr.bf16.gmra.mxu1 %v10634_v10  ;;  %v10639_v25 = vld [vmem:[#allocation2 + $0xec] ss:$12 sps:$4 sm:$0xff]  }
 0x27d   : > { %v8724_v9 = vpop.f32.mrf.mxu0  ;;  %3877 = vmatmul.mubr.bf16.gmra.mxu0 %v8048_v3  ;;  %9889 = vmatprep.mubr.msk.bf16.mxu1 %vm11119_vm0, %v13705_v42  ;;  %v8051_v3 = vcombine.low %v12376_v20, %v12378_v44 }
 0x27e   : > { %13724 = vst [vmem:[#allocation12_spill] sm:$0xff] %v12388_v5  ;;  %v2419_v4 = vadd.f32 %v8723_v39, %v2418_v11  ;;  %v9759_v16 = vpop.f32.mrf.mxu1  ;;  %3884 = vmatprep.mubr.bf16.mxu0 %v8052_v19  ;;  %v8055_v11 = vcombine.high %v12392_v26, %v12394_v29 }
 0x27f   : > { %v8725_v47 = vpop.f32.mrf.mxu0 }
 0x280   : > { %v12397_v45 = vadd.f32 %v2419_v4, %v12162_v36  ;;  %v8726_v62 = vadd.f32 %v8725_v47, %v8724_v9  ;;  %v2426_v15 = vpop.f32.mrf.mxu1  ;;  %v12410_v47 = vld [vmem:[#allocation2 + $0x120] sm:$0xff] }
 0x281   : > { %v8727_v10 = vpop.f32.mrf.mxu0 }
 0x282   : > { %13725 = vst [vmem:[#allocation13_spill] sm:$0xff] %v12397_v45  ;;  %v2424_v31 = vadd.f32 %v8726_v62, %v2423_v33  ;;  %v9760_v5 = vpop.f32.mrf.mxu1 }
 0x283   : > { %v8728_v19 = vpop.f32.mrf.mxu0  ;;  %v12408_v5 = vld [vmem:[#allocation2 + $0x114] sm:$0xff] }
 0x284   : > { %v12404_v39 = vadd.f32 %v2424_v31, %v12165_v57  ;;  %v8729_v16 = vadd.f32 %v8728_v19, %v8727_v10  ;;  %v2431_v27 = vpop.f32.mrf.mxu1  ;;  %9890 = vmatmul.mubr.bf16.gmra.mxu1 %v10639_v25  ;;  %v10643_v31 = vld [vmem:[#allocation2 + $0x104] ss:$12 sps:$4 sm:$0xff]  }
 0x285   : > { %v8730_v36 = vpop.f32.mrf.mxu0  ;;  %3885 = vmatmul.mubr.bf16.gmra.mxu0 %v8051_v3  ;;  %9893 = vmatprep.mubr.msk.bf16.mxu1 %vm11119_vm0, %v13705_v42  ;;  %v8054_v3 = vcombine.low %v12392_v26, %v12394_v29 }
 0x286   : > { %13726 = vst [vmem:[#allocation14_spill] sm:$0xff] %v12404_v39  ;;  %v2427_v9 = vadd.f32 %v8729_v16, %v2426_v15  ;;  %v9763_v4 = vpop.f32.mrf.mxu1  ;;  %3892 = vmatprep.mubr.bf16.mxu0 %v8055_v11  ;;  %v8058_v15 = vcombine.high %v12408_v5, %v12410_v47 }
 0x287   : > { %v8731_v33 = vpop.f32.mrf.mxu0 }
 0x288   : > { %v12413_v62 = vadd.f32 %v2427_v9, %v12172_v14  ;;  %v8732_v57 = vadd.f32 %v8731_v33, %v8730_v36  ;;  %v2434_v10 = vpop.f32.mrf.mxu1  ;;  %v12426_v33 = vld [vmem:[#allocation2 + $0x138] sm:$0xff] }
 0x289   : > { %v8733_v25 = vpop.f32.mrf.mxu0 }
 0x28a   : > { %13727 = vst [vmem:[#allocation17_spill] sm:$0xff] %v12413_v62  ;;  %v2432_v19 = vadd.f32 %v8732_v57, %v2431_v27  ;;  %v9764_v39 = vpop.f32.mrf.mxu1 }
 0x28b   : > { %v8734_v11 = vpop.f32.mrf.mxu0  ;;  %v12424_v39 = vld [vmem:[#allocation2 + $0x12c] sm:$0xff] }
 0x28c   : > { %v12420_v16 = vadd.f32 %v2432_v19, %v12175_v63  ;;  %v8735_v4 = vadd.f32 %v8734_v11, %v8733_v25  ;;  %v2439_v45 = vpop.f32.mrf.mxu1  ;;  %9894 = vmatmul.mubr.bf16.gmra.mxu1 %v10643_v31  ;;  %v10648_v19 = vld [vmem:[#allocation2 + $0x11c] ss:$12 sps:$4 sm:$0xff]  }
 0x28d   : > { %v8736_v14 = vpop.f32.mrf.mxu0  ;;  %3893 = vmatmul.mubr.bf16.gmra.mxu0 %v8054_v3  ;;  %9897 = vmatprep.mubr.msk.bf16.mxu1 %vm11119_vm0, %v13705_v42  ;;  %v8057_v3 = vcombine.low %v12408_v5, %v12410_v47 }
 0x28e   : > { %13728 = vst [vmem:[#allocation18_spill] sm:$0xff] %v12420_v16  ;;  %v2435_v36 = vadd.f32 %v8735_v4, %v2434_v10  ;;  %v9767_v9 = vpop.f32.mrf.mxu1  ;;  %3900 = vmatprep.mubr.bf16.mxu0 %v8058_v15  ;;  %v8061_v10 = vcombine.high %v12424_v39, %v12426_v33 }
 0x28f   : > { %v8737_v27 = vpop.f32.mrf.mxu0 }
 0x290   : > { %v12429_v57 = vadd.f32 %v2435_v36, %v12182_v35  ;;  %v8738_v63 = vadd.f32 %v8737_v27, %v8736_v14  ;;  %v2442_v25 = vpop.f32.mrf.mxu1  ;;  %v12442_v27 = vld [vmem:[#allocation2 + $0x150] sm:$0xff] }
 0x291   : > { %v8739_v31 = vpop.f32.mrf.mxu0 }
 0x292   : > { %13729 = vst [vmem:[#allocation19_spill] sm:$0xff] %v12429_v57  ;;  %v2440_v11 = vadd.f32 %v8738_v63, %v2439_v45  ;;  %v9768_v16 = vpop.f32.mrf.mxu1 }
 0x293   : > { %v8740_v15 = vpop.f32.mrf.mxu0  ;;  %v12440_v16 = vld [vmem:[#allocation2 + $0x144] sm:$0xff] }
 0x294   : > { %v12436_v4 = vadd.f32 %v2440_v11, %v12185_v46  ;;  %v8741_v9 = vadd.f32 %v8740_v15, %v8739_v31  ;;  %v2447_v62 = vpop.f32.mrf.mxu1  ;;  %9898 = vmatmul.mubr.bf16.gmra.mxu1 %v10648_v19  ;;  %v10652_v11 = vld [vmem:[#allocation2 + $0x134] ss:$12 sps:$4 sm:$0xff]  }
 0x295   : > { %v8742_v35 = vpop.f32.mrf.mxu0  ;;  %3901 = vmatmul.mubr.bf16.gmra.mxu0 %v8057_v3  ;;  %9901 = vmatprep.mubr.msk.bf16.mxu1 %vm11119_vm0, %v13705_v42  ;;  %v8060_v3 = vcombine.low %v12424_v39, %v12426_v33 }
 0x296   : > { %13730 = vst [vmem:[#allocation20_spill] sm:$0xff] %v12436_v4  ;;  %v2443_v14 = vadd.f32 %v8741_v9, %v2442_v25  ;;  %v9771_v36 = vpop.f32.mrf.mxu1  ;;  %3908 = vmatprep.mubr.bf16.mxu0 %v8061_v10  ;;  %v8064_v25 = vcombine.high %v12440_v16, %v12442_v27 }
 0x297   : > { %v8743_v45 = vpop.f32.mrf.mxu0 }
 0x298   : > { %v12445_v63 = vadd.f32 %v2443_v14, %v12192_v7  ;;  %v8744_v46 = vadd.f32 %v8743_v45, %v8742_v35  ;;  %v2450_v31 = vpop.f32.mrf.mxu1  ;;  %v12458_v45 = vld [vmem:[#allocation2 + $0x168] sm:$0xff] }
 0x299   : > { %v8745_v19 = vpop.f32.mrf.mxu0 }
 0x29a   : > { %13731 = vst [vmem:[#allocation21_spill] sm:$0xff] %v12445_v63  ;;  %v2448_v15 = vadd.f32 %v8744_v46, %v2447_v62  ;;  %v9772_v4 = vpop.f32.mrf.mxu1 }
 0x29b   : > { %v8746_v10 = vpop.f32.mrf.mxu0  ;;  %v12456_v4 = vld [vmem:[#allocation2 + $0x15c] sm:$0xff] }
 0x29c   : > { %v12452_v9 = vadd.f32 %v2448_v15, %v12195_v58  ;;  %v8747_v36 = vadd.f32 %v8746_v10, %v8745_v19  ;;  %v3163_v57 = vpop.f32.mrf.mxu1  ;;  %9902 = vmatmul.mubr.bf16.gmra.mxu1 %v10652_v11  ;;  %v10657_v15 = vld [vmem:[#allocation2 + $0x14c] ss:$12 sps:$4 sm:$0xff]  }
 0x29d   : > { %v8787_v7 = vpop.f32.mrf.mxu0  ;;  %3909 = vmatmul.mubr.bf16.gmra.mxu0 %v8060_v3  ;;  %9905 = vmatprep.mubr.msk.bf16.mxu1 %vm11119_vm0, %v13705_v42  ;;  %v8063_v3 = vcombine.low %v12440_v16, %v12442_v27 }
 0x29e   : > { %13732 = vst [vmem:[#allocation22_spill] sm:$0xff] %v12452_v9  ;;  %v2451_v35 = vadd.f32 %v8747_v36, %v2450_v31  ;;  %v9791_v14 = vpop.f32.mrf.mxu1  ;;  %3916 = vmatprep.mubr.bf16.mxu0 %v8064_v25  ;;  %v8067_v31 = vcombine.high %v12456_v4, %v12458_v45 }
 0x29f   : > { %v8788_v62 = vpop.f32.mrf.mxu0 }
 0x2a0   : > { %v12461_v46 = vadd.f32 %v2451_v35, %v12202_v40  ;;  %v8789_v58 = vadd.f32 %v8788_v62, %v8787_v7  ;;  %v3166_v19 = vpop.f32.mrf.mxu1 }
 0x2a1   : > { %v8790_v11 = vpop.f32.mrf.mxu0 }
 0x2a2   : > { %v3164_v10 = vadd.f32 %v8789_v58, %v3163_v57  ;;  %v9792_v9 = vpop.f32.mrf.mxu1 }
 0x2a3   : > { %v8791_v25 = vpop.f32.mrf.mxu0  ;;  %v12472_v9 = vld [vmem:[#allocation2 + $0x174] sm:$0xff] }
 0x2a4   : > { %v12468_v36 = vadd.f32 %v3164_v10, %v12205_v53  ;;  %v8792_v14 = vadd.f32 %v8791_v25, %v8790_v11  ;;  %v3171_v63 = vpop.f32.mrf.mxu1  ;;  %9906 = vmatmul.mubr.bf16.gmra.mxu1 %v10657_v15  ;;  %v10661_v10 = vld [vmem:[#allocation2 + $0x164] ss:$12 sps:$4 sm:$0xff]   ;;  %v8066_v15 = vcombine.low %v12456_v4, %v12458_v45 }
 0x2a5   : > { %v8793_v40 = vpop.f32.mrf.mxu0  ;;  %3917 = vmatmul.mubr.bf16.gmra.mxu0 %v8063_v3  ;;  %9909 = vmatprep.mubr.msk.bf16.mxu1 %vm11119_vm0, %v13705_v42 }
 0x2a6   : > { %13733 = vst [vmem:[#allocation23_spill] sm:$0xff] %v12468_v36  ;;  %v3167_v7 = vadd.f32 %v8792_v14, %v3166_v19  ;;  %v9795_v35 = vpop.f32.mrf.mxu1  ;;  %3924 = vmatprep.mubr.bf16.mxu0 %v8067_v31  ;;  %v8070_v19 = vcombine.high %v12472_v9, %v12221_v56 }
 0x2a7   : > { %v8794_v57 = vpop.f32.mrf.mxu0 }
 0x2a8   : > { %v12475_v62 = vadd.f32 %v3167_v7, %v12212_v60  ;;  %v8795_v58 = vadd.f32 %v8794_v57, %v8793_v40  ;;  %v3174_v53 = vpop.f32.mrf.mxu1 }
 0x2a9   : > { %v8796_v11 = vpop.f32.mrf.mxu0 }
 0x2aa   : > { %13734 = vst [vmem:[#allocation24_spill] sm:$0xff] %v12475_v62  ;;  %v3172_v3 = vadd.f32 %v8795_v58, %v3171_v63  ;;  %v9796_v25 = vpop.f32.mrf.mxu1  ;;  %v10666_v62 = vld [vmem:[#allocation2 + $0x17c] ss:$12 sps:$4 sm:$0xff]  }
 0x2ab   : > { %v8797_v14 = vpop.f32.mrf.mxu0 }
 0x2ac   : > { %v12482_v31 = vadd.f32 %v3172_v3, %v12215_v32  ;;  %v8798_v35 = vadd.f32 %v8797_v14, %v8796_v11  ;;  %v3179_v36 = vpop.f32.mrf.mxu1  ;;  %9910 = vmatmul.mubr.bf16.gmra.mxu1 %v10661_v10  ;;  %v8069_v11 = vcombine.low %v12472_v9, %v12221_v56 }
 0x2ad   : > { %v8799_v60 = vpop.f32.mrf.mxu0  ;;  %3925 = vmatmul.mubr.bf16.gmra.mxu0 %v8066_v15  ;;  %9913 = vmatprep.mubr.msk.bf16.mxu1 %vm11119_vm0, %v13705_v42  ;;  %v8073_v15 = vcombine.high %v12223_v54, %v12236_v38 }
 0x2ae   : > { %v3175_v40 = vadd.f32 %v8798_v35, %v3174_v53  ;;  %v9799_v7 = vpop.f32.mrf.mxu1  ;;  %3932 = vmatprep.mubr.bf16.mxu0 %v8070_v19 }
 0x2af   : > { %v8800_v63 = vpop.f32.mrf.mxu0 }
 0x2b0   : > { %v12487_v57 = vadd.f32 %v3175_v40, %v12226_v30  ;;  %v8801_v58 = vadd.f32 %v8800_v63, %v8799_v60  ;;  %v3182_v25 = vpop.f32.mrf.mxu1 }
 0x2b1   : > { %v8802_v32 = vpop.f32.mrf.mxu0 }
 0x2b2   : > { %v3180_v10 = vadd.f32 %v8801_v58, %v3179_v36  ;;  %v9800_v3 = vpop.f32.mrf.mxu1  ;;  %v12498_v36 = vld [vmem:[#allocation2 + $0x1b0] sm:$0xff] }
 0x2b3   : > { %v8803_v14 = vpop.f32.mrf.mxu0  ;;  %v10670_v58 = vld [vmem:[#allocation2 + $0x194] ss:$12 sps:$4 sm:$0xff]  }
 0x2b4   : > { %v12494_v53 = vadd.f32 %v3180_v10, %v12231_v1  ;;  %v8804_v19 = vadd.f32 %v8803_v14, %v8802_v32  ;;  %v3187_v35 = vpop.f32.mrf.mxu1  ;;  %9914 = vmatmul.mubr.bf16.gmra.mxu1 %v10666_v62  ;;  %v8072_v62 = vcombine.low %v12223_v54, %v12236_v38 }
 0x2b5   : > { %v8805_v30 = vpop.f32.mrf.mxu0  ;;  %3933 = vmatmul.mubr.bf16.gmra.mxu0 %v8069_v11  ;;  %9917 = vmatprep.mubr.msk.bf16.mxu1 %vm11119_vm0, %v13705_v42 }
 0x2b6   : > { %v3183_v60 = vadd.f32 %v8804_v19, %v3182_v25  ;;  %v9803_v40 = vpop.f32.mrf.mxu1  ;;  %3940 = vmatprep.mubr.bf16.mxu0 %v8073_v15  ;;  %v8076_v25 = vcombine.high %v12238_v22, %v12498_v36 }
 0x2b7   : > { %v8806_v56 = vpop.f32.mrf.mxu0 }
 0x2b8   : > { %v12501_v7 = vadd.f32 %v3183_v60, %v12241_v51  ;;  %v8807_v63 = vadd.f32 %v8806_v56, %v8805_v30  ;;  %v3190_v1 = vpop.f32.mrf.mxu1  ;;  %v10676_v56 = vld [vmem:[#allocation2 + $0x1ac] ss:$12 sps:$4 sm:$0xff]  }
 0x2b9   : > { %v8808_v32 = vpop.f32.mrf.mxu0 }
 0x2ba   : > { %v3188_v11 = vadd.f32 %v8807_v63, %v3187_v35  ;;  %v9804_v10 = vpop.f32.mrf.mxu1  ;;  %v8075_v63 = vcombine.low %v12238_v22, %v12498_v36 }
 0x2bb   : > { %v8809_v3 = vpop.f32.mrf.mxu0 }
 0x2bc   : > { %v12508_v15 = vadd.f32 %v3188_v11, %v12248_v8  ;;  %v8810_v14 = vadd.f32 %v8809_v3, %v8808_v32  ;;  %v3195_v19 = vpop.f32.mrf.mxu1  ;;  %9918 = vmatmul.mubr.bf16.gmra.mxu1 %v10670_v58 }
 0x2bd   : > { %v8811_v51 = vpop.f32.mrf.mxu0  ;;  %3941 = vmatmul.mubr.bf16.gmra.mxu0 %v8072_v62  ;;  %9921 = vmatprep.mubr.msk.bf16.mxu1 %vm11119_vm0, %v13705_v42  ;;  %v8103_v62 = vcombine.high %v12252_v23, %v12268_v13 }
 0x2be   : > { %v3191_v30 = vadd.f32 %v8810_v14, %v3190_v1  ;;  %v9807_v60 = vpop.f32.mrf.mxu1  ;;  %3948 = vmatprep.mubr.bf16.mxu0 %v8076_v25 }
 0x2bf   : > { %v8812_v54 = vpop.f32.mrf.mxu0 }
 0x2c0   : > { %v12513_v38 = vadd.f32 %v3191_v30, %v12255_v2  ;;  %v8813_v35 = vadd.f32 %v8812_v54, %v8811_v51  ;;  %v3198_v40 = vpop.f32.mrf.mxu1  ;;  %v10679_v30 = vld [vmem:[#allocation2 + $0x68] ss:$12 sps:$4 sm:$0xff]   ;;  %v8102_v54 = vcombine.low %v12252_v23, %v12268_v13  ;;  %v10691_v23 = vld [vmem:[%s11294_s11 + $0x530] sm:$0xff]  }
 0x2c1   : > { %v8814_v8 = vpop.f32.mrf.mxu0 }
 0x2c2   : > { %v3196_v58 = vadd.f32 %v8813_v35, %v3195_v19  ;;  %v9808_v32 = vpop.f32.mrf.mxu1  ;;  %v10682_v35 = vld [vmem:[%s11294_s11 + $0x538] sm:$0xff]  }
 0x2c3   : > { %v8815_v11 = vpop.f32.mrf.mxu0  ;;  %v10689_v32 = vld [vmem:[%s11294_s11 + $0x4f0] sm:$0xff]  }
 0x2c4   : > { %v12520_v1 = vadd.f32 %v3196_v58, %v12261_v52  ;;  %v8816_v10 = vadd.f32 %v8815_v11, %v8814_v8  ;;  %v3203_v2 = vpop.f32.mrf.mxu1  ;;  %9922 = vmatmul.mubr.bf16.gmra.mxu1 %v10676_v56  ;;  %v8106_v58 = vcombine.high %v12270_v50, %v12285_v6 }
 0x2c5   : > { %v8817_v25 = vpop.f32.mrf.mxu0  ;;  %3949 = vmatmul.mubr.bf16.gmra.mxu0 %v8075_v63  ;;  %9941 = vmatprep.mubr.msk.bf16.mxu1 %vm11119_vm0, %v13705_v42  ;;  %v10681_v63 = vld [vmem:[%s11294_s11 + $0x4b8] sm:$0xff]  }
 0x2c6   : > { %v3199_v22 = vadd.f32 %v8816_v10, %v3198_v40  ;;  %v9811_v3 = vpop.f32.mrf.mxu1  ;;  %4664 = vmatprep.mubr.bf16.mxu0 %v8103_v62 }
 0x2c7   : > { %v8818_v14 = vpop.f32.mrf.mxu0 }
 0x2c8   : > { %v12525_v19 = vadd.f32 %v3199_v22, %v12266_v21  ;;  %v8819_v52 = vadd.f32 %v8818_v14, %v8817_v25  ;;  %v3206_v51 = vpop.f32.mrf.mxu1  ;;  %v10690_v25 = vld [vmem:[%s11294_s11 + $0x4b0] sm:$0xff]  }
 0x2c9   : > { %v8820_v60 = vpop.f32.mrf.mxu0 }
 0x2ca   : > { %v3204_v56 = vadd.f32 %v8819_v52, %v3203_v2  ;;  %v9812_v8 = vpop.f32.mrf.mxu1 }
 0x2cb   : > { %v8821_v40 = vpop.f32.mrf.mxu0 }
 0x2cc   : > { %v12535_v21 = vadd.f32 %v3204_v56, %v12279_v12  ;;  %v8822_v62 = vadd.f32 %v8821_v40, %v8820_v60  ;;  %v3211_v11 = vpop.f32.mrf.mxu1  ;;  %9942 = vmatmul.mubr.bf16.vlgmr.msra.gmra.mxu1 %v10679_v30  ;;  %v10695_v12 = vld [vmem:[%s11294_s11 + $0x4e8] sm:$0xff]   ;;  %v10685_v30 = vld [vmem:[#allocation2 + $0x80] ss:$12 sps:$4 sm:$0xff]   ;;  %v8105_v60 = vcombine.low %v12270_v50, %v12285_v6  ;;  %v8109_v56 = vcombine.high %v12287_v48, %v12307_v37  ;;  %v10704_v40 = vld [vmem:[%s11294_s11 + $0x4e0] sm:$0xff]  }
 0x2cd   : > { %v8823_v10 = vpop.f32.mrf.mxu0  ;;  %4665 = vmatmul.mubr.bf16.vlgmr.msra.gmra.mxu0 %v8102_v54  ;;  %10002 = vmatpush3.bf16.msra.mxu1 %v10682_v35 }
 0x2ce   : > { %v3207_v13 = vadd.f32 %v8822_v62, %v3206_v51  ;;  %v9815_v2 = vpop.f32.mrf.mxu1  ;;  %9159 = vmatpush3.bf16.msra.mxu0 %v10681_v63  ;;  %9945 = vmatprep.mubr.msk.bf16.mxu1 %vm11119_vm0, %v13705_v42  ;;  %v10700_v63 = vld [vmem:[%s11294_s11 + $0x528] sm:$0xff]  }
 0x2cf   : > { %v8824_v22 = vpop.f32.mrf.mxu0  ;;  %4672 = vmatprep.mubr.bf16.mxu0 %v8106_v58  ;;  %9160 = vmatprep.subr.bf16.mxu0 %v10689_v32 }
 0x2d0   : > { %v12543_v3 = vadd.f32 %v3207_v13, %v12291_v28  ;;  %v8825_v14 = vadd.f32 %v8824_v22, %v8823_v10  ;;  %v3214_v52 = vpop.f32.mrf.mxu1  ;;  %10003 = vmatprep.subr.bf16.mxu1 %v13705_v42  ;;  %v10699_v28 = vld [vmem:[%s11294_s11 + $0x4a8] sm:$0xff]   ;;  %v10705_v10 = vld [vmem:[%s11294_s11 + $0x4a0] sm:$0xff]   ;;  %v10713_v13 = vld [vmem:[%s11294_s11 + $0x4d8] sm:$0xff]  }
 0x2d1   : > { %v8826_v51 = vpop.f32.mrf.mxu0  ;;  %10004 = vmatpush3.bf16.msra.mxu1 %v10691_v23 }
 0x2d2   : > { %v3212_v54 = vadd.f32 %v8825_v14, %v3211_v11  ;;  %v9816_v35 = vpop.f32.mrf.mxu1  ;;  %9161 = vmatpush3.bf16.msra.mxu0 %v10690_v25  ;;  %10005 = vmatprep.subr.bf16.mxu1 %v13705_v42 }
 0x2d3   : > { %v8827_v8 = vpop.f32.mrf.mxu0  ;;  %9162 = vmatprep.subr.bf16.mxu0 %v10695_v12  ;;  %v10688_v12 = vld [vmem:[#allocation2 + $0x98] ss:$12 sps:$4 sm:$0xff]  }
 0x2d4   : > { %v12555_v58 = vadd.f32 %v3212_v54, %v12303_v18  ;;  %v8828_v50 = vadd.f32 %v8827_v8, %v8826_v51  ;;  %v3219_v6 = vpop.f32.mrf.mxu1  ;;  %9946 = vmatmul.mubr.bf16.gmra.mxu1 %v10685_v30  ;;  %v10709_v18 = vld [vmem:[%s11294_s11 + $0x520] sm:$0xff]   ;;  %v10714_v54 = vld [vmem:[%s11294_s11 + $0x498] sm:$0xff]  }
 0x2d5   : > { %v8829_v32 = vpop.f32.mrf.mxu0  ;;  %4673 = vmatmul.mubr.bf16.gmra.mxu0 %v8105_v60  ;;  %9949 = vmatprep.mubr.msk.bf16.mxu1 %vm11119_vm0, %v13705_v42  ;;  %v8112_v60 = vcombine.high %v12310_v43, %v12331_v34 }
 0x2d6   : > { %v3215_v62 = vadd.f32 %v8828_v50, %v3214_v52  ;;  %v9819_v11 = vpop.f32.mrf.mxu1  ;;  %4680 = vmatprep.mubr.bf16.mxu0 %v8109_v56  ;;  %9163 = vmatpush3.bf16.msra.mxu0 %v10699_v28  ;;  %v8108_v52 = vcombine.low %v12287_v48, %v12307_v37  ;;  %v10722_v56 = vld [vmem:[%s11294_s11 + $0x4d0] sm:$0xff]  }
 0x2d7   : > { %v8830_v23 = vpop.f32.mrf.mxu0  ;;  %10006 = vmatpush3.bf16.msra.mxu1 %v10700_v63  ;;  %9164 = vmatprep.subr.bf16.mxu0 %v10704_v40  ;;  %v10723_v50 = vld [vmem:[%s11294_s11 + $0x490] sm:$0xff]  }
 0x2d8   : > { %v12563_v2 = vadd.f32 %v3215_v62, %v12315_v49  ;;  %v8831_v25 = vadd.f32 %v8830_v23, %v8829_v32  ;;  %v3222_v22 = vpop.f32.mrf.mxu1  ;;  %10007 = vmatprep.subr.bf16.mxu1 %v13705_v42  ;;  %v10718_v49 = vld [vmem:[%s11294_s11 + $0x518] sm:$0xff]   ;;  %v10731_v32 = vld [vmem:[%s11294_s11 + $0x4c8] sm:$0xff]  }
 0x2d9   : > { %v8832_v14 = vpop.f32.mrf.mxu0  ;;  %v10694_v23 = vld [vmem:[#allocation2 + $0xb0] ss:$12 sps:$4 sm:$0xff]  }
 0x2da   : > { %v3220_v30 = vadd.f32 %v8831_v25, %v3219_v6  ;;  %v9820_v51 = vpop.f32.mrf.mxu1  ;;  %9165 = vmatpush3.bf16.msra.mxu0 %v10705_v10 }
 0x2db   : > { %v8833_v35 = vpop.f32.mrf.mxu0  ;;  %10008 = vmatpush3.bf16.msra.mxu1 %v10709_v18  ;;  %9166 = vmatprep.subr.bf16.mxu0 %v10713_v13  ;;  %v8111_v13 = vcombine.low %v12310_v43, %v12331_v34 }
 0x2dc   : > { %v12574_v28 = vadd.f32 %v3220_v30, %v12326_v0  ;;  %v8834_v8 = vadd.f32 %v8833_v35, %v8832_v14  ;;  %v3227_v48 = vpop.f32.mrf.mxu1  ;;  %9950 = vmatmul.mubr.bf16.gmra.mxu1 %v10688_v12  ;;  %10009 = vmatprep.subr.bf16.mxu1 %v13705_v42  ;;  %v10727_v0 = vld [vmem:[%s11294_s11 + $0x510] sm:$0xff]   ;;  %v8115_v12 = vcombine.high %v12334_v24, %v12355_v61  ;;  %v10732_v14 = vld [vmem:[%s11294_s11 + $0x488] sm:$0xff]   ;;  %v10742_v30 = vld [vmem:[%s11294_s11 + $0x4c0] sm:$0xff]  }
 0x2dd   : > { %v8835_v37 = vpop.f32.mrf.mxu0  ;;  %4681 = vmatmul.mubr.bf16.gmra.mxu0 %v8108_v52  ;;  %9953 = vmatprep.mubr.msk.bf16.mxu1 %vm11119_vm0, %v13705_v42 }
 0x2de   : > { %v3223_v63 = vadd.f32 %v8834_v8, %v3222_v22  ;;  %v9823_v40 = vpop.f32.mrf.mxu1  ;;  %4688 = vmatprep.mubr.bf16.mxu0 %v8112_v60  ;;  %9167 = vmatpush3.bf16.msra.mxu0 %v10714_v54  ;;  %v10751_v8 = vld [vmem:[%s11294_s11 + $0x5b8] sm:$0xff]  }
 0x2df   : > { %v8836_v6 = vpop.f32.mrf.mxu0  ;;  %10010 = vmatpush3.bf16.msra.mxu1 %v10718_v49  ;;  %9168 = vmatprep.subr.bf16.mxu0 %v10722_v56  ;;  %v10743_v49 = vld [vmem:[%s11294_s11 + $0x480] sm:$0xff]  }
 0x2e0   : > { %v12583_v62 = vadd.f32 %v3223_v63, %v12339_v55  ;;  %v8837_v11 = vadd.f32 %v8836_v6, %v8835_v37  ;;  %v3230_v10 = vpop.f32.mrf.mxu1  ;;  %10011 = vmatprep.subr.bf16.mxu1 %v13705_v42  ;;  %v10737_v55 = vld [vmem:[%s11294_s11 + $0x508] sm:$0xff]   ;;  %v10698_v40 = vld [vmem:[#allocation2 + $0xc8] ss:$12 sps:$4 sm:$0xff]   ;;  %v8114_v6 = vcombine.low %v12334_v24, %v12355_v61 }
 0x2e1   : > { %v8838_v18 = vpop.f32.mrf.mxu0 }
 0x2e2   : > { %v3228_v25 = vadd.f32 %v8837_v11, %v3227_v48  ;;  %v9824_v22 = vpop.f32.mrf.mxu1  ;;  %9169 = vmatpush3.bf16.msra.mxu0 %v10723_v50  ;;  %v8118_v11 = vcombine.high %v12358_v41, %v12376_v20 }
 0x2e3   : > { %v8839_v52 = vpop.f32.mrf.mxu0  ;;  %10012 = vmatpush3.bf16.msra.mxu1 %v10727_v0  ;;  %9170 = vmatprep.subr.bf16.mxu0 %v10731_v32 }
 0x2e4   : > { %v12594_v51 = vadd.f32 %v3228_v25, %v12350_v59  ;;  %v8840_v60 = vadd.f32 %v8839_v52, %v8838_v18  ;;  %v3235_v43 = vpop.f32.mrf.mxu1  ;;  %9954 = vmatmul.mubr.bf16.gmra.mxu1 %v10694_v23  ;;  %10013 = vmatprep.subr.bf16.mxu1 %v13705_v42  ;;  %v10744_v59 = vld [vmem:[%s11294_s11 + $0x500] sm:$0xff]  }
 0x2e5   : > { %v8841_v34 = vpop.f32.mrf.mxu0  ;;  %4689 = vmatmul.mubr.bf16.gmra.mxu0 %v8111_v13  ;;  %9957 = vmatprep.mubr.msk.bf16.mxu1 %vm11119_vm0, %v13705_v42 }
 0x2e6   : > { %v3231_v54 = vadd.f32 %v8840_v60, %v3230_v10  ;;  %v9827_v35 = vpop.f32.mrf.mxu1  ;;  %4696 = vmatprep.mubr.bf16.mxu0 %v8115_v12  ;;  %9171 = vmatpush3.bf16.msra.mxu0 %v10732_v14  ;;  %v13736_v12 = vld [vmem:[#allocation15_spill] sm:$0xff] }
 0x2e7   : > { %v8842_v56 = vpop.f32.mrf.mxu0  ;;  %10014 = vmatpush3.bf16.msra.mxu1 %v10737_v55  ;;  %9172 = vmatprep.subr.bf16.mxu0 %v10742_v30  ;;  %v10703_v30 = vld [vmem:[#allocation2 + $0xe0] ss:$12 sps:$4 sm:$0xff]   ;;  %v8121_v35 = vcombine.high %v12378_v44, %v12392_v26 }
 0x2e8   : > { %v12603_v48 = vadd.f32 %v3231_v54, %v12363_v17  ;;  %v8843_v37 = vadd.f32 %v8842_v56, %v8841_v34  ;;  %v3238_v63 = vpop.f32.mrf.mxu1  ;;  %10015 = vmatprep.subr.bf16.mxu1 %v13705_v42  ;;  %v13735_v17 = vld [vmem:[#allocation16_spill] sm:$0xff] }
 0x2e9   : > { %v8844_v50 = vpop.f32.mrf.mxu0  ;;  %v13737_v56 = vld [vmem:[#allocation12_spill] sm:$0xff] }
 0x2ea   : > { %v3236_v0 = vadd.f32 %v8843_v37, %v3235_v43  ;;  %v9828_v32 = vpop.f32.mrf.mxu1  ;;  %9173 = vmatpush3.bf16.msra.mxu0 %v10743_v49  ;;  %v8117_v43 = vcombine.low %v12358_v41, %v12376_v20  ;;  %v13738_v20 = vld [vmem:[#allocation13_spill] sm:$0xff] }
 0x2eb   : > { %v8845_v10 = vpop.f32.mrf.mxu0  ;;  %10016 = vmatpush3.bf16.msra.mxu1 %v10744_v59  ;;  %9287 = vmatprep.subr.bf16.mxu0 %v10751_v8 }
 0x2ec   : > { %v12611_v23 = vadd.f32 %v3236_v0, %v13735_v17  ;;  %v8846_v18 = vadd.f32 %v8845_v10, %v8844_v50  ;;  %v3243_v13 = vpop.f32.mrf.mxu1  ;;  %9958 = vmatmul.mubr.bf16.gmra.mxu1 %v10698_v40  ;;  %10077 = vmatprep.subr.bf16.mxu1 %v13705_v42  ;;  %v8120_v17 = vcombine.low %v12378_v44, %v12392_v26  ;;  %v13740_v26 = vld [vmem:[#allocation17_spill] sm:$0xff] }
 0x2ed   : > { %v8847_v25 = vpop.f32.mrf.mxu0  ;;  %4697 = vmatmul.mubr.bf16.gmra.mxu0 %v8114_v6  ;;  %9961 = vmatprep.mubr.msk.bf16.mxu1 %vm11119_vm0, %v13705_v42 }
 0x2ee   : > { %v3239_v24 = vadd.f32 %v8846_v18, %v3238_v63  ;;  %v9831_v61 = vpop.f32.mrf.mxu1  ;;  %4704 = vmatprep.mubr.bf16.mxu0 %v8118_v11  ;;  %v10708_v11 = vld [vmem:[#allocation2 + $0xf8] ss:$12 sps:$4 sm:$0xff]  }
 0x2ef   : > { %v8848_v22 = vpop.f32.mrf.mxu0  ;;  %v13739_v61 = vld [vmem:[#allocation14_spill] sm:$0xff] }
 0x2f0   : > { %v12617_v14 = vadd.f32 %v3239_v24, %v13736_v12  ;;  %v8849_v52 = vadd.f32 %v8848_v22, %v8847_v25  ;;  %v3246_v55 = vpop.f32.mrf.mxu1  ;;  %v8124_v25 = vcombine.high %v12394_v29, %v12408_v5 }
 0x2f1   : > { %v8850_v60 = vpop.f32.mrf.mxu0 }
 0x2f2   : > { %v3244_v34 = vadd.f32 %v8849_v52, %v3243_v13  ;;  %v9832_v54 = vpop.f32.mrf.mxu1 }
 0x2f3   : > { %v8851_v49 = vpop.f32.mrf.mxu0 }
 0x2f4   : > { %v12624_v59 = vadd.f32 %v3244_v34, %v13737_v56  ;;  %v8852_v8 = vadd.f32 %v8851_v49, %v8850_v60  ;;  %v3251_v37 = vpop.f32.mrf.mxu1  ;;  %9962 = vmatmul.mubr.bf16.gmra.mxu1 %v10703_v30  ;;  %v8123_v56 = vcombine.low %v12394_v29, %v12408_v5  ;;  %v13742_v5 = vld [vmem:[#allocation19_spill] sm:$0xff] }
 0x2f5   : > { %v8853_v63 = vpop.f32.mrf.mxu0  ;;  %4705 = vmatmul.mubr.bf16.gmra.mxu0 %v8117_v43  ;;  %9965 = vmatprep.mubr.msk.bf16.mxu1 %vm11119_vm0, %v13705_v42 }
 0x2f6   : > { %v3247_v40 = vadd.f32 %v8852_v8, %v3246_v55  ;;  %v9835_v50 = vpop.f32.mrf.mxu1  ;;  %4712 = vmatprep.mubr.bf16.mxu0 %v8121_v35  ;;  %v10712_v35 = vld [vmem:[#allocation2 + $0x110] ss:$12 sps:$4 sm:$0xff]  }
 0x2f7   : > { %v8854_v41 = vpop.f32.mrf.mxu0  ;;  %v13741_v50 = vld [vmem:[#allocation18_spill] sm:$0xff] }
 0x2f8   : > { %v12629_v6 = vadd.f32 %v3247_v40, %v13738_v20  ;;  %v8855_v0 = vadd.f32 %v8854_v41, %v8853_v63  ;;  %v3254_v32 = vpop.f32.mrf.mxu1  ;;  %v8127_v63 = vcombine.high %v12410_v47, %v12424_v39 }
 0x2f9   : > { %v8856_v10 = vpop.f32.mrf.mxu0 }
 0x2fa   : > { %v3252_v18 = vadd.f32 %v8855_v0, %v3251_v37  ;;  %v9836_v13 = vpop.f32.mrf.mxu1 }
 0x2fb   : > { %v8857_v24 = vpop.f32.mrf.mxu0 }
 0x2fc   : > { %v12636_v22 = vadd.f32 %v3252_v18, %v13739_v61  ;;  %v8858_v12 = vadd.f32 %v8857_v24, %v8856_v10  ;;  %v3259_v52 = vpop.f32.mrf.mxu1  ;;  %9966 = vmatmul.mubr.bf16.gmra.mxu1 %v10708_v11  ;;  %v8126_v61 = vcombine.low %v12410_v47, %v12424_v39  ;;  %v13744_v39 = vld [vmem:[#allocation21_spill] sm:$0xff] }
 0x2fd   : > { %v8859_v55 = vpop.f32.mrf.mxu0  ;;  %4713 = vmatmul.mubr.bf16.gmra.mxu0 %v8120_v17  ;;  %9969 = vmatprep.mubr.msk.bf16.mxu1 %vm11119_vm0, %v13705_v42 }
 0x2fe   : > { %v3255_v30 = vadd.f32 %v8858_v12, %v3254_v32  ;;  %v9839_v60 = vpop.f32.mrf.mxu1  ;;  %4720 = vmatprep.mubr.bf16.mxu0 %v8124_v25  ;;  %v10717_v25 = vld [vmem:[#allocation2 + $0x128] ss:$12 sps:$4 sm:$0xff]  }
 0x2ff   : > { %v8860_v44 = vpop.f32.mrf.mxu0  ;;  %v13743_v60 = vld [vmem:[#allocation20_spill] sm:$0xff] }
 0x300   : > { %v12641_v43 = vadd.f32 %v3255_v30, %v13740_v26  ;;  %v8861_v34 = vadd.f32 %v8860_v44, %v8859_v55  ;;  %v3262_v54 = vpop.f32.mrf.mxu1  ;;  %v8130_v55 = vcombine.high %v12426_v33, %v12440_v16 }
 0x301   : > { %v8862_v49 = vpop.f32.mrf.mxu0 }
 0x302   : > { %v3260_v8 = vadd.f32 %v8861_v34, %v3259_v52  ;;  %v9840_v37 = vpop.f32.mrf.mxu1 }
 0x303   : > { %v8863_v40 = vpop.f32.mrf.mxu0 }
 0x304   : > { %v12648_v41 = vadd.f32 %v3260_v8, %v13741_v50  ;;  %v8864_v20 = vadd.f32 %v8863_v40, %v8862_v49  ;;  %v3267_v0 = vpop.f32.mrf.mxu1  ;;  %9970 = vmatmul.mubr.bf16.gmra.mxu1 %v10712_v35  ;;  %v8129_v50 = vcombine.low %v12426_v33, %v12440_v16 }
 0x305   : > { %v8865_v32 = vpop.f32.mrf.mxu0  ;;  %4721 = vmatmul.mubr.bf16.gmra.mxu0 %v8123_v56  ;;  %9973 = vmatprep.mubr.msk.bf16.mxu1 %vm11119_vm0, %v13705_v42 }
 0x306   : > { %v3263_v11 = vadd.f32 %v8864_v20, %v3262_v54  ;;  %v9843_v10 = vpop.f32.mrf.mxu1  ;;  %4728 = vmatprep.mubr.bf16.mxu0 %v8127_v63  ;;  %v10721_v63 = vld [vmem:[#allocation2 + $0x140] ss:$12 sps:$4 sm:$0xff]  }
 0x307   : > { %v8866_v29 = vpop.f32.mrf.mxu0  ;;  %v13745_v10 = vld [vmem:[#allocation22_spill] sm:$0xff] }
 0x308   : > { %v12653_v17 = vadd.f32 %v3263_v11, %v13742_v5  ;;  %v8867_v18 = vadd.f32 %v8866_v29, %v8865_v32  ;;  %v3270_v13 = vpop.f32.mrf.mxu1  ;;  %v8133_v32 = vcombine.high %v12442_v27, %v12456_v4 }
 0x309   : > { %v8868_v24 = vpop.f32.mrf.mxu0 }
 0x30a   : > { %v3268_v12 = vadd.f32 %v8867_v18, %v3267_v0  ;;  %v9844_v52 = vpop.f32.mrf.mxu1 }
 0x30b   : > { %v8869_v30 = vpop.f32.mrf.mxu0  ;;  %v10726_v52 = vld [vmem:[#allocation2 + $0x158] ss:$12 sps:$4 sm:$0xff]  }
 0x30c   : > { %v12660_v44 = vadd.f32 %v3268_v12, %v13743_v60  ;;  %v8870_v26 = vadd.f32 %v8869_v30, %v8868_v24  ;;  %v3275_v34 = vpop.f32.mrf.mxu1  ;;  %9974 = vmatmul.mubr.bf16.gmra.mxu1 %v10717_v25  ;;  %v8132_v30 = vcombine.low %v12442_v27, %v12456_v4  ;;  %v13747_v4 = vld [vmem:[#allocation24_spill] sm:$0xff] }
 0x30d   : > { %v8871_v54 = vpop.f32.mrf.mxu0  ;;  %4729 = vmatmul.mubr.bf16.gmra.mxu0 %v8126_v61  ;;  %9977 = vmatprep.mubr.msk.bf16.mxu1 %vm11119_vm0, %v13705_v42 }
 0x30e   : > { %v3271_v35 = vadd.f32 %v8870_v26, %v3270_v13  ;;  %v9847_v49 = vpop.f32.mrf.mxu1  ;;  %4736 = vmatprep.mubr.bf16.mxu0 %v8130_v55 }
 0x30f   : > { %v8872_v47 = vpop.f32.mrf.mxu0 }
 0x310   : > { %v12665_v56 = vadd.f32 %v3271_v35, %v13744_v39  ;;  %v8873_v8 = vadd.f32 %v8872_v47, %v8871_v54  ;;  %v3278_v37 = vpop.f32.mrf.mxu1  ;;  %v13746_v35 = vld [vmem:[#allocation23_spill] sm:$0xff] }
 0x311   : > { %v8874_v40 = vpop.f32.mrf.mxu0 }
 0x312   : > { %v3276_v20 = vadd.f32 %v8873_v8, %v3275_v34  ;;  %v9848_v0 = vpop.f32.mrf.mxu1  ;;  %v8136_v34 = vcombine.high %v12458_v45, %v12472_v9 }
 0x313   : > { %v8875_v11 = vpop.f32.mrf.mxu0 }
 0x314   : > { %v12672_v29 = vadd.f32 %v3276_v20, %v13745_v10  ;;  %v8876_v5 = vadd.f32 %v8875_v11, %v8874_v40  ;;  %v3991_v18 = vpop.f32.mrf.mxu1  ;;  %9978 = vmatmul.mubr.bf16.gmra.mxu1 %v10721_v63  ;;  %v10730_v20 = vld [vmem:[#allocation2 + $0x170] ss:$12 sps:$4 sm:$0xff]  }
 0x315   : > { %v8916_v13 = vpop.f32.mrf.mxu0  ;;  %4737 = vmatmul.mubr.bf16.gmra.mxu0 %v8129_v50  ;;  %9981 = vmatprep.mubr.msk.bf16.mxu1 %vm11119_vm0, %v13705_v42 }
 0x316   : > { %v3279_v25 = vadd.f32 %v8876_v5, %v3278_v37  ;;  %v9867_v24 = vpop.f32.mrf.mxu1  ;;  %4744 = vmatprep.mubr.bf16.mxu0 %v8133_v32  ;;  %v8135_v32 = vcombine.low %v12458_v45, %v12472_v9  ;;  %v12693_v5 = vld [vmem:[#allocation2 + $0x184] ss:$12 sps:$4 sm:$0xff]  }
 0x317   : > { %v8917_v33 = vpop.f32.mrf.mxu0 }
 0x318   : > { %v12677_v16 = vadd.f32 %v3279_v25, %v12461_v46  ;;  %v8918_v61 = vadd.f32 %v8917_v33, %v8916_v13  ;;  %v3994_v12 = vpop.f32.mrf.mxu1 }
 0x319   : > { %v8919_v55 = vpop.f32.mrf.mxu0 }
 0x31a   : > { %v3992_v60 = vadd.f32 %v8918_v61, %v3991_v18  ;;  %v9868_v26 = vpop.f32.mrf.mxu1 }
 0x31b   : > { %v8920_v54 = vpop.f32.mrf.mxu0 }
 0x31c   : > { %v12684_v49 = vadd.f32 %v3992_v60, %v13746_v35  ;;  %v8921_v47 = vadd.f32 %v8920_v54, %v8919_v55  ;;  %v3999_v39 = vpop.f32.mrf.mxu1  ;;  %9982 = vmatmul.mubr.bf16.gmra.mxu1 %v10726_v52  ;;  %v12704_v60 = vld [vmem:[#allocation2 + $0x180] ss:$12 sps:$4 sm:$0xff]   ;;  %v12706_v54 = vld [vmem:[#allocation2 + $0x19c] ss:$12 sps:$4 sm:$0xff]  }
 0x31d   : > { %v8922_v46 = vpop.f32.mrf.mxu0  ;;  %4745 = vmatmul.mubr.bf16.gmra.mxu0 %v8132_v30  ;;  %9985 = vmatprep.mubr.msk.bf16.mxu1 %vm11119_vm0, %v13705_v42 }
 0x31e   : > { %v3995_v8 = vadd.f32 %v8921_v47, %v3994_v12  ;;  %v9871_v37 = vpop.f32.mrf.mxu1  ;;  %4752 = vmatprep.mubr.bf16.mxu0 %v8136_v34 }
 0x31f   : > { %v8923_v27 = vpop.f32.mrf.mxu0 }
 0x320   : > { %v12689_v63 = vadd.f32 %v3995_v8, %v13747_v4  ;;  %v8924_v40 = vadd.f32 %v8923_v27, %v8922_v46  ;;  %v4002_v50 = vpop.f32.mrf.mxu1  ;;  %v12715_v4 = vld [vmem:[#allocation2 + $0x1bc] sm:$0xff] }
 0x321   : > { %v8925_v0 = vpop.f32.mrf.mxu0 }
 0x322   : > { %v4000_v11 = vadd.f32 %v8924_v40, %v3999_v39  ;;  %v9872_v10 = vpop.f32.mrf.mxu1 }
 0x323   : > { %v8926_v18 = vpop.f32.mrf.mxu0 }
 0x324   : > { %v12696_v13 = vadd.f32 %v4000_v11, %v12482_v31  ;;  %v8927_v25 = vadd.f32 %v8926_v18, %v8925_v0  ;;  %v4007_v24 = vpop.f32.mrf.mxu1  ;;  %9986 = vmatmul.mubr.bf16.gmra.mxu1 %v10730_v20  ;;  %v10736_v31 = vld [vmem:[#allocation2 + $0x188] ss:$12 sps:$4 sm:$0xff]   ;;  %v10741_v20 = vld [vmem:[#allocation2 + $0x1a0] ss:$12 sps:$4 sm:$0xff]   ;;  %v8145_v18 = vcombine.high %v12498_v36, %v12715_v4 }
 0x325   : > { %v8928_v33 = vpop.f32.mrf.mxu0  ;;  %4753 = vmatmul.mubr.bf16.gmra.mxu0 %v8135_v32  ;;  %9989 = vmatprep.mubr.msk.bf16.mxu1 %vm11119_vm0, %v13705_v42  ;;  %v12720_v32 = vld [vmem:[#allocation2 + $0x198] ss:$12 sps:$4 sm:$0xff]  }
 0x326   : > { %v4003_v61 = vadd.f32 %v8927_v25, %v4002_v50  ;;  %v9875_v12 = vpop.f32.mrf.mxu1  ;;  %4760 = vmatprep.mubr.bf16.mxu0 %v12693_v5 }
 0x327   : > { %v8929_v45 = vpop.f32.mrf.mxu0 }
 0x328   : > { %v12702_v9 = vadd.f32 %v4003_v61, %v12487_v57  ;;  %v8930_v52 = vadd.f32 %v8929_v45, %v8928_v33  ;;  %v4010_v55 = vpop.f32.mrf.mxu1 }
 0x329   : > { %v8931_v30 = vpop.f32.mrf.mxu0 }
 0x32a   : > { %v4008_v26 = vadd.f32 %v8930_v52, %v4007_v24  ;;  %v9876_v34 = vpop.f32.mrf.mxu1 }
 0x32b   : > { %v8932_v35 = vpop.f32.mrf.mxu0  ;;  %v10747_v34 = vld [vmem:[#allocation2 + $0x1b8] ss:$12 sps:$4 sm:$0xff]  }
 0x32c   : > { %v12709_v47 = vadd.f32 %v4008_v26, %v12494_v53  ;;  %v8933_v39 = vadd.f32 %v8932_v35, %v8931_v30  ;;  %v4015_v46 = vpop.f32.mrf.mxu1  ;;  %9990 = vmatmul.mubr.bf16.gmra.mxu1 %v10736_v31  ;;  %v12730_v31 = vld [vmem:[#allocation2 + $0x9c] sm:$0xff] }
 0x32d   : > { %v8934_v8 = vpop.f32.mrf.mxu0  ;;  %4761 = vmatmul.mubr.bf16.gmra.mxu0 %v12704_v60  ;;  %9993 = vmatprep.mubr.msk.bf16.mxu1 %vm11119_vm0, %v13705_v42 }
 0x32e   : > { %v4011_v57 = vadd.f32 %v8933_v39, %v4010_v55  ;;  %v9879_v37 = vpop.f32.mrf.mxu1  ;;  %4768 = vmatprep.mubr.bf16.mxu0 %v12706_v54  ;;  %v4968_v55 = vld [vmem:[#allocation2 + $0x90] sm:$0xff]  ;;  %v8144_v39 = vcombine.low %v12498_v36, %v12715_v4 }
 0x32f   : > { %v8935_v27 = vpop.f32.mrf.mxu0 }
 0x330   : > { %v12718_v40 = vadd.f32 %v4011_v57, %v12501_v7  ;;  %v8936_v53 = vadd.f32 %v8935_v27, %v8934_v8  ;;  %v4018_v50 = vpop.f32.mrf.mxu1  ;;  %v8172_v57 = vcombine.high %v4968_v55, %v12730_v31 }
 0x331   : > { %v8937_v0 = vpop.f32.mrf.mxu0 }
 0x332   : > { %v4016_v11 = vadd.f32 %v8936_v53, %v4015_v46  ;;  %v9880_v10 = vpop.f32.mrf.mxu1 }
 0x333   : > { %v8938_v25 = vpop.f32.mrf.mxu0 }
 0x334   : > { %v12725_v24 = vadd.f32 %v4016_v11, %v12508_v15  ;;  %v8939_v33 = vadd.f32 %v8938_v25, %v8937_v0  ;;  %v4023_v61 = vpop.f32.mrf.mxu1  ;;  %9994 = vmatmul.mubr.bf16.gmra.mxu1 %v10741_v20  ;;  %v12746_v25 = vld [vmem:[#allocation2 + $0xa8] sm:$0xff] }
 0x335   : > { %v8940_v7 = vpop.f32.mrf.mxu0  ;;  %4769 = vmatmul.mubr.bf16.gmra.mxu0 %v12720_v32  ;;  %9997 = vmatprep.mubr.msk.bf16.mxu1 %vm11119_vm0, %v13705_v42 }
 0x336   : > { %v4019_v12 = vadd.f32 %v8939_v33, %v4018_v50  ;;  %v9883_v45 = vpop.f32.mrf.mxu1  ;;  %4776 = vmatprep.mubr.bf16.mxu0 %v8145_v18  ;;  %v10750_v18 = vld [vmem:[#allocation2 + $0x98] ss:$12 sps:$4 sm:$0xff]  }
 0x337   : > { %v8941_v52 = vpop.f32.mrf.mxu0  ;;  %v12748_v33 = vld [vmem:[#allocation2 + $0xb4] sm:$0xff] }
 0x338   : > { %v12733_v30 = vadd.f32 %v4019_v12, %v12513_v38  ;;  %v8942_v15 = vadd.f32 %v8941_v52, %v8940_v7  ;;  %v4026_v26 = vpop.f32.mrf.mxu1  ;;  %v8171_v7 = vcombine.low %v4968_v55, %v12730_v31  ;;  %v10753_v12 = vld [vmem:[%s11294_s11 + $0x5f8] sm:$0xff]   ;;  %v10762_v55 = vld [vmem:[%s11294_s11 + $0x5f0] sm:$0xff]  }
 0x339   : > { %v8943_v35 = vpop.f32.mrf.mxu0 }
 0x33a   : > { %v4024_v46 = vadd.f32 %v8942_v15, %v4023_v61  ;;  %v9884_v8 = vpop.f32.mrf.mxu1  ;;  %v10752_v15 = vld [vmem:[%s11294_s11 + $0x578] sm:$0xff]  }
 0x33b   : > { %v8944_v37 = vpop.f32.mrf.mxu0 }
 0x33c   : > { %v12739_v27 = vadd.f32 %v4024_v46, %v12520_v1  ;;  %v8945_v53 = vadd.f32 %v8944_v37, %v8943_v35  ;;  %v4031_v50 = vpop.f32.mrf.mxu1  ;;  %9998 = vmatmul.mubr.bf16.gmra.mxu1 %v10747_v34  ;;  %v10760_v34 = vld [vmem:[%s11294_s11 + $0x5b0] sm:$0xff]  }
 0x33d   : > { %v8946_v38 = vpop.f32.mrf.mxu0  ;;  %4777 = vmatmul.mubr.bf16.gmra.mxu0 %v8144_v39  ;;  %10017 = vmatprep.mubr.msk.bf16.mxu1 %vm11119_vm0, %v13705_v42 }
 0x33e   : > { %v4027_v20 = vadd.f32 %v8945_v53, %v4026_v26  ;;  %v9887_v36 = vpop.f32.mrf.mxu1  ;;  %5492 = vmatprep.mubr.bf16.mxu0 %v8172_v57  ;;  %v10761_v53 = vld [vmem:[%s11294_s11 + $0x570] sm:$0xff]  }
 0x33f   : > { %v8947_v0 = vpop.f32.mrf.mxu0 }
 0x340   : > { %v12744_v11 = vadd.f32 %v4027_v20, %v12525_v19  ;;  %v8948_v1 = vadd.f32 %v8947_v0, %v8946_v38  ;;  %v4034_v10 = vpop.f32.mrf.mxu1  ;;  %v8175_v19 = vcombine.high %v12746_v25, %v12748_v33  ;;  %v12763_v38 = vld [vmem:[#allocation2 + $0xc0] sm:$0xff]  ;;  %v10766_v20 = vld [vmem:[%s11294_s11 + $0x5a8] sm:$0xff]  }
 0x341   : > { %v8949_v61 = vpop.f32.mrf.mxu0 }
 0x342   : > { %v4032_v45 = vadd.f32 %v8948_v1, %v4031_v50  ;;  %v9888_v52 = vpop.f32.mrf.mxu1 }
 0x343   : > { %v8950_v26 = vpop.f32.mrf.mxu0 }
 0x344   : > { %v12757_v35 = vadd.f32 %v4032_v45, %v12535_v21  ;;  %v8951_v39 = vadd.f32 %v8950_v26, %v8949_v61  ;;  %v4039_v46 = vpop.f32.mrf.mxu1  ;;  %10018 = vmatmul.mubr.bf16.vlgmr.msra.gmra.mxu1 %v10750_v18  ;;  %v12765_v21 = vld [vmem:[#allocation2 + $0xcc] sm:$0xff]  ;;  %v8174_v61 = vcombine.low %v12746_v25, %v12748_v33 }
 0x345   : > { %v8952_v8 = vpop.f32.mrf.mxu0  ;;  %5493 = vmatmul.mubr.bf16.vlgmr.msra.gmra.mxu0 %v8171_v7  ;;  %10078 = vmatpush3.bf16.msra.mxu1 %v10753_v12  ;;  %v8178_v45 = vcombine.high %v12763_v38, %v12765_v21  ;;  %v10775_v26 = vld [vmem:[%s11294_s11 + $0x5a0] sm:$0xff]  }
 0x346   : > { %v4035_v57 = vadd.f32 %v8951_v39, %v4034_v10  ;;  %v9891_v37 = vpop.f32.mrf.mxu1  ;;  %9288 = vmatpush3.bf16.msra.mxu0 %v10752_v15  ;;  %10021 = vmatprep.mubr.msk.bf16.mxu1 %vm11119_vm0, %v13705_v42  ;;  %v10756_v10 = vld [vmem:[#allocation2 + $0xb0] ss:$12 sps:$4 sm:$0xff]  }
 0x347   : > { %v8953_v50 = vpop.f32.mrf.mxu0  ;;  %5500 = vmatprep.mubr.bf16.mxu0 %v8175_v19  ;;  %9289 = vmatprep.subr.bf16.mxu0 %v10760_v34  ;;  %v10771_v15 = vld [vmem:[%s11294_s11 + $0x5e8] sm:$0xff]   ;;  %v10776_v37 = vld [vmem:[%s11294_s11 + $0x560] sm:$0xff]  }
 0x348   : > { %v12769_v36 = vadd.f32 %v4035_v57, %v12543_v3  ;;  %v8954_v0 = vadd.f32 %v8953_v50, %v8952_v8  ;;  %v4042_v1 = vpop.f32.mrf.mxu1  ;;  %10079 = vmatprep.subr.bf16.mxu1 %v13705_v42  ;;  %v10770_v3 = vld [vmem:[%s11294_s11 + $0x568] sm:$0xff]   ;;  %v10780_v50 = vld [vmem:[%s11294_s11 + $0x5e0] sm:$0xff]  }
 0x349   : > { %v8955_v18 = vpop.f32.mrf.mxu0  ;;  %10080 = vmatpush3.bf16.msra.mxu1 %v10762_v55  ;;  %v12785_v57 = vld [vmem:[#allocation2 + $0xd8] sm:$0xff] }
 0x34a   : > { %v4040_v7 = vadd.f32 %v8954_v0, %v4039_v46  ;;  %v9892_v12 = vpop.f32.mrf.mxu1  ;;  %9290 = vmatpush3.bf16.msra.mxu0 %v10761_v53  ;;  %10081 = vmatprep.subr.bf16.mxu1 %v13705_v42 }
 0x34b   : > { %v8956_v52 = vpop.f32.mrf.mxu0  ;;  %9291 = vmatprep.subr.bf16.mxu0 %v10766_v20  ;;  %v10784_v20 = vld [vmem:[%s11294_s11 + $0x598] sm:$0xff]  }
 0x34c   : > { %v12781_v19 = vadd.f32 %v4040_v7, %v12555_v58  ;;  %v8957_v34 = vadd.f32 %v8956_v52, %v8955_v18  ;;  %v4047_v39 = vpop.f32.mrf.mxu1  ;;  %10022 = vmatmul.mubr.bf16.gmra.mxu1 %v10756_v10  ;;  %v12788_v58 = vld [vmem:[#allocation2 + $0xe4] sm:$0xff]  ;;  %v8177_v7 = vcombine.low %v12763_v38, %v12765_v21 }
 0x34d   : > { %v8958_v46 = vpop.f32.mrf.mxu0  ;;  %5501 = vmatmul.mubr.bf16.gmra.mxu0 %v8174_v61  ;;  %10025 = vmatprep.mubr.msk.bf16.mxu1 %vm11119_vm0, %v13705_v42  ;;  %v10759_v18 = vld [vmem:[#allocation2 + $0xc8] ss:$12 sps:$4 sm:$0xff]  }
 0x34e   : > { %v4043_v8 = vadd.f32 %v8957_v34, %v4042_v1  ;;  %v9895_v55 = vpop.f32.mrf.mxu1  ;;  %5508 = vmatprep.mubr.bf16.mxu0 %v8178_v45  ;;  %9292 = vmatpush3.bf16.msra.mxu0 %v10770_v3  ;;  %v8181_v3 = vcombine.high %v12785_v57, %v12788_v58  ;;  %v10785_v52 = vld [vmem:[%s11294_s11 + $0x558] sm:$0xff]  }
 0x34f   : > { %v8959_v53 = vpop.f32.mrf.mxu0  ;;  %10082 = vmatpush3.bf16.msra.mxu1 %v10771_v15  ;;  %9293 = vmatprep.subr.bf16.mxu0 %v10775_v26  ;;  %v10793_v26 = vld [vmem:[%s11294_s11 + $0x590] sm:$0xff]  }
 0x350   : > { %v12793_v0 = vadd.f32 %v4043_v8, %v12563_v2  ;;  %v8960_v1 = vadd.f32 %v8959_v53, %v8958_v46  ;;  %v4050_v10 = vpop.f32.mrf.mxu1  ;;  %10083 = vmatprep.subr.bf16.mxu1 %v13705_v42  ;;  %v10789_v2 = vld [vmem:[%s11294_s11 + $0x5d8] sm:$0xff]   ;;  %v12809_v53 = vld [vmem:[#allocation2 + $0xf0] sm:$0xff] }
 0x351   : > { %v8961_v61 = vpop.f32.mrf.mxu0 }
 0x352   : > { %v4048_v12 = vadd.f32 %v8960_v1, %v4047_v39  ;;  %v9896_v45 = vpop.f32.mrf.mxu1  ;;  %9294 = vmatpush3.bf16.msra.mxu0 %v10776_v37  ;;  %v10796_v1 = vld [vmem:[%s11294_s11 + $0x5d0] sm:$0xff]  }
 0x353   : > { %v8962_v15 = vpop.f32.mrf.mxu0  ;;  %10084 = vmatpush3.bf16.msra.mxu1 %v10780_v50  ;;  %9295 = vmatprep.subr.bf16.mxu0 %v10784_v20  ;;  %v12812_v20 = vld [vmem:[#allocation2 + $0xfc] sm:$0xff] }
 0x354   : > { %v12804_v34 = vadd.f32 %v4048_v12, %v12574_v28  ;;  %v8963_v46 = vadd.f32 %v8962_v15, %v8961_v61  ;;  %v4055_v8 = vpop.f32.mrf.mxu1  ;;  %10026 = vmatmul.mubr.bf16.gmra.mxu1 %v10759_v18  ;;  %10085 = vmatprep.subr.bf16.mxu1 %v13705_v42  ;;  %v10794_v28 = vld [vmem:[%s11294_s11 + $0x550] sm:$0xff]   ;;  %v10798_v18 = vld [vmem:[%s11294_s11 + $0x588] sm:$0xff]  }
 0x355   : > { %v8964_v39 = vpop.f32.mrf.mxu0  ;;  %5509 = vmatmul.mubr.bf16.gmra.mxu0 %v8177_v7  ;;  %10029 = vmatprep.mubr.msk.bf16.mxu1 %vm11119_vm0, %v13705_v42  ;;  %v10765_v12 = vld [vmem:[#allocation2 + $0xe0] ss:$12 sps:$4 sm:$0xff]  }
 0x356   : > { %v4051_v55 = vadd.f32 %v8963_v46, %v4050_v10  ;;  %v9899_v37 = vpop.f32.mrf.mxu1  ;;  %5516 = vmatprep.mubr.bf16.mxu0 %v8181_v3  ;;  %9296 = vmatpush3.bf16.msra.mxu0 %v10785_v52  ;;  %v8180_v3 = vcombine.low %v12785_v57, %v12788_v58 }
 0x357   : > { %v8965_v50 = vpop.f32.mrf.mxu0  ;;  %10086 = vmatpush3.bf16.msra.mxu1 %v10789_v2  ;;  %9297 = vmatprep.subr.bf16.mxu0 %v10793_v26  ;;  %v8184_v2 = vcombine.high %v12809_v53, %v12812_v20  ;;  %v10799_v26 = vld [vmem:[%s11294_s11 + $0x548] sm:$0xff]  }
 0x358   : > { %v12817_v61 = vadd.f32 %v4051_v55, %v12583_v62  ;;  %v8966_v10 = vadd.f32 %v8965_v50, %v8964_v39  ;;  %v4058_v7 = vpop.f32.mrf.mxu1  ;;  %10087 = vmatprep.subr.bf16.mxu1 %v13705_v42  ;;  %v10803_v62 = vld [vmem:[%s11294_s11 + $0x5c8] sm:$0xff]   ;;  %v10807_v39 = vld [vmem:[%s11294_s11 + $0x580] sm:$0xff]  }
 0x359   : > { %v8967_v45 = vpop.f32.mrf.mxu0 }
 0x35a   : > { %v4056_v52 = vadd.f32 %v8966_v10, %v4055_v8  ;;  %v9900_v15 = vpop.f32.mrf.mxu1  ;;  %9298 = vmatpush3.bf16.msra.mxu0 %v10794_v28 }
 0x35b   : > { %v8968_v46 = vpop.f32.mrf.mxu0  ;;  %10088 = vmatpush3.bf16.msra.mxu1 %v10796_v1  ;;  %9299 = vmatprep.subr.bf16.mxu0 %v10798_v18  ;;  %v12833_v18 = vld [vmem:[#allocation2 + $0x108] sm:$0xff] }
 0x35c   : > { %v12828_v55 = vadd.f32 %v4056_v52, %v12594_v51  ;;  %v8969_v37 = vadd.f32 %v8968_v46, %v8967_v45  ;;  %v4063_v50 = vpop.f32.mrf.mxu1  ;;  %10030 = vmatmul.mubr.bf16.gmra.mxu1 %v10765_v12  ;;  %10089 = vmatprep.subr.bf16.mxu1 %v13705_v42  ;;  %v10808_v51 = vld [vmem:[%s11294_s11 + $0x540] sm:$0xff]   ;;  %v10816_v52 = vld [vmem:[%s11294_s11 + $0x678] sm:$0xff]  }
 0x35d   : > { %v8970_v8 = vpop.f32.mrf.mxu0  ;;  %5517 = vmatmul.mubr.bf16.gmra.mxu0 %v8180_v3  ;;  %10033 = vmatprep.mubr.msk.bf16.mxu1 %vm11119_vm0, %v13705_v42  ;;  %v12836_v45 = vld [vmem:[#allocation2 + $0x114] sm:$0xff] }
 0x35e   : > { %13748 = vst [vmem:[#allocation16_spill] sm:$0xff] %v12828_v55  ;;  %v4059_v28 = vadd.f32 %v8969_v37, %v4058_v7  ;;  %v9903_v1 = vpop.f32.mrf.mxu1  ;;  %5524 = vmatprep.mubr.bf16.mxu0 %v8184_v2  ;;  %9300 = vmatpush3.bf16.msra.mxu0 %v10799_v26  ;;  %v10809_v12 = vld [vmem:[%s11294_s11 + $0x5c0] sm:$0xff]   ;;  %v10769_v55 = vld [vmem:[#allocation2 + $0xf8] ss:$12 sps:$4 sm:$0xff]   ;;  %v8183_v2 = vcombine.low %v12809_v53, %v12812_v20 }
 0x35f   : > { %v8971_v10 = vpop.f32.mrf.mxu0  ;;  %10090 = vmatpush3.bf16.msra.mxu1 %v10803_v62  ;;  %9301 = vmatprep.subr.bf16.mxu0 %v10807_v39  ;;  %v8187_v62 = vcombine.high %v12833_v18, %v12836_v45 }
 0x360   : > { %v12841_v15 = vadd.f32 %v4059_v28, %v12603_v48  ;;  %v8972_v3 = vadd.f32 %v8971_v10, %v8970_v8  ;;  %v4066_v46 = vpop.f32.mrf.mxu1  ;;  %10091 = vmatprep.subr.bf16.mxu1 %v13705_v42 }
 0x361   : > { %v8973_v7 = vpop.f32.mrf.mxu0 }
 0x362   : > { %v4064_v26 = vadd.f32 %v8972_v3, %v4063_v50  ;;  %v9904_v37 = vpop.f32.mrf.mxu1  ;;  %9302 = vmatpush3.bf16.msra.mxu0 %v10808_v51  ;;  %v12854_v3 = vld [vmem:[#allocation2 + $0x120] sm:$0xff] }
 0x363   : > { %v8974_v39 = vpop.f32.mrf.mxu0  ;;  %10092 = vmatpush3.bf16.msra.mxu1 %v10809_v12  ;;  %9416 = vmatprep.subr.bf16.mxu0 %v10816_v52  ;;  %v12856_v12 = vld [vmem:[#allocation2 + $0x12c] sm:$0xff] }
 0x364   : > { %v12849_v48 = vadd.f32 %v4064_v26, %v12611_v23  ;;  %v8975_v8 = vadd.f32 %v8974_v39, %v8973_v7  ;;  %v4071_v28 = vpop.f32.mrf.mxu1  ;;  %10034 = vmatmul.mubr.bf16.gmra.mxu1 %v10769_v55  ;;  %10153 = vmatprep.subr.bf16.mxu1 %v13705_v42  ;;  %v10774_v7 = vld [vmem:[#allocation2 + $0x110] ss:$12 sps:$4 sm:$0xff]  }
 0x365   : > { %v8976_v1 = vpop.f32.mrf.mxu0  ;;  %5525 = vmatmul.mubr.bf16.gmra.mxu0 %v8183_v2  ;;  %10037 = vmatprep.mubr.msk.bf16.mxu1 %vm11119_vm0, %v13705_v42  ;;  %v8186_v2 = vcombine.low %v12833_v18, %v12836_v45 }
 0x366   : > { %13749 = vst [vmem:[#allocation15_spill] sm:$0xff] %v12849_v48  ;;  %v4067_v50 = vadd.f32 %v8975_v8, %v4066_v46  ;;  %v9907_v10 = vpop.f32.mrf.mxu1  ;;  %5532 = vmatprep.mubr.bf16.mxu0 %v8187_v62  ;;  %v8190_v46 = vcombine.high %v12854_v3, %v12856_v12 }
 0x367   : > { %v8977_v51 = vpop.f32.mrf.mxu0 }
 0x368   : > { %v12859_v23 = vadd.f32 %v4067_v50, %v12617_v14  ;;  %v8978_v52 = vadd.f32 %v8977_v51, %v8976_v1  ;;  %v4074_v55 = vpop.f32.mrf.mxu1  ;;  %v12870_v51 = vld [vmem:[#allocation2 + $0x138] sm:$0xff] }
 0x369   : > { %v8979_v26 = vpop.f32.mrf.mxu0 }
 0x36a   : > { %13750 = vst [vmem:[#allocation12_spill] sm:$0xff] %v12859_v23  ;;  %v4072_v37 = vadd.f32 %v8978_v52, %v4071_v28  ;;  %v9908_v39 = vpop.f32.mrf.mxu1  ;;  %v12872_v52 = vld [vmem:[#allocation2 + $0x144] sm:$0xff] }
 0x36b   : > { %v8980_v62 = vpop.f32.mrf.mxu0 }
 0x36c   : > { %v12866_v8 = vadd.f32 %v4072_v37, %v12624_v59  ;;  %v8981_v10 = vadd.f32 %v8980_v62, %v8979_v26  ;;  %v4079_v48 = vpop.f32.mrf.mxu1  ;;  %10038 = vmatmul.mubr.bf16.gmra.mxu1 %v10774_v7  ;;  %v10779_v37 = vld [vmem:[#allocation2 + $0x128] ss:$12 sps:$4 sm:$0xff]  }
 0x36d   : > { %v8982_v14 = vpop.f32.mrf.mxu0  ;;  %5533 = vmatmul.mubr.bf16.gmra.mxu0 %v8186_v2  ;;  %10041 = vmatprep.mubr.msk.bf16.mxu1 %vm11119_vm0, %v13705_v42  ;;  %v8189_v2 = vcombine.low %v12854_v3, %v12856_v12 }
 0x36e   : > { %13751 = vst [vmem:[#allocation13_spill] sm:$0xff] %v12866_v8  ;;  %v4075_v1 = vadd.f32 %v8981_v10, %v4074_v55  ;;  %v9911_v50 = vpop.f32.mrf.mxu1  ;;  %5540 = vmatprep.mubr.bf16.mxu0 %v8190_v46  ;;  %v8193_v55 = vcombine.high %v12870_v51, %v12872_v52 }
 0x36f   : > { %v8983_v28 = vpop.f32.mrf.mxu0 }
 0x370   : > { %v12875_v39 = vadd.f32 %v4075_v1, %v12629_v6  ;;  %v8984_v59 = vadd.f32 %v8983_v28, %v8982_v14  ;;  %v4082_v26 = vpop.f32.mrf.mxu1  ;;  %v12888_v28 = vld [vmem:[#allocation2 + $0x15c] sm:$0xff] }
 0x371   : > { %v8985_v7 = vpop.f32.mrf.mxu0 }
 0x372   : > { %13752 = vst [vmem:[#allocation14_spill] sm:$0xff] %v12875_v39  ;;  %v4080_v62 = vadd.f32 %v8984_v59, %v4079_v48  ;;  %v9912_v8 = vpop.f32.mrf.mxu1 }
 0x373   : > { %v8986_v46 = vpop.f32.mrf.mxu0  ;;  %v12886_v8 = vld [vmem:[#allocation2 + $0x150] sm:$0xff] }
 0x374   : > { %v12882_v10 = vadd.f32 %v4080_v62, %v12636_v22  ;;  %v8987_v50 = vadd.f32 %v8986_v46, %v8985_v7  ;;  %v4087_v23 = vpop.f32.mrf.mxu1  ;;  %10042 = vmatmul.mubr.bf16.gmra.mxu1 %v10779_v37  ;;  %v10783_v62 = vld [vmem:[#allocation2 + $0x140] ss:$12 sps:$4 sm:$0xff]  }
 0x375   : > { %v8988_v6 = vpop.f32.mrf.mxu0  ;;  %5541 = vmatmul.mubr.bf16.gmra.mxu0 %v8189_v2  ;;  %10045 = vmatprep.mubr.msk.bf16.mxu1 %vm11119_vm0, %v13705_v42  ;;  %v8192_v2 = vcombine.low %v12870_v51, %v12872_v52 }
 0x376   : > { %13753 = vst [vmem:[#allocation17_spill] sm:$0xff] %v12882_v10  ;;  %v4083_v14 = vadd.f32 %v8987_v50, %v4082_v26  ;;  %v9915_v1 = vpop.f32.mrf.mxu1  ;;  %5548 = vmatprep.mubr.bf16.mxu0 %v8193_v55  ;;  %v8196_v26 = vcombine.high %v12886_v8, %v12888_v28 }
 0x377   : > { %v8989_v48 = vpop.f32.mrf.mxu0 }
 0x378   : > { %v12891_v59 = vadd.f32 %v4083_v14, %v12641_v43  ;;  %v8990_v22 = vadd.f32 %v8989_v48, %v8988_v6  ;;  %v4090_v7 = vpop.f32.mrf.mxu1  ;;  %v12904_v48 = vld [vmem:[#allocation2 + $0x174] sm:$0xff] }
 0x379   : > { %v8991_v37 = vpop.f32.mrf.mxu0 }
 0x37a   : > { %13754 = vst [vmem:[#allocation18_spill] sm:$0xff] %v12891_v59  ;;  %v4088_v46 = vadd.f32 %v8990_v22, %v4087_v23  ;;  %v9916_v10 = vpop.f32.mrf.mxu1 }
 0x37b   : > { %v8992_v55 = vpop.f32.mrf.mxu0  ;;  %v12902_v10 = vld [vmem:[#allocation2 + $0x168] sm:$0xff] }
 0x37c   : > { %v12898_v50 = vadd.f32 %v4088_v46, %v12648_v41  ;;  %v8993_v1 = vadd.f32 %v8992_v55, %v8991_v37  ;;  %v4095_v39 = vpop.f32.mrf.mxu1  ;;  %10046 = vmatmul.mubr.bf16.gmra.mxu1 %v10783_v62  ;;  %v10788_v46 = vld [vmem:[#allocation2 + $0x158] ss:$12 sps:$4 sm:$0xff]  }
 0x37d   : > { %v8994_v43 = vpop.f32.mrf.mxu0  ;;  %5549 = vmatmul.mubr.bf16.gmra.mxu0 %v8192_v2  ;;  %10049 = vmatprep.mubr.msk.bf16.mxu1 %vm11119_vm0, %v13705_v42  ;;  %v8195_v2 = vcombine.low %v12886_v8, %v12888_v28 }
 0x37e   : > { %13755 = vst [vmem:[#allocation19_spill] sm:$0xff] %v12898_v50  ;;  %v4091_v6 = vadd.f32 %v8993_v1, %v4090_v7  ;;  %v9919_v14 = vpop.f32.mrf.mxu1  ;;  %5556 = vmatprep.mubr.bf16.mxu0 %v8196_v26  ;;  %v8199_v7 = vcombine.high %v12902_v10, %v12904_v48 }
 0x37f   : > { %v8995_v23 = vpop.f32.mrf.mxu0 }
 0x380   : > { %v12907_v22 = vadd.f32 %v4091_v6, %v12653_v17  ;;  %v8996_v41 = vadd.f32 %v8995_v23, %v8994_v43  ;;  %v4098_v37 = vpop.f32.mrf.mxu1 }
 0x381   : > { %v8997_v62 = vpop.f32.mrf.mxu0 }
 0x382   : > { %13756 = vst [vmem:[#allocation20_spill] sm:$0xff] %v12907_v22  ;;  %v4096_v55 = vadd.f32 %v8996_v41, %v4095_v39  ;;  %v9920_v50 = vpop.f32.mrf.mxu1  ;;  %v10792_v22 = vld [vmem:[#allocation2 + $0x170] ss:$12 sps:$4 sm:$0xff]  }
 0x383   : > { %v8998_v26 = vpop.f32.mrf.mxu0 }
 0x384   : > { %v12914_v1 = vadd.f32 %v4096_v55, %v12660_v44  ;;  %v8999_v14 = vadd.f32 %v8998_v26, %v8997_v62  ;;  %v4103_v59 = vpop.f32.mrf.mxu1  ;;  %10050 = vmatmul.mubr.bf16.gmra.mxu1 %v10788_v46  ;;  %v8198_v62 = vcombine.low %v12902_v10, %v12904_v48 }
 0x385   : > { %v9000_v17 = vpop.f32.mrf.mxu0  ;;  %5557 = vmatmul.mubr.bf16.gmra.mxu0 %v8195_v2  ;;  %10053 = vmatprep.mubr.msk.bf16.mxu1 %vm11119_vm0, %v13705_v42 }
 0x386   : > { %v4099_v43 = vadd.f32 %v8999_v14, %v4098_v37  ;;  %v9923_v6 = vpop.f32.mrf.mxu1  ;;  %5564 = vmatprep.mubr.bf16.mxu0 %v8199_v7 }
 0x387   : > { %v9001_v39 = vpop.f32.mrf.mxu0 }
 0x388   : > { %v12919_v50 = vadd.f32 %v4099_v43, %v12665_v56  ;;  %v9002_v23 = vadd.f32 %v9001_v39, %v9000_v17  ;;  %v4106_v41 = vpop.f32.mrf.mxu1 }
 0x389   : > { %v9003_v44 = vpop.f32.mrf.mxu0 }
 0x38a   : > { %v4104_v46 = vadd.f32 %v9002_v23, %v4103_v59  ;;  %v9924_v55 = vpop.f32.mrf.mxu1 }
 0x38b   : > { %v9004_v2 = vpop.f32.mrf.mxu0 }
 0x38c   : > { %v12924_v26 = vadd.f32 %v4104_v46, %v12672_v29  ;;  %v9005_v37 = vadd.f32 %v9004_v2, %v9003_v44  ;;  %v4819_v14 = vpop.f32.mrf.mxu1  ;;  %10054 = vmatmul.mubr.bf16.gmra.mxu1 %v10792_v22  ;;  %v10795_v29 = vld [vmem:[#allocation2 + $0x188] ss:$12 sps:$4 sm:$0xff]  }
 0x38d   : > { %v9045_v7 = vpop.f32.mrf.mxu0  ;;  %5565 = vmatmul.mubr.bf16.gmra.mxu0 %v8198_v62  ;;  %10057 = vmatprep.mubr.msk.bf16.mxu1 %vm11119_vm0, %v13705_v42 }
 0x38e   : > { %v4107_v56 = vadd.f32 %v9005_v37, %v4106_v41  ;;  %v9943_v17 = vpop.f32.mrf.mxu1  ;;  %5572 = vmatprep.mubr.bf16.mxu0 %v12693_v5 }
 0x38f   : > { %v9046_v43 = vpop.f32.mrf.mxu0  ;;  %v10797_v17 = vld [vmem:[#allocation2 + $0x1a0] ss:$12 sps:$4 sm:$0xff]  }
 0x390   : > { %v12930_v59 = vadd.f32 %v4107_v56, %v12677_v16  ;;  %v9047_v6 = vadd.f32 %v9046_v43, %v9045_v7  ;;  %v4822_v39 = vpop.f32.mrf.mxu1 }
 0x391   : > { %v9048_v23 = vpop.f32.mrf.mxu0 }
 0x392   : > { %v4820_v44 = vadd.f32 %v9047_v6, %v4819_v14  ;;  %v9944_v46 = vpop.f32.mrf.mxu1  ;;  %v12939_v14 = vld [vmem:[#allocation2 + $0x1b0] sm:$0xff] }
 0x393   : > { %v9049_v22 = vpop.f32.mrf.mxu0 }
 0x394   : > { %v12933_v62 = vadd.f32 %v4820_v44, %v12684_v49  ;;  %v9050_v55 = vadd.f32 %v9049_v22, %v9048_v23  ;;  %v4827_v2 = vpop.f32.mrf.mxu1  ;;  %10058 = vmatmul.mubr.bf16.gmra.mxu1 %v10795_v29 }
 0x395   : > { %v9051_v41 = vpop.f32.mrf.mxu0  ;;  %5573 = vmatmul.mubr.bf16.gmra.mxu0 %v12704_v60  ;;  %10061 = vmatprep.mubr.msk.bf16.mxu1 %vm11119_vm0, %v13705_v42  ;;  %v8208_v60 = vcombine.high %v12939_v14, %v12715_v4 }
 0x396   : > { %v4823_v16 = vadd.f32 %v9050_v55, %v4822_v39  ;;  %v9947_v5 = vpop.f32.mrf.mxu1  ;;  %5580 = vmatprep.mubr.bf16.mxu0 %v12706_v54 }
 0x397   : > { %v9052_v37 = vpop.f32.mrf.mxu0 }
 0x398   : > { %v12942_v7 = vadd.f32 %v4823_v16, %v12689_v63  ;;  %v9053_v49 = vadd.f32 %v9052_v37, %v9051_v41  ;;  %v4830_v56 = vpop.f32.mrf.mxu1  ;;  %v12954_v41 = vld [vmem:[#allocation2 + $0x1d4] sm:$0xff] }
 0x399   : > { %v9054_v43 = vpop.f32.mrf.mxu0  ;;  %v10802_v37 = vld [vmem:[#allocation2 + $0x1b8] ss:$12 sps:$4 sm:$0xff]  }
 0x39a   : > { %v4828_v6 = vadd.f32 %v9053_v49, %v4827_v2  ;;  %v9948_v29 = vpop.f32.mrf.mxu1  ;;  %v12952_v2 = vld [vmem:[#allocation2 + $0x1c8] sm:$0xff] }
 0x39b   : > { %v9055_v23 = vpop.f32.mrf.mxu0 }
 0x39c   : > { %v12947_v39 = vadd.f32 %v4828_v6, %v12696_v13  ;;  %v9056_v54 = vadd.f32 %v9055_v23, %v9054_v43  ;;  %v4835_v44 = vpop.f32.mrf.mxu1  ;;  %10062 = vmatmul.mubr.bf16.gmra.mxu1 %v10797_v17 }
 0x39d   : > { %v9057_v46 = vpop.f32.mrf.mxu0  ;;  %5581 = vmatmul.mubr.bf16.gmra.mxu0 %v12720_v32  ;;  %10065 = vmatprep.mubr.msk.bf16.mxu1 %vm11119_vm0, %v13705_v42  ;;  %v8207_v32 = vcombine.low %v12939_v14, %v12715_v4 }
 0x39e   : > { %v4831_v63 = vadd.f32 %v9056_v54, %v4830_v56  ;;  %v9951_v22 = vpop.f32.mrf.mxu1  ;;  %5588 = vmatprep.mubr.bf16.mxu0 %v8208_v60  ;;  %v8211_v56 = vcombine.high %v12952_v2, %v12954_v41 }
 0x39f   : > { %v9058_v55 = vpop.f32.mrf.mxu0 }
 0x3a0   : > { %v12957_v13 = vadd.f32 %v4831_v63, %v12702_v9  ;;  %v9059_v16 = vadd.f32 %v9058_v55, %v9057_v46  ;;  %v4838_v5 = vpop.f32.mrf.mxu1  ;;  %v12970_v63 = vld [vmem:[#allocation2 + $0x1ec] sm:$0xff] }
 0x3a1   : > { %v9060_v49 = vpop.f32.mrf.mxu0 }
 0x3a2   : > { %v4836_v17 = vadd.f32 %v9059_v16, %v4835_v44  ;;  %v9952_v43 = vpop.f32.mrf.mxu1  ;;  %v12968_v44 = vld [vmem:[#allocation2 + $0x1e0] sm:$0xff]  ;;  %v10806_v16 = vld [vmem:[#allocation2 + $0x1d0] ss:$12 sps:$4 sm:$0xff]  }
 0x3a3   : > { %v9061_v6 = vpop.f32.mrf.mxu0 }
 0x3a4   : > { %v12964_v29 = vadd.f32 %v4836_v17, %v12709_v47  ;;  %v9062_v60 = vadd.f32 %v9061_v6, %v9060_v49  ;;  %v4843_v23 = vpop.f32.mrf.mxu1  ;;  %10066 = vmatmul.mubr.bf16.gmra.mxu1 %v10802_v37  ;;  %v8210_v49 = vcombine.low %v12952_v2, %v12954_v41 }
 0x3a5   : > { %v9063_v9 = vpop.f32.mrf.mxu0  ;;  %5589 = vmatmul.mubr.bf16.gmra.mxu0 %v8207_v32  ;;  %10069 = vmatprep.mubr.msk.bf16.mxu1 %vm11119_vm0, %v13705_v42 }
 0x3a6   : > { %v4839_v54 = vadd.f32 %v9062_v60, %v4838_v5  ;;  %v9955_v46 = vpop.f32.mrf.mxu1  ;;  %5596 = vmatprep.mubr.bf16.mxu0 %v8211_v56  ;;  %v8214_v5 = vcombine.high %v12968_v44, %v12970_v63 }
 0x3a7   : > { %v9064_v4 = vpop.f32.mrf.mxu0 }
 0x3a8   : > { %v12973_v22 = vadd.f32 %v4839_v54, %v12718_v40  ;;  %v9065_v47 = vadd.f32 %v9064_v4, %v9063_v9  ;;  %v4846_v55 = vpop.f32.mrf.mxu1 }
 0x3a9   : > { %v9066_v37 = vpop.f32.mrf.mxu0 }
 0x3aa   : > { %v4844_v32 = vadd.f32 %v9065_v47, %v4843_v23  ;;  %v9956_v17 = vpop.f32.mrf.mxu1 }
 0x3ab   : > { %v9067_v43 = vpop.f32.mrf.mxu0  ;;  %v10812_v17 = vld [vmem:[#allocation2 + $0x1e8] ss:$12 sps:$4 sm:$0xff]  }
 0x3ac   : > { %v12980_v56 = vadd.f32 %v4844_v32, %v12725_v24  ;;  %v9068_v6 = vadd.f32 %v9067_v43, %v9066_v37  ;;  %v4851_v60 = vpop.f32.mrf.mxu1  ;;  %10070 = vmatmul.mubr.bf16.gmra.mxu1 %v10806_v16  ;;  %v8213_v37 = vcombine.low %v12968_v44, %v12970_v63 }
 0x3ad   : > { %v9069_v40 = vpop.f32.mrf.mxu0  ;;  %5597 = vmatmul.mubr.bf16.gmra.mxu0 %v8210_v49  ;;  %10073 = vmatprep.mubr.msk.bf16.mxu1 %vm11119_vm0, %v13705_v42  ;;  %v8241_v49 = vcombine.high %v12730_v31, %v12746_v25 }
 0x3ae   : > { %v4847_v9 = vadd.f32 %v9068_v6, %v4846_v55  ;;  %v9959_v54 = vpop.f32.mrf.mxu1  ;;  %5604 = vmatprep.mubr.bf16.mxu0 %v8214_v5 }
 0x3af   : > { %v9070_v23 = vpop.f32.mrf.mxu0 }
 0x3b0   : > { %v12985_v46 = vadd.f32 %v4847_v9, %v12733_v30  ;;  %v9071_v4 = vadd.f32 %v9070_v23, %v9069_v40  ;;  %v4854_v47 = vpop.f32.mrf.mxu1 }
 0x3b1   : > { %v9072_v24 = vpop.f32.mrf.mxu0 }
 0x3b2   : > { %v4852_v16 = vadd.f32 %v9071_v4, %v4851_v60  ;;  %v9960_v32 = vpop.f32.mrf.mxu1  ;;  %v10815_v4 = vld [vmem:[#allocation2 + $0xa4] ss:$12 sps:$4 sm:$0xff]  }
 0x3b3   : > { %v9073_v43 = vpop.f32.mrf.mxu0 }
 0x3b4   : > { %v12992_v55 = vadd.f32 %v4852_v16, %v12739_v27  ;;  %v9074_v5 = vadd.f32 %v9073_v43, %v9072_v24  ;;  %v4859_v30 = vpop.f32.mrf.mxu1  ;;  %10074 = vmatmul.mubr.bf16.gmra.mxu1 %v10812_v17  ;;  %v8240_v17 = vcombine.low %v12730_v31, %v12746_v25  ;;  %v10817_v43 = vld [vmem:[%s11294_s11 + $0x638] sm:$0xff]   ;;  %v10827_v31 = vld [vmem:[%s11294_s11 + $0x6b0] sm:$0xff]  }
 0x3b5   : > { %v9075_v6 = vpop.f32.mrf.mxu0  ;;  %5605 = vmatmul.mubr.bf16.gmra.mxu0 %v8213_v37  ;;  %10093 = vmatprep.mubr.msk.bf16.mxu1 %vm11119_vm0, %v13705_v42  ;;  %v10818_v37 = vld [vmem:[%s11294_s11 + $0x6b8] sm:$0xff]  }
 0x3b6   : > { %v4855_v40 = vadd.f32 %v9074_v5, %v4854_v47  ;;  %v9963_v60 = vpop.f32.mrf.mxu1  ;;  %6320 = vmatprep.mubr.bf16.mxu0 %v8241_v49  ;;  %v8244_v49 = vcombine.high %v12748_v33, %v12763_v38  ;;  %v10825_v5 = vld [vmem:[%s11294_s11 + $0x670] sm:$0xff]  }
 0x3b7   : > { %v9076_v9 = vpop.f32.mrf.mxu0 }
 0x3b8   : > { %v12997_v54 = vadd.f32 %v4855_v40, %v12744_v11  ;;  %v9077_v27 = vadd.f32 %v9076_v9, %v9075_v6  ;;  %v4862_v23 = vpop.f32.mrf.mxu1  ;;  %v10826_v9 = vld [vmem:[%s11294_s11 + $0x630] sm:$0xff]  }
 0x3b9   : > { %v9078_v24 = vpop.f32.mrf.mxu0 }
 0x3ba   : > { %v4860_v16 = vadd.f32 %v9077_v27, %v4859_v30  ;;  %v9964_v32 = vpop.f32.mrf.mxu1 }
 0x3bb   : > { %v9079_v47 = vpop.f32.mrf.mxu0 }
 0x3bc   : > { %v13007_v11 = vadd.f32 %v4860_v16, %v12757_v35  ;;  %v9080_v6 = vadd.f32 %v9079_v47, %v9078_v24  ;;  %v4867_v40 = vpop.f32.mrf.mxu1  ;;  %10094 = vmatmul.mubr.bf16.vlgmr.msra.gmra.mxu1 %v10815_v4  ;;  %v10831_v35 = vld [vmem:[%s11294_s11 + $0x668] sm:$0xff]   ;;  %v8243_v16 = vcombine.low %v12748_v33, %v12763_v38  ;;  %v8247_v47 = vcombine.high %v12765_v21, %v12785_v57 }
 0x3bd   : > { %v9081_v60 = vpop.f32.mrf.mxu0  ;;  %6321 = vmatmul.mubr.bf16.vlgmr.msra.gmra.mxu0 %v8240_v17  ;;  %10154 = vmatpush3.bf16.msra.mxu1 %v10818_v37  ;;  %v10821_v37 = vld [vmem:[#allocation2 + $0xbc] ss:$12 sps:$4 sm:$0xff]  }
 0x3be   : > { %v4863_v25 = vadd.f32 %v9080_v6, %v4862_v23  ;;  %v9967_v30 = vpop.f32.mrf.mxu1  ;;  %9417 = vmatpush3.bf16.msra.mxu0 %v10817_v43  ;;  %10097 = vmatprep.mubr.msk.bf16.mxu1 %vm11119_vm0, %v13705_v42  ;;  %v10840_v6 = vld [vmem:[%s11294_s11 + $0x660] sm:$0xff]  }
 0x3bf   : > { %v9082_v27 = vpop.f32.mrf.mxu0  ;;  %6328 = vmatprep.mubr.bf16.mxu0 %v8244_v49  ;;  %9418 = vmatprep.subr.bf16.mxu0 %v10825_v5  ;;  %v10836_v5 = vld [vmem:[%s11294_s11 + $0x6a8] sm:$0xff]   ;;  %v10841_v30 = vld [vmem:[%s11294_s11 + $0x620] sm:$0xff]  }
 0x3c0   : > { %v13015_v24 = vadd.f32 %v4863_v25, %v12769_v36  ;;  %v9083_v4 = vadd.f32 %v9082_v27, %v9081_v60  ;;  %v4870_v17 = vpop.f32.mrf.mxu1  ;;  %10155 = vmatprep.subr.bf16.mxu1 %v13705_v42  ;;  %v10835_v36 = vld [vmem:[%s11294_s11 + $0x628] sm:$0xff]   ;;  %v10849_v27 = vld [vmem:[%s11294_s11 + $0x658] sm:$0xff]  }
 0x3c1   : > { %v9084_v23 = vpop.f32.mrf.mxu0  ;;  %10156 = vmatpush3.bf16.msra.mxu1 %v10827_v31 }
 0x3c2   : > { %v4868_v32 = vadd.f32 %v9083_v4, %v4867_v40  ;;  %v9968_v43 = vpop.f32.mrf.mxu1  ;;  %9419 = vmatpush3.bf16.msra.mxu0 %v10826_v9  ;;  %10157 = vmatprep.subr.bf16.mxu1 %v13705_v42 }
 0x3c3   : > { %v9085_v49 = vpop.f32.mrf.mxu0  ;;  %9420 = vmatprep.subr.bf16.mxu0 %v10831_v35 }
 0x3c4   : > { %v13027_v60 = vadd.f32 %v4868_v32, %v12781_v19  ;;  %v9086_v33 = vadd.f32 %v9085_v49, %v9084_v23  ;;  %v4875_v38 = vpop.f32.mrf.mxu1  ;;  %10098 = vmatmul.mubr.bf16.gmra.mxu1 %v10821_v37  ;;  %v10845_v19 = vld [vmem:[%s11294_s11 + $0x6a0] sm:$0xff]  }
 0x3c5   : > { %v9087_v40 = vpop.f32.mrf.mxu0  ;;  %6329 = vmatmul.mubr.bf16.gmra.mxu0 %v8243_v16  ;;  %10101 = vmatprep.mubr.msk.bf16.mxu1 %vm11119_vm0, %v13705_v42  ;;  %v10824_v23 = vld [vmem:[#allocation2 + $0xd4] ss:$12 sps:$4 sm:$0xff]   ;;  %v8246_v16 = vcombine.low %v12765_v21, %v12785_v57 }
 0x3c6   : > { %v4871_v31 = vadd.f32 %v9086_v33, %v4870_v17  ;;  %v9971_v25 = vpop.f32.mrf.mxu1  ;;  %6336 = vmatprep.mubr.bf16.mxu0 %v8247_v47  ;;  %9421 = vmatpush3.bf16.msra.mxu0 %v10835_v36  ;;  %v8250_v47 = vcombine.high %v12788_v58, %v12809_v53  ;;  %v10850_v36 = vld [vmem:[%s11294_s11 + $0x618] sm:$0xff]  }
 0x3c7   : > { %v9088_v9 = vpop.f32.mrf.mxu0  ;;  %10158 = vmatpush3.bf16.msra.mxu1 %v10836_v5  ;;  %9422 = vmatprep.subr.bf16.mxu0 %v10840_v6  ;;  %v10858_v5 = vld [vmem:[%s11294_s11 + $0x650] sm:$0xff]  }
 0x3c8   : > { %v13035_v35 = vadd.f32 %v4871_v31, %v12793_v0  ;;  %v9089_v4 = vadd.f32 %v9088_v9, %v9087_v40  ;;  %v4878_v37 = vpop.f32.mrf.mxu1  ;;  %10159 = vmatprep.subr.bf16.mxu1 %v13705_v42  ;;  %v10854_v0 = vld [vmem:[%s11294_s11 + $0x698] sm:$0xff]   ;;  %v10859_v31 = vld [vmem:[%s11294_s11 + $0x610] sm:$0xff]  }
 0x3c9   : > { %v9090_v17 = vpop.f32.mrf.mxu0 }
 0x3ca   : > { %v4876_v32 = vadd.f32 %v9089_v4, %v4875_v38  ;;  %v9972_v43 = vpop.f32.mrf.mxu1  ;;  %9423 = vmatpush3.bf16.msra.mxu0 %v10841_v30  ;;  %v10867_v30 = vld [vmem:[%s11294_s11 + $0x648] sm:$0xff]  }
 0x3cb   : > { %v9091_v49 = vpop.f32.mrf.mxu0  ;;  %10160 = vmatpush3.bf16.msra.mxu1 %v10845_v19  ;;  %9424 = vmatprep.subr.bf16.mxu0 %v10849_v27  ;;  %v10830_v4 = vld [vmem:[#allocation2 + $0xec] ss:$12 sps:$4 sm:$0xff]  }
 0x3cc   : > { %v13046_v6 = vadd.f32 %v4876_v32, %v12804_v34  ;;  %v9092_v33 = vadd.f32 %v9091_v49, %v9090_v17  ;;  %v4883_v21 = vpop.f32.mrf.mxu1  ;;  %10102 = vmatmul.mubr.bf16.gmra.mxu1 %v10824_v23  ;;  %10161 = vmatprep.subr.bf16.mxu1 %v13705_v42  ;;  %v10863_v34 = vld [vmem:[%s11294_s11 + $0x690] sm:$0xff]   ;;  %v8249_v23 = vcombine.low %v12788_v58, %v12809_v53  ;;  %v10868_v43 = vld [vmem:[%s11294_s11 + $0x608] sm:$0xff]  }
 0x3cd   : > { %v9093_v57 = vpop.f32.mrf.mxu0  ;;  %6337 = vmatmul.mubr.bf16.gmra.mxu0 %v8246_v16  ;;  %10105 = vmatprep.mubr.msk.bf16.mxu1 %vm11119_vm0, %v13705_v42  ;;  %v8253_v32 = vcombine.high %v12812_v20, %v12833_v18  ;;  %v13757_v49 = vld [vmem:[#allocation16_spill] sm:$0xff] }
 0x3ce   : > { %v4879_v38 = vadd.f32 %v9092_v33, %v4878_v37  ;;  %v9975_v40 = vpop.f32.mrf.mxu1  ;;  %6344 = vmatprep.mubr.bf16.mxu0 %v8250_v47  ;;  %9425 = vmatpush3.bf16.msra.mxu0 %v10850_v36  ;;  %v10876_v36 = vld [vmem:[%s11294_s11 + $0x640] sm:$0xff]  }
 0x3cf   : > { %v9094_v25 = vpop.f32.mrf.mxu0  ;;  %10162 = vmatpush3.bf16.msra.mxu1 %v10854_v0  ;;  %9426 = vmatprep.subr.bf16.mxu0 %v10858_v5  ;;  %v10878_v40 = vld [vmem:[%s11294_s11 + $0x680] sm:$0xff]  }
 0x3d0   : > { %v13055_v9 = vadd.f32 %v4879_v38, %v12817_v61  ;;  %v9095_v19 = vadd.f32 %v9094_v25, %v9093_v57  ;;  %v4886_v27 = vpop.f32.mrf.mxu1  ;;  %10163 = vmatprep.subr.bf16.mxu1 %v13705_v42  ;;  %v10872_v61 = vld [vmem:[%s11294_s11 + $0x688] sm:$0xff]   ;;  %v10877_v57 = vld [vmem:[%s11294_s11 + $0x600] sm:$0xff]  }
 0x3d1   : > { %v9096_v37 = vpop.f32.mrf.mxu0 }
 0x3d2   : > { %v4884_v17 = vadd.f32 %v9095_v19, %v4883_v21  ;;  %v9976_v16 = vpop.f32.mrf.mxu1  ;;  %9427 = vmatpush3.bf16.msra.mxu0 %v10859_v31 }
 0x3d3   : > { %v9097_v47 = vpop.f32.mrf.mxu0  ;;  %10164 = vmatpush3.bf16.msra.mxu1 %v10863_v34  ;;  %9428 = vmatprep.subr.bf16.mxu0 %v10867_v30  ;;  %v10834_v30 = vld [vmem:[#allocation2 + $0x104] ss:$12 sps:$4 sm:$0xff]  }
 0x3d4   : > { %v13066_v0 = vadd.f32 %v4884_v17, %v13757_v49  ;;  %v9098_v5 = vadd.f32 %v9097_v47, %v9096_v37  ;;  %v4891_v33 = vpop.f32.mrf.mxu1  ;;  %10106 = vmatmul.mubr.bf16.gmra.mxu1 %v10830_v4  ;;  %10165 = vmatprep.subr.bf16.mxu1 %v13705_v42  ;;  %v13758_v16 = vld [vmem:[#allocation15_spill] sm:$0xff] }
 0x3d5   : > { %v9099_v58 = vpop.f32.mrf.mxu0  ;;  %6345 = vmatmul.mubr.bf16.gmra.mxu0 %v8249_v23  ;;  %10109 = vmatprep.mubr.msk.bf16.mxu1 %vm11119_vm0, %v13705_v42  ;;  %v8256_v23 = vcombine.high %v12836_v45, %v12854_v3 }
 0x3d6   : > { %v4887_v53 = vadd.f32 %v9098_v5, %v4886_v27  ;;  %v9979_v21 = vpop.f32.mrf.mxu1  ;;  %6352 = vmatprep.mubr.bf16.mxu0 %v8253_v32  ;;  %9429 = vmatpush3.bf16.msra.mxu0 %v10868_v43  ;;  %v8252_v27 = vcombine.low %v12812_v20, %v12833_v18 }
 0x3d7   : > { %v9100_v38 = vpop.f32.mrf.mxu0  ;;  %10166 = vmatpush3.bf16.msra.mxu1 %v10872_v61  ;;  %9430 = vmatprep.subr.bf16.mxu0 %v10876_v36  ;;  %v13759_v36 = vld [vmem:[#allocation12_spill] sm:$0xff]  ;;  %v8255_v21 = vcombine.low %v12836_v45, %v12854_v3  ;;  %v13761_v3 = vld [vmem:[#allocation14_spill] sm:$0xff] }
 0x3d8   : > { %v13074_v31 = vadd.f32 %v4887_v53, %v12841_v15  ;;  %v9101_v25 = vadd.f32 %v9100_v38, %v9099_v58  ;;  %v4894_v34 = vpop.f32.mrf.mxu1  ;;  %10167 = vmatprep.subr.bf16.mxu1 %v13705_v42  ;;  %v10839_v58 = vld [vmem:[#allocation2 + $0x11c] ss:$12 sps:$4 sm:$0xff]  }
 0x3d9   : > { %v9102_v19 = vpop.f32.mrf.mxu0 }
 0x3da   : > { %v4892_v4 = vadd.f32 %v9101_v25, %v4891_v33  ;;  %v9980_v37 = vpop.f32.mrf.mxu1  ;;  %9431 = vmatpush3.bf16.msra.mxu0 %v10877_v57 }
 0x3db   : > { %v9103_v17 = vpop.f32.mrf.mxu0  ;;  %10168 = vmatpush3.bf16.msra.mxu1 %v10878_v40  ;;  %v8259_v40 = vcombine.high %v12856_v12, %v12870_v51 }
 0x3dc   : > { %v13082_v15 = vadd.f32 %v4892_v4, %v13758_v16  ;;  %v9104_v32 = vadd.f32 %v9103_v17, %v9102_v19  ;;  %v4899_v43 = vpop.f32.mrf.mxu1  ;;  %10110 = vmatmul.mubr.bf16.gmra.mxu1 %v10834_v30 }
 0x3dd   : > { %v9105_v47 = vpop.f32.mrf.mxu0  ;;  %6353 = vmatmul.mubr.bf16.gmra.mxu0 %v8252_v27  ;;  %10113 = vmatprep.mubr.msk.bf16.mxu1 %vm11119_vm0, %v13705_v42 }
 0x3de   : > { %v4895_v20 = vadd.f32 %v9104_v32, %v4894_v34  ;;  %v9983_v18 = vpop.f32.mrf.mxu1  ;;  %6360 = vmatprep.mubr.bf16.mxu0 %v8256_v23  ;;  %v13760_v34 = vld [vmem:[#allocation13_spill] sm:$0xff] }
 0x3df   : > { %v9106_v61 = vpop.f32.mrf.mxu0 }
 0x3e0   : > { %v13087_v49 = vadd.f32 %v4895_v20, %v13759_v36  ;;  %v9107_v5 = vadd.f32 %v9106_v61, %v9105_v47  ;;  %v4902_v33 = vpop.f32.mrf.mxu1  ;;  %v8258_v20 = vcombine.low %v12856_v12, %v12870_v51  ;;  %v8262_v36 = vcombine.high %v12872_v52, %v12886_v8  ;;  %v13763_v51 = vld [vmem:[#allocation18_spill] sm:$0xff] }
 0x3e1   : > { %v9108_v53 = vpop.f32.mrf.mxu0 }
 0x3e2   : > { %v4900_v57 = vadd.f32 %v9107_v5, %v4899_v43  ;;  %v9984_v38 = vpop.f32.mrf.mxu1  ;;  %v10844_v43 = vld [vmem:[#allocation2 + $0x134] ss:$12 sps:$4 sm:$0xff]  }
 0x3e3   : > { %v9109_v25 = vpop.f32.mrf.mxu0 }
 0x3e4   : > { %v13094_v30 = vadd.f32 %v4900_v57, %v13760_v34  ;;  %v9110_v19 = vadd.f32 %v9109_v25, %v9108_v53  ;;  %v4907_v27 = vpop.f32.mrf.mxu1  ;;  %10114 = vmatmul.mubr.bf16.gmra.mxu1 %v10839_v58 }
 0x3e5   : > { %v9111_v4 = vpop.f32.mrf.mxu0  ;;  %6361 = vmatmul.mubr.bf16.gmra.mxu0 %v8255_v21  ;;  %10117 = vmatprep.mubr.msk.bf16.mxu1 %vm11119_vm0, %v13705_v42 }
 0x3e6   : > { %v4903_v37 = vadd.f32 %v9110_v19, %v4902_v33  ;;  %v9987_v23 = vpop.f32.mrf.mxu1  ;;  %6368 = vmatprep.mubr.bf16.mxu0 %v8259_v40  ;;  %v13762_v33 = vld [vmem:[#allocation17_spill] sm:$0xff] }
 0x3e7   : > { %v9112_v45 = vpop.f32.mrf.mxu0 }
 0x3e8   : > { %v13099_v17 = vadd.f32 %v4903_v37, %v13761_v3  ;;  %v9113_v16 = vadd.f32 %v9112_v45, %v9111_v4  ;;  %v4910_v32 = vpop.f32.mrf.mxu1  ;;  %v8261_v37 = vcombine.low %v12872_v52, %v12886_v8  ;;  %v8265_v3 = vcombine.high %v12888_v28, %v12902_v10  ;;  %v13122_v8 = vld [vmem:[#allocation2 + $0x180] sm:$0xff] }
 0x3e9   : > { %v9114_v47 = vpop.f32.mrf.mxu0 }
 0x3ea   : > { %v4908_v18 = vadd.f32 %v9113_v16, %v4907_v27  ;;  %v9988_v61 = vpop.f32.mrf.mxu1  ;;  %v10848_v27 = vld [vmem:[#allocation2 + $0x14c] ss:$12 sps:$4 sm:$0xff]  }
 0x3eb   : > { %v9115_v5 = vpop.f32.mrf.mxu0 }
 0x3ec   : > { %v13106_v58 = vadd.f32 %v4908_v18, %v13762_v33  ;;  %v9116_v53 = vadd.f32 %v9115_v5, %v9114_v47  ;;  %v4915_v21 = vpop.f32.mrf.mxu1  ;;  %10118 = vmatmul.mubr.bf16.gmra.mxu1 %v10844_v43  ;;  %v13765_v5 = vld [vmem:[#allocation20_spill] sm:$0xff] }
 0x3ed   : > { %v9117_v57 = vpop.f32.mrf.mxu0  ;;  %6369 = vmatmul.mubr.bf16.gmra.mxu0 %v8258_v20  ;;  %10121 = vmatprep.mubr.msk.bf16.mxu1 %vm11119_vm0, %v13705_v42 }
 0x3ee   : > { %v4911_v38 = vadd.f32 %v9116_v53, %v4910_v32  ;;  %v9991_v40 = vpop.f32.mrf.mxu1  ;;  %6376 = vmatprep.mubr.bf16.mxu0 %v8262_v36  ;;  %v13764_v32 = vld [vmem:[#allocation19_spill] sm:$0xff] }
 0x3ef   : > { %v9118_v12 = vpop.f32.mrf.mxu0  ;;  %v8264_v40 = vcombine.low %v12888_v28, %v12902_v10  ;;  %v13136_v10 = vld [vmem:[#allocation2 + $0x18c] sm:$0xff] }
 0x3f0   : > { %v13111_v25 = vadd.f32 %v4911_v38, %v13763_v51  ;;  %v9119_v34 = vadd.f32 %v9118_v12, %v9117_v57  ;;  %v4918_v19 = vpop.f32.mrf.mxu1  ;;  %v10853_v57 = vld [vmem:[#allocation2 + $0x164] ss:$12 sps:$4 sm:$0xff]  }
 0x3f1   : > { %v9120_v4 = vpop.f32.mrf.mxu0 }
 0x3f2   : > { %v4916_v23 = vadd.f32 %v9119_v34, %v4915_v21  ;;  %v9992_v45 = vpop.f32.mrf.mxu1  ;;  %v8268_v34 = vcombine.high %v12904_v48, %v13122_v8 }
 0x3f3   : > { %v9121_v16 = vpop.f32.mrf.mxu0 }
 0x3f4   : > { %v13118_v43 = vadd.f32 %v4916_v23, %v13764_v32  ;;  %v9122_v47 = vadd.f32 %v9121_v16, %v9120_v4  ;;  %v4923_v20 = vpop.f32.mrf.mxu1  ;;  %10122 = vmatmul.mubr.bf16.gmra.mxu1 %v10848_v27  ;;  %v13138_v16 = vld [vmem:[#allocation2 + $0x198] sm:$0xff] }
 0x3f5   : > { %v9123_v18 = vpop.f32.mrf.mxu0  ;;  %6377 = vmatmul.mubr.bf16.gmra.mxu0 %v8261_v37  ;;  %10125 = vmatprep.mubr.msk.bf16.mxu1 %vm11119_vm0, %v13705_v42 }
 0x3f6   : > { %v4919_v61 = vadd.f32 %v9122_v47, %v4918_v19  ;;  %v9995_v36 = vpop.f32.mrf.mxu1  ;;  %6384 = vmatprep.mubr.bf16.mxu0 %v8265_v3 }
 0x3f7   : > { %v9124_v52 = vpop.f32.mrf.mxu0 }
 0x3f8   : > { %v13125_v33 = vadd.f32 %v4919_v61, %v13765_v5  ;;  %v9125_v53 = vadd.f32 %v9124_v52, %v9123_v18  ;;  %v4926_v21 = vpop.f32.mrf.mxu1  ;;  %v8267_v61 = vcombine.low %v12904_v48, %v13122_v8  ;;  %v8271_v5 = vcombine.high %v13136_v10, %v13138_v16 }
 0x3f9   : > { %v9126_v38 = vpop.f32.mrf.mxu0 }
 0x3fa   : > { %v4924_v12 = vadd.f32 %v9125_v53, %v4923_v20  ;;  %v9996_v51 = vpop.f32.mrf.mxu1  ;;  %v10857_v20 = vld [vmem:[#allocation2 + $0x17c] ss:$12 sps:$4 sm:$0xff]  }
 0x3fb   : > { %v9127_v19 = vpop.f32.mrf.mxu0  ;;  %v13152_v51 = vld [vmem:[#allocation2 + $0x1a4] sm:$0xff] }
 0x3fc   : > { %v13132_v27 = vadd.f32 %v4924_v12, %v12914_v1  ;;  %v9128_v4 = vadd.f32 %v9127_v19, %v9126_v38  ;;  %v4931_v37 = vpop.f32.mrf.mxu1  ;;  %10126 = vmatmul.mubr.bf16.gmra.mxu1 %v10853_v57 }
 0x3fd   : > { %v9129_v23 = vpop.f32.mrf.mxu0  ;;  %6385 = vmatmul.mubr.bf16.gmra.mxu0 %v8264_v40  ;;  %10129 = vmatprep.mubr.msk.bf16.mxu1 %vm11119_vm0, %v13705_v42 }
 0x3fe   : > { %v4927_v45 = vadd.f32 %v9128_v4, %v4926_v21  ;;  %v9999_v3 = vpop.f32.mrf.mxu1  ;;  %6392 = vmatprep.mubr.bf16.mxu0 %v8268_v34  ;;  %v10862_v4 = vld [vmem:[#allocation2 + $0x194] ss:$12 sps:$4 sm:$0xff]  }
 0x3ff   : > { %v9130_v28 = vpop.f32.mrf.mxu0 }
 0x400   : > { %v13141_v32 = vadd.f32 %v4927_v45, %v12919_v50  ;;  %v9131_v1 = vadd.f32 %v9130_v28, %v9129_v23  ;;  %v4934_v47 = vpop.f32.mrf.mxu1  ;;  %v8270_v23 = vcombine.low %v13136_v10, %v13138_v16  ;;  %v8274_v28 = vcombine.high %v13152_v51, %v12939_v14 }
 0x401   : > { %v9132_v18 = vpop.f32.mrf.mxu0 }
 0x402   : > { %v4932_v36 = vadd.f32 %v9131_v1, %v4931_v37  ;;  %v10000_v52 = vpop.f32.mrf.mxu1 }
 0x403   : > { %v9133_v53 = vpop.f32.mrf.mxu0 }
 0x404   : > { %v13148_v21 = vadd.f32 %v4932_v36, %v12924_v26  ;;  %v9134_v57 = vadd.f32 %v9133_v53, %v9132_v18  ;;  %v5647_v38 = vpop.f32.mrf.mxu1  ;;  %10130 = vmatmul.mubr.bf16.gmra.mxu1 %v10857_v20 }
 0x405   : > { %v9174_v50 = vpop.f32.mrf.mxu0  ;;  %6393 = vmatmul.mubr.bf16.gmra.mxu0 %v8267_v61  ;;  %10133 = vmatprep.mubr.msk.bf16.mxu1 %vm11119_vm0, %v13705_v42 }
 0x406   : > { %v4935_v40 = vadd.f32 %v9134_v57, %v4934_v47  ;;  %v10019_v12 = vpop.f32.mrf.mxu1  ;;  %6400 = vmatprep.mubr.bf16.mxu0 %v8271_v5  ;;  %v13166_v5 = vld [vmem:[#allocation2 + $0x1bc] sm:$0xff] }
 0x407   : > { %v9175_v48 = vpop.f32.mrf.mxu0 }
 0x408   : > { %v13155_v34 = vadd.f32 %v4935_v40, %v12930_v59  ;;  %v9176_v19 = vadd.f32 %v9175_v48, %v9174_v50  ;;  %v5650_v26 = vpop.f32.mrf.mxu1  ;;  %v8273_v40 = vcombine.low %v13152_v51, %v12939_v14 }
 0x409   : > { %v9177_v37 = vpop.f32.mrf.mxu0 }
 0x40a   : > { %v5648_v45 = vadd.f32 %v9176_v19, %v5647_v38  ;;  %v10020_v3 = vpop.f32.mrf.mxu1  ;;  %v10866_v38 = vld [vmem:[#allocation2 + $0x1ac] ss:$12 sps:$4 sm:$0xff]   ;;  %v8277_v19 = vcombine.high %v13166_v5, %v12952_v2 }
 0x40b   : > { %v9178_v1 = vpop.f32.mrf.mxu0 }
 0x40c   : > { %v13162_v47 = vadd.f32 %v5648_v45, %v12933_v62  ;;  %v9179_v20 = vadd.f32 %v9178_v1, %v9177_v37  ;;  %v5655_v18 = vpop.f32.mrf.mxu1  ;;  %10134 = vmatmul.mubr.bf16.gmra.mxu1 %v10862_v4 }
 0x40d   : > { %v9180_v59 = vpop.f32.mrf.mxu0  ;;  %6401 = vmatmul.mubr.bf16.gmra.mxu0 %v8270_v23  ;;  %10137 = vmatprep.mubr.msk.bf16.mxu1 %vm11119_vm0, %v13705_v42 }
 0x40e   : > { %v5651_v61 = vadd.f32 %v9179_v20, %v5650_v26  ;;  %v10023_v36 = vpop.f32.mrf.mxu1  ;;  %6408 = vmatprep.mubr.bf16.mxu0 %v8274_v28 }
 0x40f   : > { %v9181_v52 = vpop.f32.mrf.mxu0 }
 0x410   : > { %v13169_v53 = vadd.f32 %v5651_v61, %v12942_v7  ;;  %v9182_v57 = vadd.f32 %v9181_v52, %v9180_v59  ;;  %v5658_v62 = vpop.f32.mrf.mxu1  ;;  %v8276_v59 = vcombine.low %v13166_v5, %v12952_v2  ;;  %v8280_v52 = vcombine.high %v12954_v41, %v12968_v44 }
 0x411   : > { %v9183_v50 = vpop.f32.mrf.mxu0 }
 0x412   : > { %v5656_v12 = vadd.f32 %v9182_v57, %v5655_v18  ;;  %v10024_v48 = vpop.f32.mrf.mxu1  ;;  %v10871_v18 = vld [vmem:[#allocation2 + $0x1c4] ss:$12 sps:$4 sm:$0xff]  }
 0x413   : > { %v9184_v26 = vpop.f32.mrf.mxu0  ;;  %v13192_v48 = vld [vmem:[#allocation2 + $0x1f8] sm:$0xff] }
 0x414   : > { %v13176_v4 = vadd.f32 %v5656_v12, %v12947_v39  ;;  %v9185_v37 = vadd.f32 %v9184_v26, %v9183_v50  ;;  %v5663_v23 = vpop.f32.mrf.mxu1  ;;  %10138 = vmatmul.mubr.bf16.gmra.mxu1 %v10866_v38 }
 0x415   : > { %v9186_v7 = vpop.f32.mrf.mxu0  ;;  %6409 = vmatmul.mubr.bf16.gmra.mxu0 %v8273_v40  ;;  %10141 = vmatprep.mubr.msk.bf16.mxu1 %vm11119_vm0, %v13705_v42 }
 0x416   : > { %v5659_v45 = vadd.f32 %v9185_v37, %v5658_v62  ;;  %v10027_v3 = vpop.f32.mrf.mxu1  ;;  %6416 = vmatprep.mubr.bf16.mxu0 %v8277_v19  ;;  %v10875_v37 = vld [vmem:[#allocation2 + $0x1dc] ss:$12 sps:$4 sm:$0xff]  }
 0x417   : > { %v9187_v14 = vpop.f32.mrf.mxu0 }
 0x418   : > { %v13181_v28 = vadd.f32 %v5659_v45, %v12957_v13  ;;  %v9188_v1 = vadd.f32 %v9187_v14, %v9186_v7  ;;  %v5666_v20 = vpop.f32.mrf.mxu1  ;;  %v8279_v7 = vcombine.low %v12954_v41, %v12968_v44  ;;  %v8283_v14 = vcombine.high %v12970_v63, %v13192_v48 }
 0x419   : > { %v9189_v39 = vpop.f32.mrf.mxu0 }
 0x41a   : > { %v5664_v61 = vadd.f32 %v9188_v1, %v5663_v23  ;;  %v10028_v36 = vpop.f32.mrf.mxu1 }
 0x41b   : > { %v9190_v57 = vpop.f32.mrf.mxu0 }
 0x41c   : > { %v13188_v62 = vadd.f32 %v5664_v61, %v12964_v29  ;;  %v9191_v38 = vadd.f32 %v9190_v57, %v9189_v39  ;;  %v5671_v50 = vpop.f32.mrf.mxu1  ;;  %10142 = vmatmul.mubr.bf16.gmra.mxu1 %v10871_v18  ;;  %v10881_v57 = vld [vmem:[#allocation2 + $0x1f4] ss:$12 sps:$4 sm:$0xff]  }
 0x41d   : > { %v9192_v13 = vpop.f32.mrf.mxu0  ;;  %6417 = vmatmul.mubr.bf16.gmra.mxu0 %v8276_v59  ;;  %10145 = vmatprep.mubr.msk.bf16.mxu1 %vm11119_vm0, %v13705_v42 }
 0x41e   : > { %v5667_v40 = vadd.f32 %v9191_v38, %v5666_v20  ;;  %v10031_v12 = vpop.f32.mrf.mxu1  ;;  %6424 = vmatprep.mubr.bf16.mxu0 %v8280_v52  ;;  %v8282_v38 = vcombine.low %v12970_v63, %v13192_v48 }
 0x41f   : > { %v9193_v2 = vpop.f32.mrf.mxu0 }
 0x420   : > { %v13195_v19 = vadd.f32 %v5667_v40, %v12973_v22  ;;  %v9194_v26 = vadd.f32 %v9193_v2, %v9192_v13  ;;  %v5674_v29 = vpop.f32.mrf.mxu1  ;;  %v10884_v40 = vld [vmem:[#allocation2 + $0xac] ss:$12 sps:$4 sm:$0xff]  }
 0x421   : > { %v9195_v23 = vpop.f32.mrf.mxu0 }
 0x422   : > { %v5672_v45 = vadd.f32 %v9194_v26, %v5671_v50  ;;  %v10032_v3 = vpop.f32.mrf.mxu1 }
 0x423   : > { %v9196_v1 = vpop.f32.mrf.mxu0 }
 0x424   : > { %v13202_v20 = vadd.f32 %v5672_v45, %v12980_v56  ;;  %v9197_v18 = vadd.f32 %v9196_v1, %v9195_v23  ;;  %v5679_v39 = vpop.f32.mrf.mxu1  ;;  %10146 = vmatmul.mubr.bf16.gmra.mxu1 %v10875_v37  ;;  %v10882_v1 = vld [vmem:[#allocation2 + $0xa8] ss:$12 sps:$4 sm:$0xff]  }
 0x425   : > { %v9198_v22 = vpop.f32.mrf.mxu0  ;;  %6425 = vmatmul.mubr.bf16.gmra.mxu0 %v8279_v7  ;;  %10149 = vmatprep.mubr.msk.bf16.mxu1 %vm11119_vm0, %v13705_v42 }
 0x426   : > { %v5675_v59 = vadd.f32 %v9197_v18, %v5674_v29  ;;  %v10035_v61 = vpop.f32.mrf.mxu1  ;;  %6432 = vmatprep.mubr.bf16.mxu0 %v8283_v14  ;;  %v10885_v14 = vld [vmem:[#allocation2 + $0xb0] ss:$12 sps:$4 sm:$0xff]  }
 0x427   : > { %v9199_v41 = vpop.f32.mrf.mxu0 }
 0x428   : > { %v13207_v44 = vadd.f32 %v5675_v59, %v12985_v46  ;;  %v9200_v36 = vadd.f32 %v9199_v41, %v9198_v22  ;;  %v5682_v52 = vpop.f32.mrf.mxu1  ;;  %v10888_v22 = vld [vmem:[#allocation2 + $0xc4] ss:$12 sps:$4 sm:$0xff]  }
 0x429   : > { %v9201_v56 = vpop.f32.mrf.mxu0 }
 0x42a   : > { %v5680_v50 = vadd.f32 %v9200_v36, %v5679_v39  ;;  %v10036_v13 = vpop.f32.mrf.mxu1 }
 0x42b   : > { %v9202_v12 = vpop.f32.mrf.mxu0 }
 0x42c   : > { %v13212_v2 = vadd.f32 %v5680_v50, %v12992_v55  ;;  %v9203_v26 = vadd.f32 %v9202_v12, %v9201_v56  ;;  %v5687_v29 = vpop.f32.mrf.mxu1  ;;  %10150 = vmatmul.mubr.bf16.gmra.mxu1 %v10881_v57  ;;  %v10886_v12 = vld [vmem:[#allocation2 + $0xc0] ss:$12 sps:$4 sm:$0xff]  }
 0x42d   : > { %v9204_v37 = vpop.f32.mrf.mxu0  ;;  %6433 = vmatmul.mubr.bf16.gmra.mxu0 %v8282_v38  ;;  %10169 = vmatprep.mubr.msk.bf16.mxu1 %vm11119_vm0, %v13705_v42 }
 0x42e   : > { %v5683_v46 = vadd.f32 %v9203_v26, %v5682_v52  ;;  %v10039_v23 = vpop.f32.mrf.mxu1  ;;  %7148 = vmatprep.mubr.bf16.mxu0 %v10884_v40  ;;  %v10889_v40 = vld [vmem:[#allocation2 + $0xc8] ss:$12 sps:$4 sm:$0xff]  }
 0x42f   : > { %v9205_v7 = vpop.f32.mrf.mxu0 }
 0x430   : > { %v13217_v63 = vadd.f32 %v5683_v46, %v12997_v54  ;;  %v9206_v45 = vadd.f32 %v9205_v7, %v9204_v37  ;;  %v5690_v3 = vpop.f32.mrf.mxu1  ;;  %v10892_v37 = vld [vmem:[#allocation2 + $0xdc] ss:$12 sps:$4 sm:$0xff]  }
 0x431   : > { %v9207_v55 = vpop.f32.mrf.mxu0 }
 0x432   : > { %v5688_v18 = vadd.f32 %v9206_v45, %v5687_v29  ;;  %v10040_v39 = vpop.f32.mrf.mxu1 }
 0x433   : > { %v9208_v59 = vpop.f32.mrf.mxu0 }
 0x434   : > { %v13220_v61 = vadd.f32 %v5688_v18, %v13007_v11  ;;  %v9209_v41 = vadd.f32 %v9208_v59, %v9207_v55  ;;  %v5695_v36 = vpop.f32.mrf.mxu1  ;;  %10170 = vmatmul.mubr.bf16.vlgmr.msra.gmra.mxu1 %v10885_v14  ;;  %v10890_v59 = vld [vmem:[#allocation2 + $0xd8] ss:$12 sps:$4 sm:$0xff]  }
 0x435   : > { %v9210_v52 = vpop.f32.mrf.mxu0  ;;  %7149 = vmatmul.mubr.bf16.vlgmr.msra.gmra.mxu0 %v10882_v1  ;;  %10173 = vmatprep.mubr.msk.bf16.mxu1 %vm11119_vm0, %v13705_v42 }
 0x436   : > { %v5691_v54 = vadd.f32 %v9209_v41, %v5690_v3  ;;  %v10043_v57 = vpop.f32.mrf.mxu1  ;;  %7156 = vmatprep.mubr.bf16.mxu0 %v10888_v22  ;;  %v10893_v22 = vld [vmem:[#allocation2 + $0xe0] ss:$12 sps:$4 sm:$0xff]  }
 0x437   : > { %v9211_v56 = vpop.f32.mrf.mxu0 }
 0x438   : > { %v13225_v38 = vadd.f32 %v5691_v54, %v13015_v24  ;;  %v9212_v50 = vadd.f32 %v9211_v56, %v9210_v52  ;;  %v5698_v13 = vpop.f32.mrf.mxu1  ;;  %v10896_v52 = vld [vmem:[#allocation2 + $0xf4] ss:$12 sps:$4 sm:$0xff]  }
 0x439   : > { %v9213_v11 = vpop.f32.mrf.mxu0 }
 0x43a   : > { %v5696_v26 = vadd.f32 %v9212_v50, %v5695_v36  ;;  %v10044_v29 = vpop.f32.mrf.mxu1 }
 0x43b   : > { %v9214_v46 = vpop.f32.mrf.mxu0 }
 0x43c   : > { %v13228_v23 = vadd.f32 %v5696_v26, %v13027_v60  ;;  %v9215_v7 = vadd.f32 %v9214_v46, %v9213_v11  ;;  %v5703_v45 = vpop.f32.mrf.mxu1  ;;  %10174 = vmatmul.mubr.bf16.gmra.mxu1 %v10889_v40  ;;  %v10894_v46 = vld [vmem:[#allocation2 + $0xf0] ss:$12 sps:$4 sm:$0xff]  }
 0x43d   : > { %v9216_v3 = vpop.f32.mrf.mxu0  ;;  %7157 = vmatmul.mubr.bf16.gmra.mxu0 %v10886_v12  ;;  %10177 = vmatprep.mubr.msk.bf16.mxu1 %vm11119_vm0, %v13705_v42 }
 0x43e   : > { %v5699_v24 = vadd.f32 %v9215_v7, %v5698_v13  ;;  %v10047_v14 = vpop.f32.mrf.mxu1  ;;  %7164 = vmatprep.mubr.bf16.mxu0 %v10892_v37  ;;  %v10897_v37 = vld [vmem:[#allocation2 + $0xf8] ss:$12 sps:$4 sm:$0xff]  }
 0x43f   : > { %v9217_v55 = vpop.f32.mrf.mxu0 }
 0x440   : > { %v13233_v1 = vadd.f32 %v5699_v24, %v13035_v35  ;;  %v9218_v18 = vadd.f32 %v9217_v55, %v9216_v3  ;;  %v5706_v39 = vpop.f32.mrf.mxu1  ;;  %v10900_v3 = vld [vmem:[#allocation2 + $0x10c] ss:$12 sps:$4 sm:$0xff]  }
 0x441   : > { %v9219_v60 = vpop.f32.mrf.mxu0 }
 0x442   : > { %v5704_v41 = vadd.f32 %v9218_v18, %v5703_v45  ;;  %v10048_v36 = vpop.f32.mrf.mxu1 }
 0x443   : > { %v9220_v54 = vpop.f32.mrf.mxu0 }
 0x444   : > { %v13236_v57 = vadd.f32 %v5704_v41, %v13046_v6  ;;  %v9221_v56 = vadd.f32 %v9220_v54, %v9219_v60  ;;  %v5711_v50 = vpop.f32.mrf.mxu1  ;;  %10178 = vmatmul.mubr.bf16.gmra.mxu1 %v10893_v22  ;;  %v10898_v54 = vld [vmem:[#allocation2 + $0x108] ss:$12 sps:$4 sm:$0xff]  }
 0x445   : > { %v9222_v13 = vpop.f32.mrf.mxu0  ;;  %7165 = vmatmul.mubr.bf16.gmra.mxu0 %v10890_v59  ;;  %10181 = vmatprep.mubr.msk.bf16.mxu1 %vm11119_vm0, %v13705_v42 }
 0x446   : > { %v5707_v35 = vadd.f32 %v9221_v56, %v5706_v39  ;;  %v10051_v40 = vpop.f32.mrf.mxu1  ;;  %7172 = vmatprep.mubr.bf16.mxu0 %v10896_v52  ;;  %v10901_v52 = vld [vmem:[#allocation2 + $0x110] ss:$12 sps:$4 sm:$0xff]  }
 0x447   : > { %v9223_v11 = vpop.f32.mrf.mxu0 }
 0x448   : > { %v13241_v12 = vadd.f32 %v5707_v35, %v13055_v9  ;;  %v9224_v26 = vadd.f32 %v9223_v11, %v9222_v13  ;;  %v5714_v29 = vpop.f32.mrf.mxu1  ;;  %v10904_v13 = vld [vmem:[#allocation2 + $0x124] ss:$12 sps:$4 sm:$0xff]  }
 0x449   : > { %v9225_v6 = vpop.f32.mrf.mxu0 }
 0x44a   : > { %v5712_v7 = vadd.f32 %v9224_v26, %v5711_v50  ;;  %v10052_v45 = vpop.f32.mrf.mxu1 }
 0x44b   : > { %v9226_v24 = vpop.f32.mrf.mxu0 }
 0x44c   : > { %v13244_v14 = vadd.f32 %v5712_v7, %v13066_v0  ;;  %v9227_v55 = vadd.f32 %v9226_v24, %v9225_v6  ;;  %v5719_v18 = vpop.f32.mrf.mxu1  ;;  %10182 = vmatmul.mubr.bf16.gmra.mxu1 %v10897_v37  ;;  %v10902_v24 = vld [vmem:[#allocation2 + $0x120] ss:$12 sps:$4 sm:$0xff]  }
 0x44d   : > { %v9228_v39 = vpop.f32.mrf.mxu0  ;;  %7173 = vmatmul.mubr.bf16.gmra.mxu0 %v10894_v46  ;;  %10185 = vmatprep.mubr.msk.bf16.mxu1 %vm11119_vm0, %v13705_v42 }
 0x44e   : > { %v5715_v9 = vadd.f32 %v9227_v55, %v5714_v29  ;;  %v10055_v22 = vpop.f32.mrf.mxu1  ;;  %7180 = vmatprep.mubr.bf16.mxu0 %v10900_v3  ;;  %v10905_v3 = vld [vmem:[#allocation2 + $0x128] ss:$12 sps:$4 sm:$0xff]  }
 0x44f   : > { %v9229_v60 = vpop.f32.mrf.mxu0 }
 0x450   : > { %v13249_v59 = vadd.f32 %v5715_v9, %v13074_v31  ;;  %v9230_v41 = vadd.f32 %v9229_v60, %v9228_v39  ;;  %v5722_v36 = vpop.f32.mrf.mxu1  ;;  %v10908_v39 = vld [vmem:[#allocation2 + $0x13c] ss:$12 sps:$4 sm:$0xff]  }
 0x451   : > { %v9231_v0 = vpop.f32.mrf.mxu0 }
 0x452   : > { %v5720_v56 = vadd.f32 %v9230_v41, %v5719_v18  ;;  %v10056_v50 = vpop.f32.mrf.mxu1 }
 0x453   : > { %v9232_v35 = vpop.f32.mrf.mxu0 }
 0x454   : > { %v13252_v40 = vadd.f32 %v5720_v56, %v13082_v15  ;;  %v9233_v11 = vadd.f32 %v9232_v35, %v9231_v0  ;;  %v5727_v26 = vpop.f32.mrf.mxu1  ;;  %10186 = vmatmul.mubr.bf16.gmra.mxu1 %v10901_v52  ;;  %v10906_v35 = vld [vmem:[#allocation2 + $0x138] ss:$12 sps:$4 sm:$0xff]  }
 0x455   : > { %v9234_v29 = vpop.f32.mrf.mxu0  ;;  %7181 = vmatmul.mubr.bf16.gmra.mxu0 %v10898_v54  ;;  %10189 = vmatprep.mubr.msk.bf16.mxu1 %vm11119_vm0, %v13705_v42 }
 0x456   : > { %v5723_v31 = vadd.f32 %v9233_v11, %v5722_v36  ;;  %v10059_v37 = vpop.f32.mrf.mxu1  ;;  %7188 = vmatprep.mubr.bf16.mxu0 %v10904_v13  ;;  %v10909_v13 = vld [vmem:[#allocation2 + $0x140] ss:$12 sps:$4 sm:$0xff]  }
 0x457   : > { %v9235_v6 = vpop.f32.mrf.mxu0 }
 0x458   : > { %v13257_v46 = vadd.f32 %v5723_v31, %v13087_v49  ;;  %v9236_v7 = vadd.f32 %v9235_v6, %v9234_v29  ;;  %v5730_v45 = vpop.f32.mrf.mxu1  ;;  %v10912_v29 = vld [vmem:[#allocation2 + $0x154] ss:$12 sps:$4 sm:$0xff]  }
 0x459   : > { %v9237_v15 = vpop.f32.mrf.mxu0 }
 0x45a   : > { %v5728_v55 = vadd.f32 %v9236_v7, %v5727_v26  ;;  %v10060_v18 = vpop.f32.mrf.mxu1 }
 0x45b   : > { %v9238_v9 = vpop.f32.mrf.mxu0 }
 0x45c   : > { %v13260_v22 = vadd.f32 %v5728_v55, %v13094_v30  ;;  %v9239_v60 = vadd.f32 %v9238_v9, %v9237_v15  ;;  %v5735_v41 = vpop.f32.mrf.mxu1  ;;  %10190 = vmatmul.mubr.bf16.gmra.mxu1 %v10905_v3  ;;  %v10910_v9 = vld [vmem:[#allocation2 + $0x150] ss:$12 sps:$4 sm:$0xff]  }
 0x45d   : > { %v9240_v36 = vpop.f32.mrf.mxu0  ;;  %7189 = vmatmul.mubr.bf16.gmra.mxu0 %v10902_v24  ;;  %10193 = vmatprep.mubr.msk.bf16.mxu1 %vm11119_vm0, %v13705_v42 }
 0x45e   : > { %v5731_v49 = vadd.f32 %v9239_v60, %v5730_v45  ;;  %v10063_v52 = vpop.f32.mrf.mxu1  ;;  %7196 = vmatprep.mubr.bf16.mxu0 %v10908_v39  ;;  %v10913_v39 = vld [vmem:[#allocation2 + $0x158] ss:$12 sps:$4 sm:$0xff]  }
 0x45f   : > { %v9241_v0 = vpop.f32.mrf.mxu0 }
 0x460   : > { %v13265_v54 = vadd.f32 %v5731_v49, %v13099_v17  ;;  %v9242_v56 = vadd.f32 %v9241_v0, %v9240_v36  ;;  %v5738_v50 = vpop.f32.mrf.mxu1  ;;  %v10916_v36 = vld [vmem:[#allocation2 + $0x16c] ss:$12 sps:$4 sm:$0xff]  }
 0x461   : > { %v9243_v30 = vpop.f32.mrf.mxu0 }
 0x462   : > { %v5736_v11 = vadd.f32 %v9242_v56, %v5735_v41  ;;  %v10064_v26 = vpop.f32.mrf.mxu1 }
 0x463   : > { %v9244_v31 = vpop.f32.mrf.mxu0 }
 0x464   : > { %v13268_v37 = vadd.f32 %v5736_v11, %v13106_v58  ;;  %v9245_v6 = vadd.f32 %v9244_v31, %v9243_v30  ;;  %v5743_v7 = vpop.f32.mrf.mxu1  ;;  %10194 = vmatmul.mubr.bf16.gmra.mxu1 %v10909_v13  ;;  %v10914_v31 = vld [vmem:[#allocation2 + $0x168] ss:$12 sps:$4 sm:$0xff]  }
 0x465   : > { %v9246_v45 = vpop.f32.mrf.mxu0  ;;  %7197 = vmatmul.mubr.bf16.gmra.mxu0 %v10906_v35  ;;  %10197 = vmatprep.mubr.msk.bf16.mxu1 %vm11119_vm0, %v13705_v42 }
 0x466   : > { %v5739_v17 = vadd.f32 %v9245_v6, %v5738_v50  ;;  %v10067_v3 = vpop.f32.mrf.mxu1  ;;  %7204 = vmatprep.mubr.bf16.mxu0 %v10912_v29  ;;  %v10917_v29 = vld [vmem:[#allocation2 + $0x170] ss:$12 sps:$4 sm:$0xff]  }
 0x467   : > { %v9247_v15 = vpop.f32.mrf.mxu0 }
 0x468   : > { %v13273_v24 = vadd.f32 %v5739_v17, %v13111_v25  ;;  %v9248_v55 = vadd.f32 %v9247_v15, %v9246_v45  ;;  %v5746_v18 = vpop.f32.mrf.mxu1  ;;  %v8337_v45 = vcombine.high %v13122_v8, %v13136_v10 }
 0x469   : > { %v9249_v58 = vpop.f32.mrf.mxu0 }
 0x46a   : > { %v5744_v60 = vadd.f32 %v9248_v55, %v5743_v7  ;;  %v10068_v41 = vpop.f32.mrf.mxu1 }
 0x46b   : > { %v9250_v49 = vpop.f32.mrf.mxu0 }
 0x46c   : > { %v13276_v52 = vadd.f32 %v5744_v60, %v13118_v43  ;;  %v9251_v0 = vadd.f32 %v9250_v49, %v9249_v58  ;;  %v5751_v56 = vpop.f32.mrf.mxu1  ;;  %10198 = vmatmul.mubr.bf16.gmra.mxu1 %v10913_v39  ;;  %v8336_v49 = vcombine.low %v13122_v8, %v13136_v10  ;;  %v6668_v10 = vld [vmem:[#allocation2 + $0x1b0] sm:$0xff] }
 0x46d   : > { %v9252_v50 = vpop.f32.mrf.mxu0  ;;  %7205 = vmatmul.mubr.bf16.gmra.mxu0 %v10910_v9  ;;  %10201 = vmatprep.mubr.msk.bf16.mxu1 %vm11119_vm0, %v13705_v42 }
 0x46e   : > { %v5747_v25 = vadd.f32 %v9251_v0, %v5746_v18  ;;  %v10071_v13 = vpop.f32.mrf.mxu1  ;;  %7212 = vmatprep.mubr.bf16.mxu0 %v10916_v36  ;;  %v10920_v36 = vld [vmem:[#allocation2 + $0x188] ss:$12 sps:$4 sm:$0xff]  }
 0x46f   : > { %v9253_v30 = vpop.f32.mrf.mxu0 }
 0x470   : > { %v13281_v35 = vadd.f32 %v5747_v25, %v13125_v33  ;;  %v9254_v11 = vadd.f32 %v9253_v30, %v9252_v50  ;;  %v5754_v26 = vpop.f32.mrf.mxu1  ;;  %v8340_v50 = vcombine.high %v13138_v16, %v13152_v51 }
 0x471   : > { %v9255_v43 = vpop.f32.mrf.mxu0 }
 0x472   : > { %v5752_v6 = vadd.f32 %v9254_v11, %v5751_v56  ;;  %v10072_v7 = vpop.f32.mrf.mxu1 }
 0x473   : > { %v9256_v17 = vpop.f32.mrf.mxu0 }
 0x474   : > { %v13286_v3 = vadd.f32 %v5752_v6, %v13132_v27  ;;  %v9257_v15 = vadd.f32 %v9256_v17, %v9255_v43  ;;  %v5759_v55 = vpop.f32.mrf.mxu1  ;;  %10202 = vmatmul.mubr.bf16.gmra.mxu1 %v10917_v29 }
 0x475   : > { %v9258_v18 = vpop.f32.mrf.mxu0  ;;  %7213 = vmatmul.mubr.bf16.gmra.mxu0 %v10914_v31  ;;  %10205 = vmatprep.mubr.msk.bf16.mxu1 %vm11119_vm0, %v13705_v42 }
 0x476   : > { %v5755_v33 = vadd.f32 %v9257_v15, %v5754_v26  ;;  %v10075_v39 = vpop.f32.mrf.mxu1  ;;  %7220 = vmatprep.mubr.bf16.mxu0 %v8337_v45  ;;  %v8339_v45 = vcombine.low %v13138_v16, %v13152_v51 }
 0x477   : > { %v9259_v58 = vpop.f32.mrf.mxu0 }
 0x478   : > { %v13291_v9 = vadd.f32 %v5755_v33, %v13141_v32  ;;  %v9260_v60 = vadd.f32 %v9259_v58, %v9258_v18  ;;  %v5762_v41 = vpop.f32.mrf.mxu1 }
 0x479   : > { %v9261_v27 = vpop.f32.mrf.mxu0 }
 0x47a   : > { %v5760_v0 = vadd.f32 %v9260_v60, %v5759_v55  ;;  %v10076_v56 = vpop.f32.mrf.mxu1  ;;  %v8343_v55 = vcombine.high %v6668_v10, %v13166_v5 }
 0x47b   : > { %v9262_v25 = vpop.f32.mrf.mxu0 }
 0x47c   : > { %v13298_v13 = vadd.f32 %v5760_v0, %v13148_v21  ;;  %v9263_v30 = vadd.f32 %v9262_v25, %v9261_v27  ;;  %v6475_v11 = vpop.f32.mrf.mxu1  ;;  %10206 = vmatmul.mubr.bf16.gmra.mxu1 %v10920_v36  ;;  %v10923_v21 = vld [vmem:[#allocation2 + $0x1a0] ss:$12 sps:$4 sm:$0xff]   ;;  %v8342_v0 = vcombine.low %v6668_v10, %v13166_v5 }
 0x47d   : > { %v9303_v32 = vpop.f32.mrf.mxu0  ;;  %7221 = vmatmul.mubr.bf16.gmra.mxu0 %v8336_v49  ;;  %10209 = vmatprep.mubr.msk.bf16.mxu1 %vm11119_vm0, %v13705_v42  ;;  %v10926_v49 = vld [vmem:[#allocation2 + $0x1b8] ss:$12 sps:$4 sm:$0xff]  }
 0x47e   : > { %v5763_v26 = vadd.f32 %v9263_v30, %v5762_v41  ;;  %v10095_v29 = vpop.f32.mrf.mxu1  ;;  %7228 = vmatprep.mubr.bf16.mxu0 %v8340_v50  ;;  %v10929_v25 = vld [vmem:[#allocation2 + $0x1cc] ss:$12 sps:$4 sm:$0xff]  }
 0x47f   : > { %v9304_v8 = vpop.f32.mrf.mxu0 }
 0x480   : > { %v13303_v43 = vadd.f32 %v5763_v26, %v13155_v34  ;;  %v9305_v31 = vadd.f32 %v9304_v8, %v9303_v32  ;;  %v6478_v6 = vpop.f32.mrf.mxu1 }
 0x481   : > { %v9306_v7 = vpop.f32.mrf.mxu0 }
 0x482   : > { %v6476_v17 = vadd.f32 %v9305_v31, %v6475_v11  ;;  %v10096_v15 = vpop.f32.mrf.mxu1 }
 0x483   : > { %v9307_v18 = vpop.f32.mrf.mxu0  ;;  %v10933_v15 = vld [vmem:[#allocation2 + $0x1e4] ss:$12 sps:$4 sm:$0xff]  }
 0x484   : > { %v13309_v33 = vadd.f32 %v6476_v17, %v13162_v47  ;;  %v9308_v39 = vadd.f32 %v9307_v18, %v9306_v7  ;;  %v6483_v58 = vpop.f32.mrf.mxu1  ;;  %10210 = vmatmul.mubr.bf16.gmra.mxu1 %v10923_v21  ;;  %v10930_v21 = vld [vmem:[#allocation2 + $0x1d0] ss:$12 sps:$4 sm:$0xff]   ;;  %v10927_v7 = vld [vmem:[#allocation2 + $0x1c8] ss:$12 sps:$4 sm:$0xff]  }
 0x485   : > { %v9309_v34 = vpop.f32.mrf.mxu0  ;;  %7229 = vmatmul.mubr.bf16.gmra.mxu0 %v8339_v45  ;;  %10213 = vmatprep.mubr.msk.bf16.mxu1 %vm11119_vm0, %v13705_v42 }
 0x486   : > { %v6479_v60 = vadd.f32 %v9308_v39, %v6478_v6  ;;  %v10099_v41 = vpop.f32.mrf.mxu1  ;;  %7236 = vmatprep.mubr.bf16.mxu0 %v8343_v55 }
 0x487   : > { %v9310_v16 = vpop.f32.mrf.mxu0 }
 0x488   : > { %v13314_v51 = vadd.f32 %v6479_v60, %v13169_v53  ;;  %v9311_v36 = vadd.f32 %v9310_v16, %v9309_v34  ;;  %v6486_v27 = vpop.f32.mrf.mxu1  ;;  %v6682_v16 = vld [vmem:[#allocation2 + $0x204] sm:$0xff] }
 0x489   : > { %v9312_v47 = vpop.f32.mrf.mxu0 }
 0x48a   : > { %v6484_v56 = vadd.f32 %v9311_v36, %v6483_v58  ;;  %v10100_v50 = vpop.f32.mrf.mxu1 }
 0x48b   : > { %v9313_v30 = vpop.f32.mrf.mxu0 }
 0x48c   : > { %v13318_v11 = vadd.f32 %v6484_v56, %v13176_v4  ;;  %v9314_v32 = vadd.f32 %v9313_v30, %v9312_v47  ;;  %v6491_v26 = vpop.f32.mrf.mxu1  ;;  %10214 = vmatmul.mubr.bf16.gmra.mxu1 %v10926_v49 }
 0x48d   : > { %v9315_v29 = vpop.f32.mrf.mxu0  ;;  %7237 = vmatmul.mubr.bf16.gmra.mxu0 %v8342_v0  ;;  %10217 = vmatprep.mubr.msk.bf16.mxu1 %vm11119_vm0, %v13705_v42  ;;  %v10931_v0 = vld [vmem:[#allocation2 + $0x1e0] ss:$12 sps:$4 sm:$0xff]  }
 0x48e   : > { %v6487_v53 = vadd.f32 %v9314_v32, %v6486_v27  ;;  %v10103_v8 = vpop.f32.mrf.mxu1  ;;  %7244 = vmatprep.mubr.bf16.mxu0 %v10929_v25  ;;  %v8352_v25 = vcombine.high %v13192_v48, %v6682_v16 }
 0x48f   : > { %v9316_v31 = vpop.f32.mrf.mxu0 }
 0x490   : > { %v13323_v5 = vadd.f32 %v6487_v53, %v13181_v28  ;;  %v9317_v10 = vadd.f32 %v9316_v31, %v9315_v29  ;;  %v6494_v6 = vpop.f32.mrf.mxu1 }
 0x491   : > { %v9318_v4 = vpop.f32.mrf.mxu0 }
 0x492   : > { %v6492_v45 = vadd.f32 %v9317_v10, %v6491_v26  ;;  %v10104_v17 = vpop.f32.mrf.mxu1 }
 0x493   : > { %v9319_v55 = vpop.f32.mrf.mxu0 }
 0x494   : > { %v13326_v18 = vadd.f32 %v6492_v45, %v13188_v62  ;;  %v9320_v39 = vadd.f32 %v9319_v55, %v9318_v4  ;;  %v6499_v58 = vpop.f32.mrf.mxu1  ;;  %10218 = vmatmul.mubr.bf16.gmra.mxu1 %v10930_v21  ;;  %v10934_v62 = vld [vmem:[#allocation2 + $0x1e8] ss:$12 sps:$4 sm:$0xff]   ;;  %v10937_v4 = vld [vmem:[#allocation2 + $0x200] ss:$12 sps:$4 sm:$0xff]  }
 0x495   : > { %v9321_v34 = vpop.f32.mrf.mxu0  ;;  %7245 = vmatmul.mubr.bf16.gmra.mxu0 %v10927_v7  ;;  %10221 = vmatprep.mubr.msk.bf16.mxu1 %vm11119_vm0, %v13705_v42  ;;  %v8351_v7 = vcombine.low %v13192_v48, %v6682_v16 }
 0x496   : > { %v6495_v28 = vadd.f32 %v9320_v39, %v6494_v6  ;;  %v10107_v60 = vpop.f32.mrf.mxu1  ;;  %7252 = vmatprep.mubr.bf16.mxu0 %v10933_v15 }
 0x497   : > { %v9322_v41 = vpop.f32.mrf.mxu0 }
 0x498   : > { %v13331_v36 = vadd.f32 %v6495_v28, %v13195_v19  ;;  %v9323_v27 = vadd.f32 %v9322_v41, %v9321_v34  ;;  %v6502_v49 = vpop.f32.mrf.mxu1 }
 0x499   : > { %v9324_v47 = vpop.f32.mrf.mxu0 }
 0x49a   : > { %v6500_v56 = vadd.f32 %v9323_v27, %v6499_v58  ;;  %v10108_v50 = vpop.f32.mrf.mxu1 }
 0x49b   : > { %v9325_v30 = vpop.f32.mrf.mxu0 }
 0x49c   : > { %v13335_v32 = vadd.f32 %v6500_v56, %v13202_v20  ;;  %v9326_v26 = vadd.f32 %v9325_v30, %v9324_v47  ;;  %v6507_v29 = vpop.f32.mrf.mxu1  ;;  %10222 = vmatmul.mubr.bf16.gmra.mxu1 %v10934_v62 }
 0x49d   : > { %v9327_v53 = vpop.f32.mrf.mxu0  ;;  %7253 = vmatmul.mubr.bf16.gmra.mxu0 %v10931_v0  ;;  %10225 = vmatprep.mubr.msk.bf16.mxu1 %vm11119_vm0, %v13705_v42 }
 0x49e   : > { %v6503_v19 = vadd.f32 %v9326_v26, %v6502_v49  ;;  %v10111_v8 = vpop.f32.mrf.mxu1  ;;  %7260 = vmatprep.mubr.bf16.mxu0 %v8352_v25 }
 0x49f   : > { %v9328_v31 = vpop.f32.mrf.mxu0 }
 0x4a0   : > { %v13340_v10 = vadd.f32 %v6503_v19, %v13207_v44  ;;  %v9329_v6 = vadd.f32 %v9328_v31, %v9327_v53  ;;  %v6510_v21 = vpop.f32.mrf.mxu1 }
 0x4a1   : > { %v9330_v20 = vpop.f32.mrf.mxu0 }
 0x4a2   : > { %v6508_v45 = vadd.f32 %v9329_v6, %v6507_v29  ;;  %v10112_v17 = vpop.f32.mrf.mxu1 }
 0x4a3   : > { %v9331_v15 = vpop.f32.mrf.mxu0 }
 0x4a4   : > { %v13344_v55 = vadd.f32 %v6508_v45, %v13212_v2  ;;  %v9332_v42 = vadd.f32 %v9331_v15, %v9330_v20  ;;  %v6515_v39 = vpop.f32.mrf.mxu1  ;;  %10226 = vmatmul.mubr.bf16.gmra.mxu1 %v10937_v4 }
 0x4a5   : > { %v9333_v58 = vpop.f32.mrf.mxu0  ;;  %7261 = vmatmul.mubr.bf16.gmra.mxu0 %v8351_v7 }
 0x4a6   : > { %v6511_v34 = vadd.f32 %v9332_v42, %v6510_v21  ;;  %v10115_v44 = vpop.f32.mrf.mxu1 }
 0x4a7   : > { %v9334_v28 = vpop.f32.mrf.mxu0 }
 0x4a8   : > { %v13347_v60 = vadd.f32 %v6511_v34, %v13217_v63  ;;  %v9335_v41 = vadd.f32 %v9334_v28, %v9333_v58  ;;  %v6518_v27 = vpop.f32.mrf.mxu1 }
 0x4a9   : > { %v9336_v48 = vpop.f32.mrf.mxu0 }
 0x4aa   : > { %v6516_v16 = vadd.f32 %v9335_v41, %v6515_v39  ;;  %v10116_v49 = vpop.f32.mrf.mxu1 }
 0x4ab   : > { %v9337_v62 = vpop.f32.mrf.mxu0 }
 0x4ac   : > { %v13350_v2 = vadd.f32 %v6516_v16, %v13220_v61  ;;  %v9338_v47 = vadd.f32 %v9337_v62, %v9336_v48  ;;  %v6523_v0 = vpop.f32.mrf.mxu1 }
 0x4ad   : > { %v9339_v56 = vpop.f32.mrf.mxu0 }
 0x4ae   : > { %v6519_v50 = vadd.f32 %v9338_v47, %v6518_v27  ;;  %v10119_v25 = vpop.f32.mrf.mxu1 }
 0x4af   : > { %v9340_v30 = vpop.f32.mrf.mxu0 }
 0x4b0   : > { %v13353_v26 = vadd.f32 %v6519_v50, %v13225_v38  ;;  %v9341_v63 = vadd.f32 %v9340_v30, %v9339_v56  ;;  %v6526_v29 = vpop.f32.mrf.mxu1 }
 0x4b1   : > { %v9342_v53 = vpop.f32.mrf.mxu0 }
 0x4b2   : > { %v6524_v19 = vadd.f32 %v9341_v63, %v6523_v0  ;;  %v10120_v8 = vpop.f32.mrf.mxu1 }
 0x4b3   : > { %v9343_v31 = vpop.f32.mrf.mxu0 }
 0x4b4   : > { %v13356_v6 = vadd.f32 %v6524_v19, %v13228_v23  ;;  %v9344_v61 = vadd.f32 %v9343_v31, %v9342_v53  ;;  %v6531_v21 = vpop.f32.mrf.mxu1 }
 0x4b5   : > { %v9345_v4 = vpop.f32.mrf.mxu0 }
 0x4b6   : > { %v6527_v20 = vadd.f32 %v9344_v61, %v6526_v29  ;;  %v10123_v7 = vpop.f32.mrf.mxu1 }
 0x4b7   : > { %v9346_v45 = vpop.f32.mrf.mxu0 }
 0x4b8   : > { %v13359_v17 = vadd.f32 %v6527_v20, %v13233_v1  ;;  %v9347_v38 = vadd.f32 %v9346_v45, %v9345_v4  ;;  %v6534_v15 = vpop.f32.mrf.mxu1 }
 0x4b9   : > { %v9348_v42 = vpop.f32.mrf.mxu0 }
 0x4ba   : > { %v6532_v39 = vadd.f32 %v9347_v38, %v6531_v21  ;;  %v10124_v58 = vpop.f32.mrf.mxu1 }
 0x4bb   : > { %v9349_v34 = vpop.f32.mrf.mxu0 }
 0x4bc   : > { %v13362_v44 = vadd.f32 %v6532_v39, %v13236_v57  ;;  %v9350_v23 = vadd.f32 %v9349_v34, %v9348_v42  ;;  %v6539_v28 = vpop.f32.mrf.mxu1 }
 0x4bd   : > { %v9351_v41 = vpop.f32.mrf.mxu0 }
 0x4be   : > { %v6535_v27 = vadd.f32 %v9350_v23, %v6534_v15  ;;  %v10127_v48 = vpop.f32.mrf.mxu1 }
 0x4bf   : > { %v9352_v16 = vpop.f32.mrf.mxu0 }
 0x4c0   : > { %v13365_v49 = vadd.f32 %v6535_v27, %v13241_v12  ;;  %v9353_v1 = vadd.f32 %v9352_v16, %v9351_v41  ;;  %v6542_v62 = vpop.f32.mrf.mxu1 }
 0x4c1   : > { %v9354_v47 = vpop.f32.mrf.mxu0 }
 0x4c2   : > { %v6540_v0 = vadd.f32 %v9353_v1, %v6539_v28  ;;  %v10128_v56 = vpop.f32.mrf.mxu1 }
 0x4c3   : > { %v9355_v50 = vpop.f32.mrf.mxu0 }
 0x4c4   : > { %v13368_v25 = vadd.f32 %v6540_v0, %v13244_v14  ;;  %v9356_v57 = vadd.f32 %v9355_v50, %v9354_v47  ;;  %v6547_v30 = vpop.f32.mrf.mxu1 }
 0x4c5   : > { %v9357_v63 = vpop.f32.mrf.mxu0 }
 0x4c6   : > { %v6543_v29 = vadd.f32 %v9356_v57, %v6542_v62  ;;  %v10131_v53 = vpop.f32.mrf.mxu1 }
 0x4c7   : > { %v9358_v19 = vpop.f32.mrf.mxu0 }
 0x4c8   : > { %v13371_v8 = vadd.f32 %v6543_v29, %v13249_v59  ;;  %v9359_v12 = vadd.f32 %v9358_v19, %v9357_v63  ;;  %v6550_v31 = vpop.f32.mrf.mxu1 }
 0x4c9   : > { %v9360_v61 = vpop.f32.mrf.mxu0 }
 0x4ca   : > { %v6548_v21 = vadd.f32 %v9359_v12, %v6547_v30  ;;  %v10132_v4 = vpop.f32.mrf.mxu1 }
 0x4cb   : > { %v9361_v20 = vpop.f32.mrf.mxu0 }
 0x4cc   : > { %v13374_v7 = vadd.f32 %v6548_v21, %v13252_v40  ;;  %v9362_v14 = vadd.f32 %v9361_v20, %v9360_v61  ;;  %v6555_v45 = vpop.f32.mrf.mxu1 }
 0x4cd   : > { %v9363_v38 = vpop.f32.mrf.mxu0 }
 0x4ce   : > { %v6551_v15 = vadd.f32 %v9362_v14, %v6550_v31  ;;  %v10135_v42 = vpop.f32.mrf.mxu1 }
 0x4cf   : > { %v9364_v39 = vpop.f32.mrf.mxu0 }
 0x4d0   : > { %v13377_v58 = vadd.f32 %v6551_v15, %v13257_v46  ;;  %v9365_v59 = vadd.f32 %v9364_v39, %v9363_v38  ;;  %v6558_v34 = vpop.f32.mrf.mxu1 }
 0x4d1   : > { %v9366_v23 = vpop.f32.mrf.mxu0 }
 0x4d2   : > { %v6556_v28 = vadd.f32 %v9365_v59, %v6555_v45  ;;  %v10136_v41 = vpop.f32.mrf.mxu1 }
 0x4d3   : > { %v9367_v27 = vpop.f32.mrf.mxu0 }
 0x4d4   : > { %v13380_v48 = vadd.f32 %v6556_v28, %v13260_v22  ;;  %v9368_v40 = vadd.f32 %v9367_v27, %v9366_v23  ;;  %v6563_v16 = vpop.f32.mrf.mxu1 }
 0x4d5   : > { %v9369_v1 = vpop.f32.mrf.mxu0 }
 0x4d6   : > { %v6559_v62 = vadd.f32 %v9368_v40, %v6558_v34  ;;  %v10139_v47 = vpop.f32.mrf.mxu1 }
 0x4d7   : > { %v9370_v0 = vpop.f32.mrf.mxu0 }
 0x4d8   : > { %v13383_v56 = vadd.f32 %v6559_v62, %v13265_v54  ;;  %v9371_v46 = vadd.f32 %v9370_v0, %v9369_v1  ;;  %v6566_v50 = vpop.f32.mrf.mxu1 }
 0x4d9   : > { %v9372_v57 = vpop.f32.mrf.mxu0 }
 0x4da   : > { %v6564_v30 = vadd.f32 %v9371_v46, %v6563_v16  ;;  %v10140_v63 = vpop.f32.mrf.mxu1 }
 0x4db   : > { %v9373_v29 = vpop.f32.mrf.mxu0 }
 0x4dc   : > { %v13386_v53 = vadd.f32 %v6564_v30, %v13268_v37  ;;  %v9374_v22 = vadd.f32 %v9373_v29, %v9372_v57  ;;  %v6571_v19 = vpop.f32.mrf.mxu1 }
 0x4dd   : > { %v9375_v12 = vpop.f32.mrf.mxu0 }
 0x4de   : > { %v6567_v31 = vadd.f32 %v9374_v22, %v6566_v50  ;;  %v10143_v61 = vpop.f32.mrf.mxu1 }
 0x4df   : > { %v9376_v21 = vpop.f32.mrf.mxu0 }
 0x4e0   : > { %v13389_v4 = vadd.f32 %v6567_v31, %v13273_v24  ;;  %v9377_v54 = vadd.f32 %v9376_v21, %v9375_v12  ;;  %v6574_v20 = vpop.f32.mrf.mxu1 }
 0x4e1   : > { %v9378_v14 = vpop.f32.mrf.mxu0 }
 0x4e2   : > { %v6572_v45 = vadd.f32 %v9377_v54, %v6571_v19  ;;  %v10144_v38 = vpop.f32.mrf.mxu1 }
 0x4e3   : > { %v9379_v15 = vpop.f32.mrf.mxu0 }
 0x4e4   : > { %v13392_v42 = vadd.f32 %v6572_v45, %v13276_v52  ;;  %v9380_v37 = vadd.f32 %v9379_v15, %v9378_v14  ;;  %v6579_v39 = vpop.f32.mrf.mxu1 }
 0x4e5   : > { %v9381_v59 = vpop.f32.mrf.mxu0 }
 0x4e6   : > { %v6575_v34 = vadd.f32 %v9380_v37, %v6574_v20  ;;  %v10147_v23 = vpop.f32.mrf.mxu1 }
 0x4e7   : > { %v9382_v28 = vpop.f32.mrf.mxu0 }
 0x4e8   : > { %v13395_v41 = vadd.f32 %v6575_v34, %v13281_v35  ;;  %v9383_v24 = vadd.f32 %v9382_v28, %v9381_v59  ;;  %v6582_v27 = vpop.f32.mrf.mxu1  ;;  %v13410_v34 = vld [vmem:[%s231_s24] ss:$0 sm:$0xff] }
 0x4e9   : > { %v9384_v40 = vpop.f32.mrf.mxu0 }
 0x4ea   : > { %v6580_v16 = vadd.f32 %v9383_v24, %v6579_v39  ;;  %v10148_v1 = vpop.f32.mrf.mxu1 }
 0x4eb   : > { %v9385_v62 = vpop.f32.mrf.mxu0  ;;  %v13415_v1 = vld [vmem:[%s231_s24 + $0x1] ss:$0 sm:$0xff] }
 0x4ec   : > { %v13398_v47 = vadd.f32 %v6580_v16, %v13286_v3  ;;  %v9386_v52 = vadd.f32 %v9385_v62, %v9384_v40  ;;  %v6587_v0 = vpop.f32.mrf.mxu1 }
 0x4ed   : > { %v9387_v46 = vpop.f32.mrf.mxu0 }
 0x4ee   : > { %v6583_v50 = vadd.f32 %v9386_v52, %v6582_v27  ;;  %v10151_v57 = vpop.f32.mrf.mxu1 }
 0x4ef   : > { %v9388_v30 = vpop.f32.mrf.mxu0  ;;  %v13418_v57 = vld [vmem:[%s231_s24 + $0x2] ss:$0 sm:$0xff] }
 0x4f0   : > { %v13401_v63 = vadd.f32 %v6583_v50, %v13291_v9  ;;  %v9389_v35 = vadd.f32 %v9388_v30, %v9387_v46  ;;  %v6590_v29 = vpop.f32.mrf.mxu1 }
 0x4f1   : > { %v9390_v22 = vpop.f32.mrf.mxu0 }
 0x4f2   : > { %v6588_v19 = vadd.f32 %v9389_v35, %v6587_v0  ;;  %v10152_v12 = vpop.f32.mrf.mxu1 }
 0x4f3   : > { %v9391_v31 = vpop.f32.mrf.mxu0 }
 0x4f4   : > { %v13404_v61 = vadd.f32 %v6588_v19, %v13298_v13  ;;  %v9392_v3 = vadd.f32 %v9391_v31, %v9390_v22  ;;  %v7303_v21 = vpop.f32.mrf.mxu1 }
 0x4f5   : > { %v9432_v54 = vpop.f32.mrf.mxu0 }
 0x4f6   : > { %v6591_v20 = vadd.f32 %v9392_v3, %v6590_v29  ;;  %v10171_v14 = vpop.f32.mrf.mxu1 }
 0x4f7   : > { %v9433_v45 = vpop.f32.mrf.mxu0 }
 0x4f8   : > { %v13408_v38 = vadd.f32 %v6591_v20, %v13303_v43  ;;  %v9434_v9 = vadd.f32 %v9433_v45, %v9432_v54  ;;  %v7306_v15 = vpop.f32.mrf.mxu1 }
 0x4f9   : > { %v9435_v37 = vpop.f32.mrf.mxu0 }
 0x4fa   : > { %v7304_v39 = vadd.f32 %v9434_v9, %v7303_v21  ;;  %v10172_v59 = vpop.f32.mrf.mxu1 }
 0x4fb   : > { %v9436_v13 = vpop.f32.mrf.mxu0 }
 0x4fc   : > { %v7422_v23 = vadd.f32 %v7304_v39, %v13309_v33  ;;  %v9437_v28 = vadd.f32 %v9436_v13, %v9435_v37  ;;  %v7311_v24 = vpop.f32.mrf.mxu1 }
 0x4fd   : > { %v9438_v27 = vpop.f32.mrf.mxu0 }
 0x4fe   : > { %v7456_v40 = vadd.f32 %v13410_v34, %v7422_v23  ;;  %v7307_v16 = vadd.f32 %v9437_v28, %v7306_v15  ;;  %v10175_v43 = vpop.f32.mrf.mxu1 }
 0x4ff   : > { %v9439_v62 = vpop.f32.mrf.mxu0 }
 0x500   : > { %v7486_v52 = vmax.f32 %v7456_v40, 0.0  ;;  %v7423_v0 = vadd.f32 %v7307_v16, %v13314_v51  ;;  %v9440_v46 = vadd.f32 %v9439_v62, %v9438_v27  ;;  %v7314_v50 = vpop.f32.mrf.mxu1 }
 0x501   : > { %v9441_v30 = vpop.f32.mrf.mxu0 }
 0x502   : > { %v7520_v33 = vmul.f32 %v13415_v1, %v7486_v52  ;;  %v7457_v35 = vadd.f32 %v13410_v34, %v7423_v0  ;;  %v7312_v29 = vadd.f32 %v9440_v46, %v7311_v24  ;;  %v10176_v22 = vpop.f32.mrf.mxu1 }
 0x503   : > { %v9442_v19 = vpop.f32.mrf.mxu0 }
 0x504   : > { %v7554_v12 = vadd.f32 %v13418_v57, %v7520_v33  ;;  %v7487_v31 = vmax.f32 %v7457_v35, 0.0  ;;  %v7424_v3 = vadd.f32 %v7312_v29, %v13318_v11  ;;  %v9443_v21 = vadd.f32 %v9442_v19, %v9441_v30  ;;  %v7319_v54 = vpop.f32.mrf.mxu1 }
 0x505   : > { %v9444_v51 = vpop.f32.mrf.mxu0 }
 0x506   : > { %7584 = vst [vmem:[%s13424_s4] sm:$0xff] %v7554_v12  ;;  %v7521_v20 = vmul.f32 %v13415_v1, %v7487_v31  ;;  %v7458_v14 = vadd.f32 %v13410_v34, %v7424_v3  ;;  %v7315_v45 = vadd.f32 %v9443_v21, %v7314_v50  ;;  %v10179_v9 = vpop.f32.mrf.mxu1 }
 0x507   : > { %v9445_v15 = vpop.f32.mrf.mxu0 }
 0x508   : > { %v7555_v37 = vadd.f32 %v13418_v57, %v7521_v20  ;;  %v7488_v39 = vmax.f32 %v7458_v14, 0.0  ;;  %v7425_v11 = vadd.f32 %v7315_v45, %v13323_v5  ;;  %v9446_v59 = vadd.f32 %v9445_v15, %v9444_v51  ;;  %v7322_v13 = vpop.f32.mrf.mxu1 }
 0x509   : > { %v9447_v23 = vpop.f32.mrf.mxu0 }
 0x50a   : > { %7585 = vst [vmem:[%s13424_s4 + $0x8] sm:$0xff] %v7555_v37  ;;  %v7522_v28 = vmul.f32 %v13415_v1, %v7488_v39  ;;  %v7459_v24 = vadd.f32 %v13410_v34, %v7425_v11  ;;  %v7320_v27 = vadd.f32 %v9446_v59, %v7319_v54  ;;  %v10180_v40 = vpop.f32.mrf.mxu1 }
 0x50b   : > { %v9448_v16 = vpop.f32.mrf.mxu0 }
 0x50c   : > { %v7556_v43 = vadd.f32 %v13418_v57, %v7522_v28  ;;  %v7489_v62 = vmax.f32 %v7459_v24, 0.0  ;;  %v7426_v52 = vadd.f32 %v7320_v27, %v13326_v18  ;;  %v9449_v0 = vadd.f32 %v9448_v16, %v9447_v23  ;;  %v7327_v5 = vpop.f32.mrf.mxu1 }
 0x50d   : > { %v9450_v46 = vpop.f32.mrf.mxu0 }
 0x50e   : > { %7586 = vst [vmem:[%s13424_s4 + $0x10] sm:$0xff] %v7556_v43  ;;  %v7523_v50 = vmul.f32 %v13415_v1, %v7489_v62  ;;  %v7460_v30 = vadd.f32 %v13410_v34, %v7426_v52  ;;  %v7323_v33 = vadd.f32 %v9449_v0, %v7322_v13  ;;  %v10183_v35 = vpop.f32.mrf.mxu1 }
 0x50f   : > { %v9451_v29 = vpop.f32.mrf.mxu0 }
 0x510   : > { %v7557_v22 = vadd.f32 %v13418_v57, %v7523_v50  ;;  %v7490_v19 = vmax.f32 %v7460_v30, 0.0  ;;  %v7427_v12 = vadd.f32 %v7323_v33, %v13331_v36  ;;  %v9452_v31 = vadd.f32 %v9451_v29, %v9450_v46  ;;  %v7330_v18 = vpop.f32.mrf.mxu1 }
 0x511   : > { %v9453_v3 = vpop.f32.mrf.mxu0 }
 0x512   : > { %7587 = vst [vmem:[%s13424_s4 + $0x18] sm:$0xff] %v7557_v22  ;;  %v7524_v21 = vmul.f32 %v13415_v1, %v7490_v19  ;;  %v7461_v54 = vadd.f32 %v13410_v34, %v7427_v12  ;;  %v7328_v51 = vadd.f32 %v9452_v31, %v7327_v5  ;;  %v10184_v20 = vpop.f32.mrf.mxu1 }
 0x513   : > { %v9454_v14 = vpop.f32.mrf.mxu0 }
 0x514   : > { %v7558_v45 = vadd.f32 %v13418_v57, %v7524_v21  ;;  %v7491_v9 = vmax.f32 %v7461_v54, 0.0  ;;  %v7428_v15 = vadd.f32 %v7328_v51, %v13335_v32  ;;  %v9455_v37 = vadd.f32 %v9454_v14, %v9453_v3  ;;  %v7335_v36 = vpop.f32.mrf.mxu1 }
 0x515   : > { %v9456_v39 = vpop.f32.mrf.mxu0 }
 0x516   : > { %7588 = vst [vmem:[%s13424_s4 + $0x20] sm:$0xff] %v7558_v45  ;;  %v7525_v11 = vmul.f32 %v13415_v1, %v7491_v9  ;;  %v7462_v59 = vadd.f32 %v13410_v34, %v7428_v15  ;;  %v7331_v13 = vadd.f32 %v9455_v37, %v7330_v18  ;;  %v10187_v23 = vpop.f32.mrf.mxu1 }
 0x517   : > { %v9457_v28 = vpop.f32.mrf.mxu0 }
 0x518   : > { %v7559_v24 = vadd.f32 %v13418_v57, %v7525_v11  ;;  %v7492_v27 = vmax.f32 %v7462_v59, 0.0  ;;  %v7429_v40 = vadd.f32 %v7331_v13, %v13340_v10  ;;  %v9458_v16 = vadd.f32 %v9457_v28, %v9456_v39  ;;  %v7338_v32 = vpop.f32.mrf.mxu1 }
 0x519   : > { %v9459_v43 = vpop.f32.mrf.mxu0 }
 0x51a   : > { %7589 = vst [vmem:[%s13424_s4 + $0x28] sm:$0xff] %v7559_v24  ;;  %v7526_v62 = vmul.f32 %v13415_v1, %v7492_v27  ;;  %v7463_v52 = vadd.f32 %v13410_v34, %v7429_v40  ;;  %v7336_v0 = vadd.f32 %v9458_v16, %v7335_v36  ;;  %v10188_v5 = vpop.f32.mrf.mxu1 }
 0x51b   : > { %v9460_v46 = vpop.f32.mrf.mxu0 }
 0x51c   : > { %v7560_v50 = vadd.f32 %v13418_v57, %v7526_v62  ;;  %v7493_v30 = vmax.f32 %v7463_v52, 0.0  ;;  %v7430_v33 = vadd.f32 %v7336_v0, %v13344_v55  ;;  %v9461_v35 = vadd.f32 %v9460_v46, %v9459_v43  ;;  %v7343_v10 = vpop.f32.mrf.mxu1 }
 0x51d   : > { %v9462_v29 = vpop.f32.mrf.mxu0 }
 0x51e   : > { %7590 = vst [vmem:[%s13424_s4 + $0x30] sm:$0xff] %v7560_v50  ;;  %v7527_v22 = vmul.f32 %v13415_v1, %v7493_v30  ;;  %v7464_v19 = vadd.f32 %v13410_v34, %v7430_v33  ;;  %v7339_v12 = vadd.f32 %v9461_v35, %v7338_v32  ;;  %v10191_v31 = vpop.f32.mrf.mxu1 }
 0x51f   : > { %v9463_v18 = vpop.f32.mrf.mxu0 }
 0x520   : > { %v7561_v3 = vadd.f32 %v13418_v57, %v7527_v22  ;;  %v7494_v21 = vmax.f32 %v7464_v19, 0.0  ;;  %v7431_v54 = vadd.f32 %v7339_v12, %v13347_v60  ;;  %v9464_v51 = vadd.f32 %v9463_v18, %v9462_v29  ;;  %v7346_v55 = vpop.f32.mrf.mxu1 }
 0x521   : > { %v9465_v20 = vpop.f32.mrf.mxu0 }
 0x522   : > { %7591 = vst [vmem:[%s13424_s4 + $0x38] sm:$0xff] %v7561_v3  ;;  %v7528_v14 = vmul.f32 %v13415_v1, %v7494_v21  ;;  %v7465_v45 = vadd.f32 %v13410_v34, %v7431_v54  ;;  %v7344_v9 = vadd.f32 %v9464_v51, %v7343_v10  ;;  %v10192_v15 = vpop.f32.mrf.mxu1 }
 0x523   : > { %v9466_v37 = vpop.f32.mrf.mxu0 }
 0x524   : > { %v7562_v36 = vadd.f32 %v13418_v57, %v7528_v14  ;;  %v7495_v39 = vmax.f32 %v7465_v45, 0.0  ;;  %v7432_v11 = vadd.f32 %v7344_v9, %v13350_v2  ;;  %v9467_v59 = vadd.f32 %v9466_v37, %v9465_v20  ;;  %v7351_v60 = vpop.f32.mrf.mxu1 }
 0x525   : > { %v9468_v13 = vpop.f32.mrf.mxu0 }
 0x526   : > { %7592 = vst [vmem:[%s13424_s4 + $0x40] sm:$0xff] %v7562_v36  ;;  %v7529_v23 = vmul.f32 %v13415_v1, %v7495_v39  ;;  %v7466_v28 = vadd.f32 %v13410_v34, %v7432_v11  ;;  %v7347_v24 = vadd.f32 %v9467_v59, %v7346_v55  ;;  %v10195_v27 = vpop.f32.mrf.mxu1 }
 0x527   : > { %v9469_v40 = vpop.f32.mrf.mxu0 }
 0x528   : > { %v7563_v16 = vadd.f32 %v13418_v57, %v7529_v23  ;;  %v7496_v32 = vmax.f32 %v7466_v28, 0.0  ;;  %v7433_v43 = vadd.f32 %v7347_v24, %v13353_v26  ;;  %v9470_v62 = vadd.f32 %v9469_v40, %v9468_v13  ;;  %v7354_v2 = vpop.f32.mrf.mxu1 }
 0x529   : > { %v9471_v52 = vpop.f32.mrf.mxu0 }
 0x52a   : > { %7593 = vst [vmem:[%s13424_s4 + $0x48] sm:$0xff] %v7563_v16  ;;  %v7530_v0 = vmul.f32 %v13415_v1, %v7496_v32  ;;  %v7467_v5 = vadd.f32 %v13410_v34, %v7433_v43  ;;  %v7352_v46 = vadd.f32 %v9470_v62, %v7351_v60  ;;  %v10196_v50 = vpop.f32.mrf.mxu1 }
 0x52b   : > { %v9472_v30 = vpop.f32.mrf.mxu0 }
 0x52c   : > { %v7564_v33 = vadd.f32 %v13418_v57, %v7530_v0  ;;  %v7497_v35 = vmax.f32 %v7467_v5, 0.0  ;;  %v7434_v10 = vadd.f32 %v7352_v46, %v13356_v6  ;;  %v9473_v29 = vadd.f32 %v9472_v30, %v9471_v52  ;;  %v7359_v26 = vpop.f32.mrf.mxu1 }
 0x52d   : > { %v9474_v22 = vpop.f32.mrf.mxu0 }
 0x52e   : > { %7594 = vst [vmem:[%s13424_s4 + $0x50] sm:$0xff] %v7564_v33  ;;  %v7531_v19 = vmul.f32 %v13415_v1, %v7497_v35  ;;  %v7468_v12 = vadd.f32 %v13410_v34, %v7434_v10  ;;  %v7355_v31 = vadd.f32 %v9473_v29, %v7354_v2  ;;  %v10199_v18 = vpop.f32.mrf.mxu1 }
 0x52f   : > { %v9475_v3 = vpop.f32.mrf.mxu0 }
 0x530   : > { %v7565_v21 = vadd.f32 %v13418_v57, %v7531_v19  ;;  %v7498_v54 = vmax.f32 %v7468_v12, 0.0  ;;  %v7435_v51 = vadd.f32 %v7355_v31, %v13359_v17  ;;  %v9476_v55 = vadd.f32 %v9475_v3, %v9474_v22  ;;  %v7362_v6 = vpop.f32.mrf.mxu1 }
 0x531   : > { %v9477_v20 = vpop.f32.mrf.mxu0 }
 0x532   : > { %7595 = vst [vmem:[%s13424_s4 + $0x58] sm:$0xff] %v7565_v21  ;;  %v7532_v14 = vmul.f32 %v13415_v1, %v7498_v54  ;;  %v7469_v45 = vadd.f32 %v13410_v34, %v7435_v51  ;;  %v7360_v9 = vadd.f32 %v9476_v55, %v7359_v26  ;;  %v10200_v15 = vpop.f32.mrf.mxu1 }
 0x533   : > { %v9478_v37 = vpop.f32.mrf.mxu0 }
 0x534   : > { %v7566_v36 = vadd.f32 %v13418_v57, %v7532_v14  ;;  %v7499_v39 = vmax.f32 %v7469_v45, 0.0  ;;  %v7436_v11 = vadd.f32 %v7360_v9, %v13362_v44  ;;  %v9479_v59 = vadd.f32 %v9478_v37, %v9477_v20  ;;  %v7367_v17 = vpop.f32.mrf.mxu1 }
 0x535   : > { %v9480_v60 = vpop.f32.mrf.mxu0 }
 0x536   : > { %7596 = vst [vmem:[%s13424_s4 + $0x60] sm:$0xff] %v7566_v36  ;;  %v7533_v13 = vmul.f32 %v13415_v1, %v7499_v39  ;;  %v7470_v23 = vadd.f32 %v13410_v34, %v7436_v11  ;;  %v7363_v28 = vadd.f32 %v9479_v59, %v7362_v6  ;;  %v10203_v24 = vpop.f32.mrf.mxu1 }
 0x537   : > { %v9481_v27 = vpop.f32.mrf.mxu0 }
 0x538   : > { %v7567_v40 = vadd.f32 %v13418_v57, %v7533_v13  ;;  %v7500_v16 = vmax.f32 %v7470_v23, 0.0  ;;  %v7437_v32 = vadd.f32 %v7363_v28, %v13365_v49  ;;  %v9482_v43 = vadd.f32 %v9481_v27, %v9480_v60  ;;  %v7370_v44 = vpop.f32.mrf.mxu1 }
 0x539   : > { %v9483_v62 = vpop.f32.mrf.mxu0 }
 0x53a   : > { %7597 = vst [vmem:[%s13424_s4 + $0x68] sm:$0xff] %v7567_v40  ;;  %v7534_v2 = vmul.f32 %v13415_v1, %v7500_v16  ;;  %v7471_v52 = vadd.f32 %v13410_v34, %v7437_v32  ;;  %v7368_v0 = vadd.f32 %v9482_v43, %v7367_v17  ;;  %v10204_v5 = vpop.f32.mrf.mxu1 }
 0x53b   : > { %v9484_v46 = vpop.f32.mrf.mxu0 }
 0x53c   : > { %v7568_v50 = vadd.f32 %v13418_v57, %v7534_v2  ;;  %v7501_v30 = vmax.f32 %v7471_v52, 0.0  ;;  %v7438_v33 = vadd.f32 %v7368_v0, %v13368_v25  ;;  %v9485_v35 = vadd.f32 %v9484_v46, %v9483_v62  ;;  %v7375_v49 = vpop.f32.mrf.mxu1 }
 0x53d   : > { %v9486_v10 = vpop.f32.mrf.mxu0 }
 0x53e   : > { %7598 = vst [vmem:[%s13424_s4 + $0x70] sm:$0xff] %v7568_v50  ;;  %v7535_v29 = vmul.f32 %v13415_v1, %v7501_v30  ;;  %v7472_v26 = vadd.f32 %v13410_v34, %v7438_v33  ;;  %v7371_v22 = vadd.f32 %v9485_v35, %v7370_v44  ;;  %v10207_v19 = vpop.f32.mrf.mxu1 }
 0x53f   : > { %v9487_v12 = vpop.f32.mrf.mxu0 }
 0x540   : > { %v7569_v31 = vadd.f32 %v13418_v57, %v7535_v29  ;;  %v7502_v18 = vmax.f32 %v7472_v26, 0.0  ;;  %v7439_v3 = vadd.f32 %v7371_v22, %v13371_v8  ;;  %v9488_v21 = vadd.f32 %v9487_v12, %v9486_v10  ;;  %v7378_v25 = vpop.f32.mrf.mxu1 }
 0x541   : > { %v9489_v54 = vpop.f32.mrf.mxu0 }
 0x542   : > { %7599 = vst [vmem:[%s13424_s4 + $0x78] sm:$0xff] %v7569_v31  ;;  %v7536_v51 = vmul.f32 %v13415_v1, %v7502_v18  ;;  %v7473_v55 = vadd.f32 %v13410_v34, %v7439_v3  ;;  %v7376_v6 = vadd.f32 %v9488_v21, %v7375_v49  ;;  %v10208_v20 = vpop.f32.mrf.mxu1 }
 0x543   : > { %v9490_v14 = vpop.f32.mrf.mxu0 }
 0x544   : > { %v7570_v45 = vadd.f32 %v13418_v57, %v7536_v51  ;;  %v7503_v9 = vmax.f32 %v7473_v55, 0.0  ;;  %v7440_v15 = vadd.f32 %v7376_v6, %v13374_v7  ;;  %v9491_v37 = vadd.f32 %v9490_v14, %v9489_v54  ;;  %v7383_v8 = vpop.f32.mrf.mxu1 }
 0x545   : > { %v9492_v36 = vpop.f32.mrf.mxu0 }
 0x546   : > { %7600 = vst [vmem:[%s13424_s4 + $0x80] sm:$0xff] %v7570_v45  ;;  %v7537_v39 = vmul.f32 %v13415_v1, %v7503_v9  ;;  %v7474_v11 = vadd.f32 %v13410_v34, %v7440_v15  ;;  %v7379_v59 = vadd.f32 %v9491_v37, %v7378_v25  ;;  %v10211_v17 = vpop.f32.mrf.mxu1 }
 0x547   : > { %v9493_v60 = vpop.f32.mrf.mxu0 }
 0x548   : > { %v7571_v13 = vadd.f32 %v13418_v57, %v7537_v39  ;;  %v7504_v23 = vmax.f32 %v7474_v11, 0.0  ;;  %v7441_v28 = vadd.f32 %v7379_v59, %v13377_v58  ;;  %v9494_v24 = vadd.f32 %v9493_v60, %v9492_v36  ;;  %v7386_v7 = vpop.f32.mrf.mxu1 }
 0x549   : > { %v9495_v27 = vpop.f32.mrf.mxu0 }
 0x54a   : > { %7601 = vst [vmem:[%s13424_s4 + $0x88] sm:$0xff] %v7571_v13  ;;  %v7538_v40 = vmul.f32 %v13415_v1, %v7504_v23  ;;  %v7475_v16 = vadd.f32 %v13410_v34, %v7441_v28  ;;  %v7384_v32 = vadd.f32 %v9494_v24, %v7383_v8  ;;  %v10212_v43 = vpop.f32.mrf.mxu1 }
 0x54b   : > { %v9496_v44 = vpop.f32.mrf.mxu0 }
 0x54c   : > { %v7572_v62 = vadd.f32 %v13418_v57, %v7538_v40  ;;  %v7505_v2 = vmax.f32 %v7475_v16, 0.0  ;;  %v7442_v52 = vadd.f32 %v7384_v32, %v13380_v48  ;;  %v9497_v0 = vadd.f32 %v9496_v44, %v9495_v27  ;;  %v7391_v58 = vpop.f32.mrf.mxu1 }
 0x54d   : > { %v9498_v5 = vpop.f32.mrf.mxu0 }
 0x54e   : > { %7602 = vst [vmem:[%s13424_s4 + $0x90] sm:$0xff] %v7572_v62  ;;  %v7539_v46 = vmul.f32 %v13415_v1, %v7505_v2  ;;  %v7476_v50 = vadd.f32 %v13410_v34, %v7442_v52  ;;  %v7387_v30 = vadd.f32 %v9497_v0, %v7386_v7  ;;  %v10215_v33 = vpop.f32.mrf.mxu1 }
 0x54f   : > { %v9499_v35 = vpop.f32.mrf.mxu0 }
 0x550   : > { %v7573_v49 = vadd.f32 %v13418_v57, %v7539_v46  ;;  %v7506_v10 = vmax.f32 %v7476_v50, 0.0  ;;  %v7443_v29 = vadd.f32 %v7387_v30, %v13383_v56  ;;  %v9500_v26 = vadd.f32 %v9499_v35, %v9498_v5  ;;  %v7394_v48 = vpop.f32.mrf.mxu1 }
 0x551   : > { %v9501_v22 = vpop.f32.mrf.mxu0 }
 0x552   : > { %7603 = vst [vmem:[%s13424_s4 + $0x98] sm:$0xff] %v7573_v49  ;;  %v7540_v19 = vmul.f32 %v13415_v1, %v7506_v10  ;;  %v7477_v12 = vadd.f32 %v13410_v34, %v7443_v29  ;;  %v7392_v31 = vadd.f32 %v9500_v26, %v7391_v58  ;;  %v10216_v18 = vpop.f32.mrf.mxu1 }
 0x553   : > { %v9502_v3 = vpop.f32.mrf.mxu0 }
 0x554   : > { %v7574_v21 = vadd.f32 %v13418_v57, %v7540_v19  ;;  %v7507_v25 = vmax.f32 %v7477_v12, 0.0  ;;  %v7444_v54 = vadd.f32 %v7392_v31, %v13386_v53  ;;  %v9503_v51 = vadd.f32 %v9502_v3, %v9501_v22  ;;  %v7399_v56 = vpop.f32.mrf.mxu1 }
 0x555   : > { %v9504_v55 = vpop.f32.mrf.mxu0 }
 0x556   : > { %7604 = vst [vmem:[%s13424_s4 + $0xa0] sm:$0xff] %v7574_v21  ;;  %v7541_v6 = vmul.f32 %v13415_v1, %v7507_v25  ;;  %v7478_v20 = vadd.f32 %v13410_v34, %v7444_v54  ;;  %v7395_v14 = vadd.f32 %v9503_v51, %v7394_v48  ;;  %v10219_v45 = vpop.f32.mrf.mxu1 }
 0x557   : > { %v9505_v9 = vpop.f32.mrf.mxu0 }
 0x558   : > { %v7575_v15 = vadd.f32 %v13418_v57, %v7541_v6  ;;  %v7508_v37 = vmax.f32 %v7478_v20, 0.0  ;;  %v7445_v8 = vadd.f32 %v7395_v14, %v13389_v4  ;;  %v9506_v36 = vadd.f32 %v9505_v9, %v9504_v55  ;;  %v7402_v53 = vpop.f32.mrf.mxu1 }
 0x559   : > { %v9507_v39 = vpop.f32.mrf.mxu0 }
 0x55a   : > { %7605 = vst [vmem:[%s13424_s4 + $0xa8] sm:$0xff] %v7575_v15  ;;  %v7542_v11 = vmul.f32 %v13415_v1, %v7508_v37  ;;  %v7479_v59 = vadd.f32 %v13410_v34, %v7445_v8  ;;  %v7400_v17 = vadd.f32 %v9506_v36, %v7399_v56  ;;  %v10220_v60 = vpop.f32.mrf.mxu1 }
 0x55b   : > { %v9508_v13 = vpop.f32.mrf.mxu0 }
 0x55c   : > { %v7576_v23 = vadd.f32 %v13418_v57, %v7542_v11  ;;  %v7509_v28 = vmax.f32 %v7479_v59, 0.0  ;;  %v7446_v24 = vadd.f32 %v7400_v17, %v13392_v42  ;;  %v9509_v7 = vadd.f32 %v9508_v13, %v9507_v39  ;;  %v7407_v4 = vpop.f32.mrf.mxu1 }
 0x55d   : > { %v9510_v27 = vpop.f32.mrf.mxu0 }
 0x55e   : > { %7606 = vst [vmem:[%s13424_s4 + $0xb0] sm:$0xff] %v7576_v23  ;;  %v7543_v40 = vmul.f32 %v13415_v1, %v7509_v28  ;;  %v7480_v16 = vadd.f32 %v13410_v34, %v7446_v24  ;;  %v7403_v32 = vadd.f32 %v9509_v7, %v7402_v53  ;;  %v10223_v43 = vpop.f32.mrf.mxu1 }
 0x55f   : > { %v9511_v44 = vpop.f32.mrf.mxu0 }
 0x560   : > { %v7577_v62 = vadd.f32 %v13418_v57, %v7543_v40  ;;  %v7510_v2 = vmax.f32 %v7480_v16, 0.0  ;;  %v7447_v52 = vadd.f32 %v7403_v32, %v13395_v41  ;;  %v9512_v0 = vadd.f32 %v9511_v44, %v9510_v27  ;;  %v7410_v42 = vpop.f32.mrf.mxu1 }
 0x561   : > { %v9513_v58 = vpop.f32.mrf.mxu0 }
 0x562   : > { %7607 = vst [vmem:[%s13424_s4 + $0xb8] sm:$0xff] %v7577_v62  ;;  %v7544_v5 = vmul.f32 %v13415_v1, %v7510_v2  ;;  %v7481_v46 = vadd.f32 %v13410_v34, %v7447_v52  ;;  %v7408_v50 = vadd.f32 %v9512_v0, %v7407_v4  ;;  %v10224_v30 = vpop.f32.mrf.mxu1 }
 0x563   : > { %v9514_v33 = vpop.f32.mrf.mxu0 }
 0x564   : > { %v7578_v35 = vadd.f32 %v13418_v57, %v7544_v5  ;;  %v7511_v49 = vmax.f32 %v7481_v46, 0.0  ;;  %v7448_v10 = vadd.f32 %v7408_v50, %v13398_v47  ;;  %v9515_v29 = vadd.f32 %v9514_v33, %v9513_v58  ;;  %v7415_v41 = vpop.f32.mrf.mxu1 }
 0x565   : > { %v9516_v26 = vpop.f32.mrf.mxu0 }
 0x566   : > { %7608 = vst [vmem:[%s13424_s4 + $0xc0] sm:$0xff] %v7578_v35  ;;  %v7545_v48 = vmul.f32 %v13415_v1, %v7511_v49  ;;  %v7482_v22 = vadd.f32 %v13410_v34, %v7448_v10  ;;  %v7411_v19 = vadd.f32 %v9515_v29, %v7410_v42  ;;  %v10227_v12 = vpop.f32.mrf.mxu1 }
 0x567   : > { %v9517_v31 = vpop.f32.mrf.mxu0 }
 0x568   : > { %v7579_v18 = vadd.f32 %v13418_v57, %v7545_v48  ;;  %v7512_v3 = vmax.f32 %v7482_v22, 0.0  ;;  %v7449_v21 = vadd.f32 %v7411_v19, %v13401_v63  ;;  %v9518_v25 = vadd.f32 %v9517_v31, %v9516_v26  ;;  %v7418_v47 = vpop.f32.mrf.mxu1 }
 0x569   : > { %v9519_v54 = vpop.f32.mrf.mxu0 }
 0x56a   : > { %7609 = vst [vmem:[%s13424_s4 + $0xc8] sm:$0xff] %v7579_v18  ;;  %v7546_v51 = vmul.f32 %v13415_v1, %v7512_v3  ;;  %v7483_v56 = vadd.f32 %v13410_v34, %v7449_v21  ;;  %v7416_v55 = vadd.f32 %v9518_v25, %v7415_v41  ;;  %v10228_v6 = vpop.f32.mrf.mxu1 }
 0x56b   : > { %v9520_v20 = vpop.f32.mrf.mxu0 }
 0x56c   : > { %v7580_v14 = vadd.f32 %v13418_v57, %v7546_v51  ;;  %v7513_v45 = vmax.f32 %v7483_v56, 0.0  ;;  %v7450_v9 = vadd.f32 %v7416_v55, %v13404_v61  ;;  %v9521_v63 = vadd.f32 %v9520_v20, %v9519_v54 }
 0x56e   : > { %7610 = vst [vmem:[%s13424_s4 + $0xd0] sm:$0xff] %v7580_v14  ;;  %v7547_v15 = vmul.f32 %v13415_v1, %v7513_v45  ;;  %v7484_v37 = vadd.f32 %v13410_v34, %v7450_v9  ;;  %v7419_v8 = vadd.f32 %v9521_v63, %v7418_v47 }
 0x570   : > { %v7581_v36 = vadd.f32 %v13418_v57, %v7547_v15  ;;  %v7514_v53 = vmax.f32 %v7484_v37, 0.0  ;;  %v7451_v39 = vadd.f32 %v7419_v8, %v13408_v38 }
 0x572   : > { %7611 = vst [vmem:[%s13424_s4 + $0xd8] sm:$0xff] %v7581_v36  ;;  %v7548_v11 = vmul.f32 %v13415_v1, %v7514_v53  ;;  %v7485_v61 = vadd.f32 %v13410_v34, %v7451_v39 }
 0x574   : > { %v7582_v59 = vadd.f32 %v13418_v57, %v7548_v11  ;;  %v7515_v17 = vmax.f32 %v7485_v61, 0.0 }
 0x576   : > { %7612 = vst [vmem:[%s13424_s4 + $0xe0] sm:$0xff] %v7582_v59  ;;  %v7549_v60 = vmul.f32 %v13415_v1, %v7515_v17 }
 0x578   : > { %v7583_v38 = vadd.f32 %v13418_v57, %v7549_v60 }
 0x57a   : > { %7613 = vst [vmem:[%s13424_s4 + $0xe8] sm:$0xff] %v7583_v38 }
 0x57b   : > { %11038 = shalt.err (!%p11035_p2)
}
 0x57c   : > { %s11039_s6 = scalar_lea.hbm %s13572_s25, 3840  ;;  %s11043_s11 = scalar_lea.hbm %s13626_s3, 11520 }
 0x57d   : > { %p11040_p4 = scmp.ne.s32.totalorder %s13572_s25, %s11039_s6  ;;  %p11044_p6 = scmp.lt.s32.totalorder %s13572_s25, %s13626_s3 }
 0x57e   : > { %p11045_p3 = scmp.lt.s32.totalorder %s11043_s11, %s11039_s6 }
 0x57f   : > { %p11041_p9 = pnand %p11040_p4, %p13766_p13 }
 0x580   : > { %p11046_p8 = por %p11045_p3, %p11044_p6 }
 0x581   : > { %p11042_p11 = pneg %p11041_p9 }
 0x583   : > { %p11047_p10 = pnand %p11046_p8, %p11042_p11 }
 0x585   : > { %11050 = shalt.err (!%p11047_p10)
}
 0x586   : > { %s11121_s28 = smov 128   ;;  %s11122_s4 = smov 384  }
 0x587   : > { %s11123_s19 = smov 8  }
 0x588   : > { %10240 = dma.vmem_to_hbm [thread:$0]  (%p13766_p13), %s13574_s21, 3840, %s13572_s25, %s7615_s15, %s11121_s28, %s11122_s4, %s11123_s19  }
 0x589 PF: > { %p10260_p0 = scmp.ge.s32.totalorder %s11109_s17, 2  ;;  %s7644_s30 = sand.u32 1, %s11089_s12  }
 0x58a   : > { %p13767_p5 = scmp.ne.s32.totalorder %s13644_s27, 0  ;;  %s7645_s22 = scalar_lea.sflag [#allocation4], %s7644_s30 }
 0x58c   : > { %p10254_p12 = pnand %p10260_p0, %p13767_p5 }
 0x58e   : > { %p10255_p7 = pneg %p10254_p12 }
 0x590   : > { %11084 = dma.done.wait (%p10255_p7), %s7645_s22, 3840  }
 0x591   : > { %11086 = vsyncadd (%p10255_p7), %s7645_s22, 4294963456  ;;  %s20_s17 = sadd.s32 1, %s11109_s17   ;;  %s13768_s12 = smov %s11093_s13 }
 0x592   : > { %p17_p1 = scmp.ge.s32.totalorder %s20_s17, 5   ;;  %s13769_s13 = smov %s11097_s14 }
 0x593   : > { %s13770_s14 = smov %s11190_s23  ;;  %s13771_s15 = smov %s11105_s16 }
 0x594   : > { %s13772_s16 = smov %s13774_s18  ;;  %19 = sbr.rel (!%p17_p1) target bundleno = 9 (0x9), region = 94 }
 0x599   :  { %7650 = vsyncpa [#allocation3], 1 }
 0x59a   :  { %7652 = vsyncpa [#allocation3 + $0x1], 1 }
 0x59b   :  { %7653 = vsyncpa [#allocation6], 1 }
 0x59c   :  { %7655 = vsyncpa [#allocation6 + $0x1], 1 }
 0x59d   :  { %7656 = vsyncpa [#allocation4], 1 }
 0x59e   :  { %7658 = vsyncpa [#allocation4 + $0x1], 1 }

</bundles_post_ra>
